<compile_context>
chip_gen: v7x
topology: tpu7x:2x2x1
jax: 0.10.0
libtpu: 0.0.40
codegen_flags: <defaults>
</compile_context>

<pallas_src>
import math
import functools

import jax
import jax.numpy as jnp
from jax.experimental import pallas as pl
from jax.experimental.pallas import tpu as pltpu

NEG_INF = -1.0e9


# ----------------------------- in-kernel helpers -----------------------------

def _layernorm(z, g, b):
    # LayerNorm over last axis, eps=1e-5, biased variance (PyTorch default).
    mu = jnp.mean(z, axis=-1, keepdims=True)
    zc = z - mu
    var = jnp.mean(zc * zc, axis=-1, keepdims=True)
    return zc * jax.lax.rsqrt(var + 1e-5) * g + b


def _mha(q2d, k2d, v2d, add_mask, B, Sq, Sk, H, dk):
    """Head-batched attention.

    q2d: (B*Sq, H*dk) f32 (1/sqrt(dk) already folded into W_q).
    k2d, v2d: (B*Sk, H*dk) f32.
    add_mask: additive f32 mask broadcastable to (B, H, Sq, Sk).
    Returns (B*Sq, H*dk) f32.
    """
    def split(t, s):
        # (B*s, H*dk) -> (B*H, s, dk): heads become a matmul batch dim.
        return (t.reshape(B, s, H, dk).transpose(0, 2, 1, 3)
                 .reshape(B * H, s, dk).astype(jnp.bfloat16))

    qh, kh, vh = split(q2d, Sq), split(k2d, Sk), split(v2d, Sk)

    s = jnp.einsum("bqd,bkd->bqk", qh, kh,
                   preferred_element_type=jnp.float32)        # (B*H, Sq, Sk)
    s = s.reshape(B, H, Sq, Sk) + add_mask
    s = s - jnp.max(s, axis=-1, keepdims=True)
    p = jnp.exp(s)
    p = p * pl.reciprocal(jnp.sum(p, axis=-1, keepdims=True), approx=True)
    o = jnp.einsum("bqk,bkd->bqd",
                   p.reshape(B * H, Sq, Sk).astype(jnp.bfloat16), vh,
                   preferred_element_type=jnp.float32)        # (B*H, Sq, dk)
    # combine heads back onto the lane axis (no per-head concatenate).
    return (o.reshape(B, H, Sq, dk).transpose(0, 2, 1, 3)
             .reshape(B * Sq, H * dk))


# ----------------------------- fused kernels -----------------------------

def encoder_layer_kernel(x_ref, kmask_ref, wqkv_ref, wo_ref, w1_ref, w2_ref,
                         vec_ref, o_ref, *, num_heads):
    B, S, D = x_ref.shape
    F = w1_ref.shape[1]
    H, dk = num_heads, D // num_heads

    x_bf = x_ref[...].reshape(B * S, D)          # bf16, batch folded into rows
    x = x_bf.astype(jnp.float32)
    vec = vec_ref[...]                           # packed biases / LN params

    # fused QKV projection over (B*S, D) rows; the :D splits are 128-aligned
    # at production d_model.
    qkv = jnp.dot(x_bf, wqkv_ref[...],
                  preferred_element_type=jnp.float32) + vec[0:1, :3 * D]
    kmask4 = kmask_ref[...][:, None, None, :]    # key-pad mask (B,1,1,S)
    attn = _mha(qkv[:, :D], qkv[:, D:2 * D], qkv[:, 2 * D:], kmask4,
                B, S, S, H, dk)
    proj = jnp.dot(attn.astype(jnp.bfloat16), wo_ref[...],
                   preferred_element_type=jnp.float32) + vec[1:2, :D]
    x1 = _layernorm(x + proj, vec[2:3, :D], vec[3:4, :D])

    # position-wise FFN
    h = jnp.maximum(jnp.dot(x1.astype(jnp.bfloat16), w1_ref[...],
                            preferred_element_type=jnp.float32) + vec[4:5, :F],
                    0.0)
    f = jnp.dot(h.astype(jnp.bfloat16), w2_ref[...],
                preferred_element_type=jnp.float32) + vec[5:6, :D]
    y = _layernorm(x1 + f, vec[6:7, :D], vec[7:8, :D])
    o_ref[...] = y.reshape(B, S, D).astype(o_ref.dtype)


def decoder_layer_kernel(x_ref, enc_ref, qpad_ref, smask_ref,
                         wqkv_s_ref, wo_s_ref, wq_c_ref, wkv_c_ref, wo_c_ref,
                         w1_ref, w2_ref, vec_ref, o_ref, *, num_heads):
    B, St, D = x_ref.shape
    Ss = enc_ref.shape[1]
    F = w1_ref.shape[1]
    H, dk = num_heads, D // num_heads

    x_bf = x_ref[...].reshape(B * St, D)
    x = x_bf.astype(jnp.float32)
    enc_bf = enc_ref[...].reshape(B * Ss, D)
    vec = vec_ref[...]

    # causal mask built in-kernel (no (B,St,St) DMA); query-pad mask additive.
    row = jax.lax.broadcasted_iota(jnp.int32, (St, St), 0)
    col = jax.lax.broadcasted_iota(jnp.int32, (St, St), 1)
    causal = jnp.where(row >= col, jnp.float32(0.0), jnp.float32(NEG_INF))
    self_mask4 = qpad_ref[...][:, None, :, None] + causal[None, None, :, :]
    cross_mask4 = smask_ref[...][:, None, None, :]

    # --- masked self-attention ---
    qkv = jnp.dot(x_bf, wqkv_s_ref[...],
                  preferred_element_type=jnp.float32) + vec[0:1, :3 * D]
    a_s = _mha(qkv[:, :D], qkv[:, D:2 * D], qkv[:, 2 * D:], self_mask4,
               B, St, St, H, dk)
    p_s = jnp.dot(a_s.astype(jnp.bfloat16), wo_s_ref[...],
                  preferred_element_type=jnp.float32) + vec[1:2, :D]
    x1 = _layernorm(x + p_s, vec[2:3, :D], vec[3:4, :D])

    # --- cross-attention (Q from decoder, fused KV from encoder output) ---
    qc = jnp.dot(x1.astype(jnp.bfloat16), wq_c_ref[...],
                 preferred_element_type=jnp.float32) + vec[4:5, :D]
    kv = jnp.dot(enc_bf, wkv_c_ref[...],
                 preferred_element_type=jnp.float32) + vec[5:6, :2 * D]
    a_c = _mha(qc, kv[:, :D], kv[:, D:], cross_mask4, B, St, Ss, H, dk)
    p_c = jnp.dot(a_c.astype(jnp.bfloat16), wo_c_ref[...],
                  preferred_element_type=jnp.float32) + vec[6:7, :D]
    x2 = _layernorm(x1 + p_c, vec[7:8, :D], vec[8:9, :D])

    # --- position-wise FFN ---
    h = jnp.maximum(jnp.dot(x2.astype(jnp.bfloat16), w1_ref[...],
                            preferred_element_type=jnp.float32) + vec[9:10, :F],
                    0.0)
    f = jnp.dot(h.astype(jnp.bfloat16), w2_ref[...],
                preferred_element_type=jnp.float32) + vec[10:11, :D]
    y = _layernorm(x2 + f, vec[11:12, :D], vec[12:13, :D])
    o_ref[...] = y.reshape(B, St, D).astype(o_ref.dtype)


def final_linear_kernel(x_ref, w_ref, b_ref, o_ref):
    # x: (B*St, D) bf16, w: (D, Vpad) bf16, output lane-dense (Vpad % 128 == 0).
    o_ref[...] = (jnp.dot(x_ref[...], w_ref[...],
                          preferred_element_type=jnp.float32) + b_ref[...])


# ----------------------------- pallas wrappers -----------------------------

def _fullspec(shape):
    n = len(shape)
    return pl.BlockSpec(shape, lambda i, n=n: (0,) * n)


def pallas_encoder_layer(x, src_key_mask, p, *, num_heads):
    B, S, D = x.shape
    kern = functools.partial(encoder_layer_kernel, num_heads=num_heads)
    args = (x, src_key_mask, p["w_qkv"], p["w_o"], p["ff_w1"], p["ff_w2"],
            p["vec"])
    return pl.pallas_call(
        kern,
        out_shape=jax.ShapeDtypeStruct((B, S, D), jnp.bfloat16),
        grid=(1,),
        in_specs=[_fullspec(a.shape) for a in args],
        out_specs=_fullspec((B, S, D)),
        compiler_params=pltpu.CompilerParams(
            dimension_semantics=("arbitrary",)),
    )(*args)


def pallas_decoder_layer(x, enc_out, tgt_qpad_mask, src_key_mask, p, *,
                         num_heads):
    B, St, D = x.shape
    kern = functools.partial(decoder_layer_kernel, num_heads=num_heads)
    args = (x, enc_out, tgt_qpad_mask, src_key_mask,
            p["w_qkv_s"], p["w_o_s"], p["w_q_c"], p["w_kv_c"], p["w_o_c"],
            p["ff_w1"], p["ff_w2"], p["vec"])
    return pl.pallas_call(
        kern,
        out_shape=jax.ShapeDtypeStruct((B, St, D), jnp.bfloat16),
        grid=(1,),
        in_specs=[_fullspec(a.shape) for a in args],
        out_specs=_fullspec((B, St, D)),
        compiler_params=pltpu.CompilerParams(
            dimension_semantics=("arbitrary",)),
    )(*args)


def pallas_final_linear(x2d, w, b):
    M, _ = x2d.shape
    N = w.shape[1]
    args = (x2d, w, b)
    return pl.pallas_call(
        final_linear_kernel,
        out_shape=jax.ShapeDtypeStruct((M, N), jnp.float32),
        grid=(1,),
        in_specs=[_fullspec(a.shape) for a in args],
        out_specs=_fullspec((M, N)),
        compiler_params=pltpu.CompilerParams(
            dimension_semantics=("arbitrary",)),
    )(*args)


# ----------------------------- model glue -----------------------------

def sinusoidal_pe(max_len, d_model):
    pos = jnp.arange(max_len, dtype=jnp.float32)[:, None]
    div = jnp.exp(jnp.arange(0, d_model, 2, dtype=jnp.float32)
                  * (-math.log(10000.0) / d_model))
    pe = jnp.zeros((max_len, d_model), dtype=jnp.float32)
    pe = pe.at[:, 0::2].set(jnp.sin(pos * div))
    pe = pe.at[:, 1::2].set(jnp.cos(pos * div))
    return pe


def transformer_forward(params, src, tgt, *, num_heads, tgt_vocab):
    B, Ss = src.shape
    St = tgt.shape[1]
    D = params["enc_emb"].shape[1]

    neg = jnp.float32(NEG_INF)
    src_key_mask = jnp.where(src != 0, 0.0, neg).astype(jnp.float32)   # (B,Ss)
    tgt_qpad_mask = jnp.where(tgt != 0, 0.0, neg).astype(jnp.float32)  # (B,St)

    pe = params["pos_enc"]
    enc_x = (params["enc_emb"][src] + pe[None, :Ss, :]).astype(jnp.bfloat16)
    dec_x = (params["dec_emb"][tgt] + pe[None, :St, :]).astype(jnp.bfloat16)
    # dropout(p) is identity at inference

    for lp in params["enc_layers"]:
        enc_x = pallas_encoder_layer(enc_x, src_key_mask, lp,
                                     num_heads=num_heads)
    for lp in params["dec_layers"]:
        dec_x = pallas_decoder_layer(dec_x, enc_x, tgt_qpad_mask, src_key_mask,
                                     lp, num_heads=num_heads)

    logits_p = pallas_final_linear(dec_x.reshape(B * St, D),
                                   params["fc_w"], params["fc_b"])
    return logits_p[:, :tgt_vocab].reshape(B, St, tgt_vocab)


# ----------------------------- parameter init -----------------------------

def _round_up(x, m):
    return ((x + m - 1) // m) * m


def _pack_vec(rows, width, n_rows):
    out = jnp.zeros((n_rows, width), jnp.float32)
    for i, r in enumerate(rows):
        r = jnp.asarray(r, jnp.float32).reshape(-1)
        out = out.at[i, :r.shape[0]].set(r)
    return out


def init_linear(key, in_dim, out_dim):
    k1, k2 = jax.random.split(key)
    bound = 1.0 / math.sqrt(in_dim)
    w = jax.random.uniform(k1, (in_dim, out_dim), jnp.float32, -bound, bound)
    b = jax.random.uniform(k2, (out_dim,), jnp.float32, -bound, bound)
    return w, b


def init_enc_layer(key, d_model, num_heads, d_ff, vec_width):
    ks = jax.random.split(key, 6)
    scale = 1.0 / math.sqrt(d_model // num_heads)       # folded into W_q / b_q
    wq, bq = init_linear(ks[0], d_model, d_model)
    wk, bk = init_linear(ks[1], d_model, d_model)
    wv, bv = init_linear(ks[2], d_model, d_model)
    wo, bo = init_linear(ks[3], d_model, d_model)
    w1, b1 = init_linear(ks[4], d_model, d_ff)
    w2, b2 = init_linear(ks[5], d_ff, d_model)
    ones = jnp.ones((d_model,), jnp.float32)
    zeros = jnp.zeros((d_model,), jnp.float32)
    w_qkv = jnp.concatenate([wq * scale, wk, wv], axis=1)
    b_qkv = jnp.concatenate([bq * scale, bk, bv], axis=0)
    vec = _pack_vec([b_qkv, bo, ones, zeros, b1, b2, ones, zeros],
                    vec_width, 8)
    return dict(w_qkv=w_qkv.astype(jnp.bfloat16), w_o=wo.astype(jnp.bfloat16),
                ff_w1=w1.astype(jnp.bfloat16), ff_w2=w2.astype(jnp.bfloat16),
                vec=vec)


def init_dec_layer(key, d_model, num_heads, d_ff, vec_width):
    ks = jax.random.split(key, 10)
    scale = 1.0 / math.sqrt(d_model // num_heads)
    wq_s, bq_s = init_linear(ks[0], d_model, d_model)
    wk_s, bk_s = init_linear(ks[1], d_model, d_model)
    wv_s, bv_s = init_linear(ks[2], d_model, d_model)
    wo_s, bo_s = init_linear(ks[3], d_model, d_model)
    wq_c, bq_c = init_linear(ks[4], d_model, d_model)
    wk_c, bk_c = init_linear(ks[5], d_model, d_model)
    wv_c, bv_c = init_linear(ks[6], d_model, d_model)
    wo_c, bo_c = init_linear(ks[7], d_model, d_model)
    w1, b1 = init_linear(ks[8], d_model, d_ff)
    w2, b2 = init_linear(ks[9], d_ff, d_model)
    ones = jnp.ones((d_model,), jnp.float32)
    zeros = jnp.zeros((d_model,), jnp.float32)
    w_qkv_s = jnp.concatenate([wq_s * scale, wk_s, wv_s], axis=1)
    b_qkv_s = jnp.concatenate([bq_s * scale, bk_s, bv_s], axis=0)
    w_kv_c = jnp.concatenate([wk_c, wv_c], axis=1)
    b_kv_c = jnp.concatenate([bk_c, bv_c], axis=0)
    vec = _pack_vec([b_qkv_s, bo_s, ones, zeros,
                     bq_c * scale, b_kv_c, bo_c, ones, zeros,
                     b1, b2, ones, zeros], vec_width, 16)
    return dict(
        w_qkv_s=w_qkv_s.astype(jnp.bfloat16), w_o_s=wo_s.astype(jnp.bfloat16),
        w_q_c=(wq_c * scale).astype(jnp.bfloat16),
        w_kv_c=w_kv_c.astype(jnp.bfloat16), w_o_c=wo_c.astype(jnp.bfloat16),
        ff_w1=w1.astype(jnp.bfloat16), ff_w2=w2.astype(jnp.bfloat16),
        vec=vec)


def init_transformer(key, src_vocab, tgt_vocab, d_model, num_heads, num_layers,
                     d_ff, max_seq_length):
    vec_width = _round_up(max(3 * d_model, d_ff), 128)
    keys = jax.random.split(key, 2 * num_layers + 3)
    enc_layers = [init_enc_layer(keys[i], d_model, num_heads, d_ff, vec_width)
                  for i in range(num_layers)]
    dec_layers = [init_dec_layer(keys[num_layers + i], d_model, num_heads,
                                 d_ff, vec_width)
                  for i in range(num_layers)]
    fc_w, fc_b = init_linear(keys[-3], d_model, tgt_vocab)
    vpad = _round_up(tgt_vocab, 128)                     # lane-dense output
    fc_w_p = jnp.zeros((d_model, vpad), jnp.float32).at[:, :tgt_vocab].set(fc_w)
    fc_b_p = jnp.zeros((1, vpad), jnp.float32).at[0, :tgt_vocab].set(fc_b)
    enc_emb = jax.random.normal(keys[-2], (src_vocab, d_model), jnp.float32)
    dec_emb = jax.random.normal(keys[-1], (tgt_vocab, d_model), jnp.float32)
    return dict(enc_layers=enc_layers, dec_layers=dec_layers,
                fc_w=fc_w_p.astype(jnp.bfloat16), fc_b=fc_b_p,
                enc_emb=enc_emb, dec_emb=dec_emb,
                pos_enc=sinusoidal_pe(max_seq_length, d_model))


# ----------------------------- main -----------------------------

if __name__ == "__main__":
    src_vocab_size = 33
    tgt_vocab_size = 33
    d_model = 32
    num_heads = 4
    num_layers = 2
    d_ff = 64
    max_seq_length = 16
    batch = 2
    seq = 8

    root = jax.random.PRNGKey(0)
    k_params, k_src, k_tgt = jax.random.split(root, 3)

    params = init_transformer(k_params, src_vocab_size, tgt_vocab_size,
                              d_model, num_heads, num_layers, d_ff,
                              max_seq_length)

    # token ids (include zeros so padding masks are exercised)
    src = jax.random.randint(k_src, (batch, seq), 0, src_vocab_size,
                             dtype=jnp.int32)
    tgt = jax.random.randint(k_tgt, (batch, seq), 0, tgt_vocab_size,
                             dtype=jnp.int32)

    fwd = jax.jit(functools.partial(transformer_forward,
                                    num_heads=num_heads,
                                    tgt_vocab=tgt_vocab_size))
    out = fwd(params, src, tgt)
    jax.block_until_ready(out)

    assert out.shape == (batch, seq, tgt_vocab_size)
    assert bool(jnp.all(jnp.isfinite(out)))
    print("KERNEL_OK")
</pallas_src>

<mosaic_0001>
module attributes {stable_mosaic.version = 11 : i64} {
  func.func @final_linear_kernel(%arg0: i32, %arg1: memref<16x32xbf16, #tpu.memory_space<vmem>>, %arg2: memref<32x128xbf16, #tpu.memory_space<vmem>>, %arg3: memref<1x128xf32, #tpu.memory_space<vmem>>, %arg4: memref<16x128xf32, #tpu.memory_space<vmem>>) attributes {dimension_semantics = [#tpu.dimension_semantics<arbitrary>], iteration_bounds = array<i64: 1>, scalar_prefetch = 0 : i64, scratch_operands = 0 : i64, tpu.core_type = #tpu.core_type<tc>, window_params = [{pipeline_mode = #tpu.pipeline_mode<synchronous>, transform_indices = @transform_0, window_bounds = array<i64: 16, 32>}, {pipeline_mode = #tpu.pipeline_mode<synchronous>, transform_indices = @transform_1, window_bounds = array<i64: 32, 128>}, {pipeline_mode = #tpu.pipeline_mode<synchronous>, transform_indices = @transform_2, window_bounds = array<i64: 1, 128>}, {pipeline_mode = #tpu.pipeline_mode<synchronous>, transform_indices = @transform_3, window_bounds = array<i64: 16, 128>}]} {
    %c0 = arith.constant 0 : index
    %c0_0 = arith.constant 0 : index
    %0 = vector.load %arg1[%c0, %c0_0] : memref<16x32xbf16, #tpu.memory_space<vmem>>, vector<16x32xbf16>
    %c0_1 = arith.constant 0 : index
    %c0_2 = arith.constant 0 : index
    %1 = vector.load %arg2[%c0_1, %c0_2] : memref<32x128xbf16, #tpu.memory_space<vmem>>, vector<32x128xbf16>
    %cst = arith.constant dense<0.000000e+00> : vector<16x128xf32>
    %2 = tpu.matmul %0, %1, %cst {dimension_numbers = #tpu.dot_dimension_numbers<[1], [0], [0], [1], [0, 0, 1, 1], [], []>} : vector<16x32xbf16>, vector<32x128xbf16>, vector<16x128xf32> -> vector<16x128xf32>
    %c0_3 = arith.constant 0 : index
    %c0_4 = arith.constant 0 : index
    %3 = vector.load %arg3[%c0_3, %c0_4] : memref<1x128xf32, #tpu.memory_space<vmem>>, vector<1x128xf32>
    %4 = vector.broadcast %3 : vector<1x128xf32> to vector<16x128xf32>
    %5 = arith.addf %2, %4 : vector<16x128xf32>
    %c0_5 = arith.constant 0 : index
    %c0_6 = arith.constant 0 : index
    %6 = vector.load %arg4[%c0_5, %c0_6] : memref<16x128xf32, #tpu.memory_space<vmem>>, vector<16x128xf32>
    tpu.vector_store %arg4[%c0_5, %c0_6], %5 {strides = array<i32>} : memref<16x128xf32, #tpu.memory_space<vmem>>, vector<16x128xf32>,
    return
  }
  func.func @transform_0(%arg0: i32) -> (i32, i32) {
    %c0_i32 = arith.constant 0 : i32
    %c0_i32_0 = arith.constant 0 : i32
    %c0_i32_1 = arith.constant 0 : i32
    return %c0_i32, %c0_i32_0 : i32, i32
  }
  func.func @transform_1(%arg0: i32) -> (i32, i32) {
    %c0_i32 = arith.constant 0 : i32
    %c0_i32_0 = arith.constant 0 : i32
    %c0_i32_1 = arith.constant 0 : i32
    return %c0_i32, %c0_i32_0 : i32, i32
  }
  func.func @transform_2(%arg0: i32) -> (i32, i32) {
    %c0_i32 = arith.constant 0 : i32
    %c0_i32_0 = arith.constant 0 : i32
    %c0_i32_1 = arith.constant 0 : i32
    return %c0_i32, %c0_i32_0 : i32, i32
  }
  func.func @transform_3(%arg0: i32) -> (i32, i32) {
    %c0_i32 = arith.constant 0 : i32
    %c0_i32_0 = arith.constant 0 : i32
    %c0_i32_1 = arith.constant 0 : i32
    return %c0_i32, %c0_i32_0 : i32, i32
  }
}

module attributes {stable_mosaic.version = 11 : i64} {
  func.func @encoder_layer_kernel(%arg0: i32, %arg1: memref<2x8x32xbf16, #tpu.memory_space<vmem>>, %arg2: memref<2x8xf32, #tpu.memory_space<vmem>>, %arg3: memref<32x96xbf16, #tpu.memory_space<vmem>>, %arg4: memref<32x32xbf16, #tpu.memory_space<vmem>>, %arg5: memref<32x64xbf16, #tpu.memory_space<vmem>>, %arg6: memref<64x32xbf16, #tpu.memory_space<vmem>>, %arg7: memref<8x128xf32, #tpu.memory_space<vmem>>, %arg8: memref<2x8x32xbf16, #tpu.memory_space<vmem>>) attributes {dimension_semantics = [#tpu.dimension_semantics<arbitrary>], iteration_bounds = array<i64: 1>, scalar_prefetch = 0 : i64, scratch_operands = 0 : i64, tpu.core_type = #tpu.core_type<tc>, window_params = [{pipeline_mode = #tpu.pipeline_mode<synchronous>, transform_indices = @transform_0, window_bounds = array<i64: 2, 8, 32>}, {pipeline_mode = #tpu.pipeline_mode<synchronous>, transform_indices = @transform_1, window_bounds = array<i64: 2, 8>}, {pipeline_mode = #tpu.pipeline_mode<synchronous>, transform_indices = @transform_2, window_bounds = array<i64: 32, 96>}, {pipeline_mode = #tpu.pipeline_mode<synchronous>, transform_indices = @transform_3, window_bounds = array<i64: 32, 32>}, {pipeline_mode = #tpu.pipeline_mode<synchronous>, transform_indices = @transform_4, window_bounds = array<i64: 32, 64>}, {pipeline_mode = #tpu.pipeline_mode<synchronous>, transform_indices = @transform_5, window_bounds = array<i64: 64, 32>}, {pipeline_mode = #tpu.pipeline_mode<synchronous>, transform_indices = @transform_6, window_bounds = array<i64: 8, 128>}, {pipeline_mode = #tpu.pipeline_mode<synchronous>, transform_indices = @transform_7, window_bounds = array<i64: 2, 8, 32>}]} {
    %c0 = arith.constant 0 : index
    %c0_0 = arith.constant 0 : index
    %c0_1 = arith.constant 0 : index
    %0 = vector.load %arg1[%c0, %c0_0, %c0_1] : memref<2x8x32xbf16, #tpu.memory_space<vmem>>, vector<2x8x32xbf16>
    %1 = vector.shape_cast %0 : vector<2x8x32xbf16> to vector<16x32xbf16>
    %2 = arith.extf %1 : vector<16x32xbf16> to vector<16x32xf32>
    %c0_2 = arith.constant 0 : index
    %c0_3 = arith.constant 0 : index
    %3 = vector.load %arg7[%c0_2, %c0_3] : memref<8x128xf32, #tpu.memory_space<vmem>>, vector<8x128xf32>
    %c0_4 = arith.constant 0 : index
    %c0_5 = arith.constant 0 : index
    %4 = vector.load %arg3[%c0_4, %c0_5] : memref<32x96xbf16, #tpu.memory_space<vmem>>, vector<32x96xbf16>
    %cst = arith.constant dense<0.000000e+00> : vector<16x96xf32>
    %5 = tpu.matmul %1, %4, %cst {dimension_numbers = #tpu.dot_dimension_numbers<[1], [0], [0], [1], [0, 0, 1, 1], [], []>} : vector<16x32xbf16>, vector<32x96xbf16>, vector<16x96xf32> -> vector<16x96xf32>
    %6 = vector.extract_strided_slice %3 {offsets = [0, 0], sizes = [1, 96], strides = [1, 1]} : vector<8x128xf32> to vector<1x96xf32>
    %7 = vector.broadcast %6 : vector<1x96xf32> to vector<16x96xf32>
    %8 = arith.addf %5, %7 : vector<16x96xf32>
    %c0_6 = arith.constant 0 : index
    %c0_7 = arith.constant 0 : index
    %9 = vector.load %arg2[%c0_6, %c0_7] : memref<2x8xf32, #tpu.memory_space<vmem>>, vector<2x8xf32>
    %10 = vector.shape_cast %9 : vector<2x8xf32> to vector<2x1x1x8xf32>
    %11 = vector.extract_strided_slice %8 {offsets = [0, 0], sizes = [16, 32], strides = [1, 1]} : vector<16x96xf32> to vector<16x32xf32>
    %12 = vector.extract_strided_slice %8 {offsets = [0, 32], sizes = [16, 32], strides = [1, 1]} : vector<16x96xf32> to vector<16x32xf32>
    %13 = vector.extract_strided_slice %8 {offsets = [0, 64], sizes = [16, 32], strides = [1, 1]} : vector<16x96xf32> to vector<16x32xf32>
    %14 = vector.shape_cast %11 : vector<16x32xf32> to vector<2x8x4x8xf32>
    %15 = tpu.transpose %14, [0, 2, 1, 3] : vector<2x8x4x8xf32> -> vector<2x4x8x8xf32>
    %16 = vector.shape_cast %15 : vector<2x4x8x8xf32> to vector<8x8x8xf32>
    %17 = arith.truncf %16 : vector<8x8x8xf32> to vector<8x8x8xbf16>
    %18 = vector.shape_cast %12 : vector<16x32xf32> to vector<2x8x4x8xf32>
    %19 = tpu.transpose %18, [0, 2, 1, 3] : vector<2x8x4x8xf32> -> vector<2x4x8x8xf32>
    %20 = vector.shape_cast %19 : vector<2x4x8x8xf32> to vector<8x8x8xf32>
    %21 = arith.truncf %20 : vector<8x8x8xf32> to vector<8x8x8xbf16>
    %22 = vector.shape_cast %13 : vector<16x32xf32> to vector<2x8x4x8xf32>
    %23 = tpu.transpose %22, [0, 2, 1, 3] : vector<2x8x4x8xf32> -> vector<2x4x8x8xf32>
    %24 = vector.shape_cast %23 : vector<2x4x8x8xf32> to vector<8x8x8xf32>
    %25 = arith.truncf %24 : vector<8x8x8xf32> to vector<8x8x8xbf16>
    "tpu.trace_start"() <{level = 10 : i32, message = "bqd,bkd->bqk"}> : () -> ()
    %cst_8 = arith.constant dense<0.000000e+00> : vector<8x8x8xf32>
    %26 = tpu.matmul %17, %21, %cst_8 {dimension_numbers = #tpu.dot_dimension_numbers<[2], [2], [1], [1], [0, 0, 0, 1, 1, 1], [0], [0]>} : vector<8x8x8xbf16>, vector<8x8x8xbf16>, vector<8x8x8xf32> -> vector<8x8x8xf32>
    "tpu.trace_stop"() : () -> ()
    %27 = vector.shape_cast %26 : vector<8x8x8xf32> to vector<2x4x8x8xf32>
    %28 = vector.broadcast %10 : vector<2x1x1x8xf32> to vector<2x4x8x8xf32>
    %29 = arith.addf %27, %28 : vector<2x4x8x8xf32>
    %cst_9 = arith.constant dense<0xFF800000> : vector<2x4x8xf32>
    %30 = vector.multi_reduction <maximumf>, %29, %cst_9 [3] : vector<2x4x8x8xf32> to vector<2x4x8xf32>
    %31 = vector.shape_cast %30 : vector<2x4x8xf32> to vector<2x4x8x1xf32>
    %32 = vector.broadcast %31 : vector<2x4x8x1xf32> to vector<2x4x8x8xf32>
    %33 = arith.subf %29, %32 : vector<2x4x8x8xf32>
    %34 = math.exp %33 : vector<2x4x8x8xf32>
    %cst_10 = arith.constant dense<0.000000e+00> : vector<2x4x8xf32>
    %35 = vector.multi_reduction <add>, %34, %cst_10 [3] : vector<2x4x8x8xf32> to vector<2x4x8xf32>
    %36 = vector.shape_cast %35 : vector<2x4x8xf32> to vector<2x4x8x1xf32>
    %37 = tpu.reciprocal %36 {approx = true} : vector<2x4x8x1xf32> -> vector<2x4x8x1xf32>
    %38 = vector.broadcast %37 : vector<2x4x8x1xf32> to vector<2x4x8x8xf32>
    %39 = arith.mulf %34, %38 : vector<2x4x8x8xf32>
    %40 = vector.shape_cast %39 : vector<2x4x8x8xf32> to vector<8x8x8xf32>
    %41 = arith.truncf %40 : vector<8x8x8xf32> to vector<8x8x8xbf16>
    "tpu.trace_start"() <{level = 10 : i32, message = "bqk,bkd->bqd"}> : () -> ()
    %cst_11 = arith.constant dense<0.000000e+00> : vector<8x8x8xf32>
    %42 = tpu.matmul %41, %25, %cst_11 {dimension_numbers = #tpu.dot_dimension_numbers<[2], [1], [1], [2], [0, 0, 0, 1, 1, 2], [0], [0]>} : vector<8x8x8xbf16>, vector<8x8x8xbf16>, vector<8x8x8xf32> -> vector<8x8x8xf32>
    "tpu.trace_stop"() : () -> ()
    %43 = vector.shape_cast %42 : vector<8x8x8xf32> to vector<2x4x8x8xf32>
    %44 = tpu.transpose %43, [0, 2, 1, 3] : vector<2x4x8x8xf32> -> vector<2x8x4x8xf32>
    %45 = vector.shape_cast %44 : vector<2x8x4x8xf32> to vector<16x32xf32>
    %46 = arith.truncf %45 : vector<16x32xf32> to vector<16x32xbf16>
    %c0_12 = arith.constant 0 : index
    %c0_13 = arith.constant 0 : index
    %47 = vector.load %arg4[%c0_12, %c0_13] : memref<32x32xbf16, #tpu.memory_space<vmem>>, vector<32x32xbf16>
    %cst_14 = arith.constant dense<0.000000e+00> : vector<16x32xf32>
    %48 = tpu.matmul %46, %47, %cst_14 {dimension_numbers = #tpu.dot_dimension_numbers<[1], [0], [0], [1], [0, 0, 1, 1], [], []>} : vector<16x32xbf16>, vector<32x32xbf16>, vector<16x32xf32> -> vector<16x32xf32>
    %49 = vector.extract_strided_slice %3 {offsets = [1, 0], sizes = [1, 32], strides = [1, 1]} : vector<8x128xf32> to vector<1x32xf32>
    %50 = vector.broadcast %49 : vector<1x32xf32> to vector<16x32xf32>
    %51 = arith.addf %48, %50 : vector<16x32xf32>
    %52 = arith.addf %2, %51 : vector<16x32xf32>
    %53 = vector.extract_strided_slice %3 {offsets = [2, 0], sizes = [1, 32], strides = [1, 1]} : vector<8x128xf32> to vector<1x32xf32>
    %54 = vector.extract_strided_slice %3 {offsets = [3, 0], sizes = [1, 32], strides = [1, 1]} : vector<8x128xf32> to vector<1x32xf32>
    %cst_15 = arith.constant dense<0.000000e+00> : vector<16xf32>
    %55 = vector.multi_reduction <add>, %52, %cst_15 [1] : vector<16x32xf32> to vector<16xf32>
    %56 = vector.shape_cast %55 : vector<16xf32> to vector<16x1xf32>
    %cst_16 = arith.constant 3.200000e+01 : f32
    %57 = vector.broadcast %cst_16 : f32 to vector<16x1xf32>
    %58 = arith.divf %56, %57 : vector<16x1xf32>
    %59 = vector.broadcast %58 : vector<16x1xf32> to vector<16x32xf32>
    %60 = arith.subf %52, %59 : vector<16x32xf32>
    %61 = arith.mulf %60, %60 : vector<16x32xf32>
    %cst_17 = arith.constant dense<0.000000e+00> : vector<16xf32>
    %62 = vector.multi_reduction <add>, %61, %cst_17 [1] : vector<16x32xf32> to vector<16xf32>
    %63 = vector.shape_cast %62 : vector<16xf32> to vector<16x1xf32>
    %cst_18 = arith.constant 3.200000e+01 : f32
    %64 = vector.broadcast %cst_18 : f32 to vector<16x1xf32>
    %65 = arith.divf %63, %64 : vector<16x1xf32>
    %cst_19 = arith.constant 9.99999974E-6 : f32
    %66 = vector.broadcast %cst_19 : f32 to vector<16x1xf32>
    %67 = arith.addf %65, %66 : vector<16x1xf32>
    %68 = math.rsqrt %67 : vector<16x1xf32>
    %69 = vector.broadcast %68 : vector<16x1xf32> to vector<16x32xf32>
    %70 = arith.mulf %60, %69 : vector<16x32xf32>
    %71 = vector.broadcast %53 : vector<1x32xf32> to vector<16x32xf32>
    %72 = arith.mulf %70, %71 : vector<16x32xf32>
    %73 = vector.broadcast %54 : vector<1x32xf32> to vector<16x32xf32>
    %74 = arith.addf %72, %73 : vector<16x32xf32>
    %75 = arith.truncf %74 : vector<16x32xf32> to vector<16x32xbf16>
    %c0_20 = arith.constant 0 : index
    %c0_21 = arith.constant 0 : index
    %76 = vector.load %arg5[%c0_20, %c0_21] : memref<32x64xbf16, #tpu.memory_space<vmem>>, vector<32x64xbf16>
    %cst_22 = arith.constant dense<0.000000e+00> : vector<16x64xf32>
    %77 = tpu.matmul %75, %76, %cst_22 {dimension_numbers = #tpu.dot_dimension_numbers<[1], [0], [0], [1], [0, 0, 1, 1], [], []>} : vector<16x32xbf16>, vector<32x64xbf16>, vector<16x64xf32> -> vector<16x64xf32>
    %78 = vector.extract_strided_slice %3 {offsets = [4, 0], sizes = [1, 64], strides = [1, 1]} : vector<8x128xf32> to vector<1x64xf32>
    %79 = vector.broadcast %78 : vector<1x64xf32> to vector<16x64xf32>
    %80 = arith.addf %77, %79 : vector<16x64xf32>
    %cst_23 = arith.constant 0.000000e+00 : f32
    %81 = vector.broadcast %cst_23 : f32 to vector<16x64xf32>
    %82 = arith.maximumf %80, %81 : vector<16x64xf32>
    %83 = arith.truncf %82 : vector<16x64xf32> to vector<16x64xbf16>
    %c0_24 = arith.constant 0 : index
    %c0_25 = arith.constant 0 : index
    %84 = vector.load %arg6[%c0_24, %c0_25] : memref<64x32xbf16, #tpu.memory_space<vmem>>, vector<64x32xbf16>
    %cst_26 = arith.constant dense<0.000000e+00> : vector<16x32xf32>
    %85 = tpu.matmul %83, %84, %cst_26 {dimension_numbers = #tpu.dot_dimension_numbers<[1], [0], [0], [1], [0, 0, 1, 1], [], []>} : vector<16x64xbf16>, vector<64x32xbf16>, vector<16x32xf32> -> vector<16x32xf32>
    %86 = vector.extract_strided_slice %3 {offsets = [5, 0], sizes = [1, 32], strides = [1, 1]} : vector<8x128xf32> to vector<1x32xf32>
    %87 = vector.broadcast %86 : vector<1x32xf32> to vector<16x32xf32>
    %88 = arith.addf %85, %87 : vector<16x32xf32>
    %89 = arith.addf %74, %88 : vector<16x32xf32>
    %90 = vector.extract_strided_slice %3 {offsets = [6, 0], sizes = [1, 32], strides = [1, 1]} : vector<8x128xf32> to vector<1x32xf32>
    %91 = vector.extract_strided_slice %3 {offsets = [7, 0], sizes = [1, 32], strides = [1, 1]} : vector<8x128xf32> to vector<1x32xf32>
    %cst_27 = arith.constant dense<0.000000e+00> : vector<16xf32>
    %92 = vector.multi_reduction <add>, %89, %cst_27 [1] : vector<16x32xf32> to vector<16xf32>
    %93 = vector.shape_cast %92 : vector<16xf32> to vector<16x1xf32>
    %cst_28 = arith.constant 3.200000e+01 : f32
    %94 = vector.broadcast %cst_28 : f32 to vector<16x1xf32>
    %95 = arith.divf %93, %94 : vector<16x1xf32>
    %96 = vector.broadcast %95 : vector<16x1xf32> to vector<16x32xf32>
    %97 = arith.subf %89, %96 : vector<16x32xf32>
    %98 = arith.mulf %97, %97 : vector<16x32xf32>
    %cst_29 = arith.constant dense<0.000000e+00> : vector<16xf32>
    %99 = vector.multi_reduction <add>, %98, %cst_29 [1] : vector<16x32xf32> to vector<16xf32>
    %100 = vector.shape_cast %99 : vector<16xf32> to vector<16x1xf32>
    %cst_30 = arith.constant 3.200000e+01 : f32
    %101 = vector.broadcast %cst_30 : f32 to vector<16x1xf32>
    %102 = arith.divf %100, %101 : vector<16x1xf32>
    %cst_31 = arith.constant 9.99999974E-6 : f32
    %103 = vector.broadcast %cst_31 : f32 to vector<16x1xf32>
    %104 = arith.addf %102, %103 : vector<16x1xf32>
    %105 = math.rsqrt %104 : vector<16x1xf32>
    %106 = vector.broadcast %105 : vector<16x1xf32> to vector<16x32xf32>
    %107 = arith.mulf %97, %106 : vector<16x32xf32>
    %108 = vector.broadcast %90 : vector<1x32xf32> to vector<16x32xf32>
    %109 = arith.mulf %107, %108 : vector<16x32xf32>
    %110 = vector.broadcast %91 : vector<1x32xf32> to vector<16x32xf32>
    %111 = arith.addf %109, %110 : vector<16x32xf32>
    %112 = vector.shape_cast %111 : vector<16x32xf32> to vector<2x8x32xf32>
    %113 = arith.truncf %112 : vector<2x8x32xf32> to vector<2x8x32xbf16>
    %c0_32 = arith.constant 0 : index
    %c0_33 = arith.constant 0 : index
    %c0_34 = arith.constant 0 : index
    %114 = vector.load %arg8[%c0_32, %c0_33, %c0_34] : memref<2x8x32xbf16, #tpu.memory_space<vmem>>, vector<2x8x32xbf16>
    tpu.vector_store %arg8[%c0_32, %c0_33, %c0_34], %113 {strides = array<i32>} : memref<2x8x32xbf16, #tpu.memory_space<vmem>>, vector<2x8x32xbf16>,
    return
  }
  func.func @transform_0(%arg0: i32) -> (i32, i32, i32) {
    %c0_i32 = arith.constant 0 : i32
    %c0_i32_0 = arith.constant 0 : i32
    %c0_i32_1 = arith.constant 0 : i32
    %c0_i32_2 = arith.constant 0 : i32
    return %c0_i32, %c0_i32_0, %c0_i32_1 : i32, i32, i32
  }
  func.func @transform_1(%arg0: i32) -> (i32, i32) {
    %c0_i32 = arith.constant 0 : i32
    %c0_i32_0 = arith.constant 0 : i32
    %c0_i32_1 = arith.constant 0 : i32
    return %c0_i32, %c0_i32_0 : i32, i32
  }
  func.func @transform_2(%arg0: i32) -> (i32, i32) {
    %c0_i32 = arith.constant 0 : i32
    %c0_i32_0 = arith.constant 0 : i32
    %c0_i32_1 = arith.constant 0 : i32
    return %c0_i32, %c0_i32_0 : i32, i32
  }
  func.func @transform_3(%arg0: i32) -> (i32, i32) {
    %c0_i32 = arith.constant 0 : i32
    %c0_i32_0 = arith.constant 0 : i32
    %c0_i32_1 = arith.constant 0 : i32
    return %c0_i32, %c0_i32_0 : i32, i32
  }
  func.func @transform_4(%arg0: i32) -> (i32, i32) {
    %c0_i32 = arith.constant 0 : i32
    %c0_i32_0 = arith.constant 0 : i32
    %c0_i32_1 = arith.constant 0 : i32
    return %c0_i32, %c0_i32_0 : i32, i32
  }
  func.func @transform_5(%arg0: i32) -> (i32, i32) {
    %c0_i32 = arith.constant 0 : i32
    %c0_i32_0 = arith.constant 0 : i32
    %c0_i32_1 = arith.constant 0 : i32
    return %c0_i32, %c0_i32_0 : i32, i32
  }
  func.func @transform_6(%arg0: i32) -> (i32, i32) {
    %c0_i32 = arith.constant 0 : i32
    %c0_i32_0 = arith.constant 0 : i32
    %c0_i32_1 = arith.constant 0 : i32
    return %c0_i32, %c0_i32_0 : i32, i32
  }
  func.func @transform_7(%arg0: i32) -> (i32, i32, i32) {
    %c0_i32 = arith.constant 0 : i32
    %c0_i32_0 = arith.constant 0 : i32
    %c0_i32_1 = arith.constant 0 : i32
    %c0_i32_2 = arith.constant 0 : i32
    return %c0_i32, %c0_i32_0, %c0_i32_1 : i32, i32, i32
  }
}

module attributes {stable_mosaic.version = 11 : i64} {
  func.func @decoder_layer_kernel(%arg0: i32, %arg1: memref<2x8x32xbf16, #tpu.memory_space<vmem>>, %arg2: memref<2x8x32xbf16, #tpu.memory_space<vmem>>, %arg3: memref<2x8xf32, #tpu.memory_space<vmem>>, %arg4: memref<2x8xf32, #tpu.memory_space<vmem>>, %arg5: memref<32x96xbf16, #tpu.memory_space<vmem>>, %arg6: memref<32x32xbf16, #tpu.memory_space<vmem>>, %arg7: memref<32x32xbf16, #tpu.memory_space<vmem>>, %arg8: memref<32x64xbf16, #tpu.memory_space<vmem>>, %arg9: memref<32x32xbf16, #tpu.memory_space<vmem>>, %arg10: memref<32x64xbf16, #tpu.memory_space<vmem>>, %arg11: memref<64x32xbf16, #tpu.memory_space<vmem>>, %arg12: memref<16x128xf32, #tpu.memory_space<vmem>>, %arg13: memref<2x8x32xbf16, #tpu.memory_space<vmem>>) attributes {dimension_semantics = [#tpu.dimension_semantics<arbitrary>], iteration_bounds = array<i64: 1>, scalar_prefetch = 0 : i64, scratch_operands = 0 : i64, tpu.core_type = #tpu.core_type<tc>, window_params = [{pipeline_mode = #tpu.pipeline_mode<synchronous>, transform_indices = @transform_0, window_bounds = array<i64: 2, 8, 32>}, {pipeline_mode = #tpu.pipeline_mode<synchronous>, transform_indices = @transform_1, window_bounds = array<i64: 2, 8, 32>}, {pipeline_mode = #tpu.pipeline_mode<synchronous>, transform_indices = @transform_2, window_bounds = array<i64: 2, 8>}, {pipeline_mode = #tpu.pipeline_mode<synchronous>, transform_indices = @transform_3, window_bounds = array<i64: 2, 8>}, {pipeline_mode = #tpu.pipeline_mode<synchronous>, transform_indices = @transform_4, window_bounds = array<i64: 32, 96>}, {pipeline_mode = #tpu.pipeline_mode<synchronous>, transform_indices = @transform_5, window_bounds = array<i64: 32, 32>}, {pipeline_mode = #tpu.pipeline_mode<synchronous>, transform_indices = @transform_6, window_bounds = array<i64: 32, 32>}, {pipeline_mode = #tpu.pipeline_mode<synchronous>, transform_indices = @transform_7, window_bounds = array<i64: 32, 64>}, {pipeline_mode = #tpu.pipeline_mode<synchronous>, transform_indices = @transform_8, window_bounds = array<i64: 32, 32>}, {pipeline_mode = #tpu.pipeline_mode<synchronous>, transform_indices = @transform_9, window_bounds = array<i64: 32, 64>}, {pipeline_mode = #tpu.pipeline_mode<synchronous>, transform_indices = @transform_10, window_bounds = array<i64: 64, 32>}, {pipeline_mode = #tpu.pipeline_mode<synchronous>, transform_indices = @transform_11, window_bounds = array<i64: 16, 128>}, {pipeline_mode = #tpu.pipeline_mode<synchronous>, transform_indices = @transform_12, window_bounds = array<i64: 2, 8, 32>}]} {
    %c0 = arith.constant 0 : index
    %c0_0 = arith.constant 0 : index
    %c0_1 = arith.constant 0 : index
    %0 = vector.load %arg1[%c0, %c0_0, %c0_1] : memref<2x8x32xbf16, #tpu.memory_space<vmem>>, vector<2x8x32xbf16>
    %1 = vector.shape_cast %0 : vector<2x8x32xbf16> to vector<16x32xbf16>
    %2 = arith.extf %1 : vector<16x32xbf16> to vector<16x32xf32>
    %c0_2 = arith.constant 0 : index
    %c0_3 = arith.constant 0 : index
    %c0_4 = arith.constant 0 : index
    %3 = vector.load %arg2[%c0_2, %c0_3, %c0_4] : memref<2x8x32xbf16, #tpu.memory_space<vmem>>, vector<2x8x32xbf16>
    %4 = vector.shape_cast %3 : vector<2x8x32xbf16> to vector<16x32xbf16>
    %c0_5 = arith.constant 0 : index
    %c0_6 = arith.constant 0 : index
    %5 = vector.load %arg12[%c0_5, %c0_6] : memref<16x128xf32, #tpu.memory_space<vmem>>, vector<16x128xf32>
    %6 = tpu.iota {dimensions = array<i32: 0>} : vector<8x8xi32>
    %7 = tpu.iota {dimensions = array<i32: 1>} : vector<8x8xi32>
    %8 = arith.cmpi sge, %6, %7 : vector<8x8xi32>
    %cst = arith.constant 0.000000e+00 : f32
    %cst_7 = arith.constant -1.000000e+09 : f32
    %9 = vector.broadcast %cst : f32 to vector<8x8xf32>
    %10 = vector.broadcast %cst_7 : f32 to vector<8x8xf32>
    %11 = arith.select %8, %9, %10 : vector<8x8xi1>, vector<8x8xf32>
    %c0_8 = arith.constant 0 : index
    %c0_9 = arith.constant 0 : index
    %12 = vector.load %arg3[%c0_8, %c0_9] : memref<2x8xf32, #tpu.memory_space<vmem>>, vector<2x8xf32>
    %13 = vector.shape_cast %12 : vector<2x8xf32> to vector<2x1x8x1xf32>
    %14 = vector.shape_cast %11 : vector<8x8xf32> to vector<1x1x8x8xf32>
    %15 = vector.broadcast %13 : vector<2x1x8x1xf32> to vector<2x1x8x8xf32>
    %16 = vector.broadcast %14 : vector<1x1x8x8xf32> to vector<2x1x8x8xf32>
    %17 = arith.addf %15, %16 : vector<2x1x8x8xf32>
    %c0_10 = arith.constant 0 : index
    %c0_11 = arith.constant 0 : index
    %18 = vector.load %arg4[%c0_10, %c0_11] : memref<2x8xf32, #tpu.memory_space<vmem>>, vector<2x8xf32>
    %19 = vector.shape_cast %18 : vector<2x8xf32> to vector<2x1x1x8xf32>
    %c0_12 = arith.constant 0 : index
    %c0_13 = arith.constant 0 : index
    %20 = vector.load %arg5[%c0_12, %c0_13] : memref<32x96xbf16, #tpu.memory_space<vmem>>, vector<32x96xbf16>
    %cst_14 = arith.constant dense<0.000000e+00> : vector<16x96xf32>
    %21 = tpu.matmul %1, %20, %cst_14 {dimension_numbers = #tpu.dot_dimension_numbers<[1], [0], [0], [1], [0, 0, 1, 1], [], []>} : vector<16x32xbf16>, vector<32x96xbf16>, vector<16x96xf32> -> vector<16x96xf32>
    %22 = vector.extract_strided_slice %5 {offsets = [0, 0], sizes = [1, 96], strides = [1, 1]} : vector<16x128xf32> to vector<1x96xf32>
    %23 = vector.broadcast %22 : vector<1x96xf32> to vector<16x96xf32>
    %24 = arith.addf %21, %23 : vector<16x96xf32>
    %25 = vector.extract_strided_slice %24 {offsets = [0, 0], sizes = [16, 32], strides = [1, 1]} : vector<16x96xf32> to vector<16x32xf32>
    %26 = vector.extract_strided_slice %24 {offsets = [0, 32], sizes = [16, 32], strides = [1, 1]} : vector<16x96xf32> to vector<16x32xf32>
    %27 = vector.extract_strided_slice %24 {offsets = [0, 64], sizes = [16, 32], strides = [1, 1]} : vector<16x96xf32> to vector<16x32xf32>
    %28 = vector.shape_cast %25 : vector<16x32xf32> to vector<2x8x4x8xf32>
    %29 = tpu.transpose %28, [0, 2, 1, 3] : vector<2x8x4x8xf32> -> vector<2x4x8x8xf32>
    %30 = vector.shape_cast %29 : vector<2x4x8x8xf32> to vector<8x8x8xf32>
    %31 = arith.truncf %30 : vector<8x8x8xf32> to vector<8x8x8xbf16>
    %32 = vector.shape_cast %26 : vector<16x32xf32> to vector<2x8x4x8xf32>
    %33 = tpu.transpose %32, [0, 2, 1, 3] : vector<2x8x4x8xf32> -> vector<2x4x8x8xf32>
    %34 = vector.shape_cast %33 : vector<2x4x8x8xf32> to vector<8x8x8xf32>
    %35 = arith.truncf %34 : vector<8x8x8xf32> to vector<8x8x8xbf16>
    %36 = vector.shape_cast %27 : vector<16x32xf32> to vector<2x8x4x8xf32>
    %37 = tpu.transpose %36, [0, 2, 1, 3] : vector<2x8x4x8xf32> -> vector<2x4x8x8xf32>
    %38 = vector.shape_cast %37 : vector<2x4x8x8xf32> to vector<8x8x8xf32>
    %39 = arith.truncf %38 : vector<8x8x8xf32> to vector<8x8x8xbf16>
    "tpu.trace_start"() <{level = 10 : i32, message = "bqd,bkd->bqk"}> : () -> ()
    %cst_15 = arith.constant dense<0.000000e+00> : vector<8x8x8xf32>
    %40 = tpu.matmul %31, %35, %cst_15 {dimension_numbers = #tpu.dot_dimension_numbers<[2], [2], [1], [1], [0, 0, 0, 1, 1, 1], [0], [0]>} : vector<8x8x8xbf16>, vector<8x8x8xbf16>, vector<8x8x8xf32> -> vector<8x8x8xf32>
    "tpu.trace_stop"() : () -> ()
    %41 = vector.shape_cast %40 : vector<8x8x8xf32> to vector<2x4x8x8xf32>
    %42 = vector.broadcast %17 : vector<2x1x8x8xf32> to vector<2x4x8x8xf32>
    %43 = arith.addf %41, %42 : vector<2x4x8x8xf32>
    %cst_16 = arith.constant dense<0xFF800000> : vector<2x4x8xf32>
    %44 = vector.multi_reduction <maximumf>, %43, %cst_16 [3] : vector<2x4x8x8xf32> to vector<2x4x8xf32>
    %45 = vector.shape_cast %44 : vector<2x4x8xf32> to vector<2x4x8x1xf32>
    %46 = vector.broadcast %45 : vector<2x4x8x1xf32> to vector<2x4x8x8xf32>
    %47 = arith.subf %43, %46 : vector<2x4x8x8xf32>
    %48 = math.exp %47 : vector<2x4x8x8xf32>
    %cst_17 = arith.constant dense<0.000000e+00> : vector<2x4x8xf32>
    %49 = vector.multi_reduction <add>, %48, %cst_17 [3] : vector<2x4x8x8xf32> to vector<2x4x8xf32>
    %50 = vector.shape_cast %49 : vector<2x4x8xf32> to vector<2x4x8x1xf32>
    %51 = tpu.reciprocal %50 {approx = true} : vector<2x4x8x1xf32> -> vector<2x4x8x1xf32>
    %52 = vector.broadcast %51 : vector<2x4x8x1xf32> to vector<2x4x8x8xf32>
    %53 = arith.mulf %48, %52 : vector<2x4x8x8xf32>
    %54 = vector.shape_cast %53 : vector<2x4x8x8xf32> to vector<8x8x8xf32>
    %55 = arith.truncf %54 : vector<8x8x8xf32> to vector<8x8x8xbf16>
    "tpu.trace_start"() <{level = 10 : i32, message = "bqk,bkd->bqd"}> : () -> ()
    %cst_18 = arith.constant dense<0.000000e+00> : vector<8x8x8xf32>
    %56 = tpu.matmul %55, %39, %cst_18 {dimension_numbers = #tpu.dot_dimension_numbers<[2], [1], [1], [2], [0, 0, 0, 1, 1, 2], [0], [0]>} : vector<8x8x8xbf16>, vector<8x8x8xbf16>, vector<8x8x8xf32> -> vector<8x8x8xf32>
    "tpu.trace_stop"() : () -> ()
    %57 = vector.shape_cast %56 : vector<8x8x8xf32> to vector<2x4x8x8xf32>
    %58 = tpu.transpose %57, [0, 2, 1, 3] : vector<2x4x8x8xf32> -> vector<2x8x4x8xf32>
    %59 = vector.shape_cast %58 : vector<2x8x4x8xf32> to vector<16x32xf32>
    %60 = arith.truncf %59 : vector<16x32xf32> to vector<16x32xbf16>
    %c0_19 = arith.constant 0 : index
    %c0_20 = arith.constant 0 : index
    %61 = vector.load %arg6[%c0_19, %c0_20] : memref<32x32xbf16, #tpu.memory_space<vmem>>, vector<32x32xbf16>
    %cst_21 = arith.constant dense<0.000000e+00> : vector<16x32xf32>
    %62 = tpu.matmul %60, %61, %cst_21 {dimension_numbers = #tpu.dot_dimension_numbers<[1], [0], [0], [1], [0, 0, 1, 1], [], []>} : vector<16x32xbf16>, vector<32x32xbf16>, vector<16x32xf32> -> vector<16x32xf32>
    %63 = vector.extract_strided_slice %5 {offsets = [1, 0], sizes = [1, 32], strides = [1, 1]} : vector<16x128xf32> to vector<1x32xf32>
    %64 = vector.broadcast %63 : vector<1x32xf32> to vector<16x32xf32>
    %65 = arith.addf %62, %64 : vector<16x32xf32>
    %66 = arith.addf %2, %65 : vector<16x32xf32>
    %67 = vector.extract_strided_slice %5 {offsets = [2, 0], sizes = [1, 32], strides = [1, 1]} : vector<16x128xf32> to vector<1x32xf32>
    %68 = vector.extract_strided_slice %5 {offsets = [3, 0], sizes = [1, 32], strides = [1, 1]} : vector<16x128xf32> to vector<1x32xf32>
    %cst_22 = arith.constant dense<0.000000e+00> : vector<16xf32>
    %69 = vector.multi_reduction <add>, %66, %cst_22 [1] : vector<16x32xf32> to vector<16xf32>
    %70 = vector.shape_cast %69 : vector<16xf32> to vector<16x1xf32>
    %cst_23 = arith.constant 3.200000e+01 : f32
    %71 = vector.broadcast %cst_23 : f32 to vector<16x1xf32>
    %72 = arith.divf %70, %71 : vector<16x1xf32>
    %73 = vector.broadcast %72 : vector<16x1xf32> to vector<16x32xf32>
    %74 = arith.subf %66, %73 : vector<16x32xf32>
    %75 = arith.mulf %74, %74 : vector<16x32xf32>
    %cst_24 = arith.constant dense<0.000000e+00> : vector<16xf32>
    %76 = vector.multi_reduction <add>, %75, %cst_24 [1] : vector<16x32xf32> to vector<16xf32>
    %77 = vector.shape_cast %76 : vector<16xf32> to vector<16x1xf32>
    %cst_25 = arith.constant 3.200000e+01 : f32
    %78 = vector.broadcast %cst_25 : f32 to vector<16x1xf32>
    %79 = arith.divf %77, %78 : vector<16x1xf32>
    %cst_26 = arith.constant 9.99999974E-6 : f32
    %80 = vector.broadcast %cst_26 : f32 to vector<16x1xf32>
    %81 = arith.addf %79, %80 : vector<16x1xf32>
    %82 = math.rsqrt %81 : vector<16x1xf32>
    %83 = vector.broadcast %82 : vector<16x1xf32> to vector<16x32xf32>
    %84 = arith.mulf %74, %83 : vector<16x32xf32>
    %85 = vector.broadcast %67 : vector<1x32xf32> to vector<16x32xf32>
    %86 = arith.mulf %84, %85 : vector<16x32xf32>
    %87 = vector.broadcast %68 : vector<1x32xf32> to vector<16x32xf32>
    %88 = arith.addf %86, %87 : vector<16x32xf32>
    %89 = arith.truncf %88 : vector<16x32xf32> to vector<16x32xbf16>
    %c0_27 = arith.constant 0 : index
    %c0_28 = arith.constant 0 : index
    %90 = vector.load %arg7[%c0_27, %c0_28] : memref<32x32xbf16, #tpu.memory_space<vmem>>, vector<32x32xbf16>
    %cst_29 = arith.constant dense<0.000000e+00> : vector<16x32xf32>
    %91 = tpu.matmul %89, %90, %cst_29 {dimension_numbers = #tpu.dot_dimension_numbers<[1], [0], [0], [1], [0, 0, 1, 1], [], []>} : vector<16x32xbf16>, vector<32x32xbf16>, vector<16x32xf32> -> vector<16x32xf32>
    %92 = vector.extract_strided_slice %5 {offsets = [4, 0], sizes = [1, 32], strides = [1, 1]} : vector<16x128xf32> to vector<1x32xf32>
    %93 = vector.broadcast %92 : vector<1x32xf32> to vector<16x32xf32>
    %94 = arith.addf %91, %93 : vector<16x32xf32>
    %c0_30 = arith.constant 0 : index
    %c0_31 = arith.constant 0 : index
    %95 = vector.load %arg8[%c0_30, %c0_31] : memref<32x64xbf16, #tpu.memory_space<vmem>>, vector<32x64xbf16>
    %cst_32 = arith.constant dense<0.000000e+00> : vector<16x64xf32>
    %96 = tpu.matmul %4, %95, %cst_32 {dimension_numbers = #tpu.dot_dimension_numbers<[1], [0], [0], [1], [0, 0, 1, 1], [], []>} : vector<16x32xbf16>, vector<32x64xbf16>, vector<16x64xf32> -> vector<16x64xf32>
    %97 = vector.extract_strided_slice %5 {offsets = [5, 0], sizes = [1, 64], strides = [1, 1]} : vector<16x128xf32> to vector<1x64xf32>
    %98 = vector.broadcast %97 : vector<1x64xf32> to vector<16x64xf32>
    %99 = arith.addf %96, %98 : vector<16x64xf32>
    %100 = vector.extract_strided_slice %99 {offsets = [0, 0], sizes = [16, 32], strides = [1, 1]} : vector<16x64xf32> to vector<16x32xf32>
    %101 = vector.extract_strided_slice %99 {offsets = [0, 32], sizes = [16, 32], strides = [1, 1]} : vector<16x64xf32> to vector<16x32xf32>
    %102 = vector.shape_cast %94 : vector<16x32xf32> to vector<2x8x4x8xf32>
    %103 = tpu.transpose %102, [0, 2, 1, 3] : vector<2x8x4x8xf32> -> vector<2x4x8x8xf32>
    %104 = vector.shape_cast %103 : vector<2x4x8x8xf32> to vector<8x8x8xf32>
    %105 = arith.truncf %104 : vector<8x8x8xf32> to vector<8x8x8xbf16>
    %106 = vector.shape_cast %100 : vector<16x32xf32> to vector<2x8x4x8xf32>
    %107 = tpu.transpose %106, [0, 2, 1, 3] : vector<2x8x4x8xf32> -> vector<2x4x8x8xf32>
    %108 = vector.shape_cast %107 : vector<2x4x8x8xf32> to vector<8x8x8xf32>
    %109 = arith.truncf %108 : vector<8x8x8xf32> to vector<8x8x8xbf16>
    %110 = vector.shape_cast %101 : vector<16x32xf32> to vector<2x8x4x8xf32>
    %111 = tpu.transpose %110, [0, 2, 1, 3] : vector<2x8x4x8xf32> -> vector<2x4x8x8xf32>
    %112 = vector.shape_cast %111 : vector<2x4x8x8xf32> to vector<8x8x8xf32>
    %113 = arith.truncf %112 : vector<8x8x8xf32> to vector<8x8x8xbf16>
    "tpu.trace_start"() <{level = 10 : i32, message = "bqd,bkd->bqk"}> : () -> ()
    %cst_33 = arith.constant dense<0.000000e+00> : vector<8x8x8xf32>
    %114 = tpu.matmul %105, %109, %cst_33 {dimension_numbers = #tpu.dot_dimension_numbers<[2], [2], [1], [1], [0, 0, 0, 1, 1, 1], [0], [0]>} : vector<8x8x8xbf16>, vector<8x8x8xbf16>, vector<8x8x8xf32> -> vector<8x8x8xf32>
    "tpu.trace_stop"() : () -> ()
    %115 = vector.shape_cast %114 : vector<8x8x8xf32> to vector<2x4x8x8xf32>
    %116 = vector.broadcast %19 : vector<2x1x1x8xf32> to vector<2x4x8x8xf32>
    %117 = arith.addf %115, %116 : vector<2x4x8x8xf32>
    %cst_34 = arith.constant dense<0xFF800000> : vector<2x4x8xf32>
    %118 = vector.multi_reduction <maximumf>, %117, %cst_34 [3] : vector<2x4x8x8xf32> to vector<2x4x8xf32>
    %119 = vector.shape_cast %118 : vector<2x4x8xf32> to vector<2x4x8x1xf32>
    %120 = vector.broadcast %119 : vector<2x4x8x1xf32> to vector<2x4x8x8xf32>
    %121 = arith.subf %117, %120 : vector<2x4x8x8xf32>
    %122 = math.exp %121 : vector<2x4x8x8xf32>
    %cst_35 = arith.constant dense<0.000000e+00> : vector<2x4x8xf32>
    %123 = vector.multi_reduction <add>, %122, %cst_35 [3] : vector<2x4x8x8xf32> to vector<2x4x8xf32>
    %124 = vector.shape_cast %123 : vector<2x4x8xf32> to vector<2x4x8x1xf32>
    %125 = tpu.reciprocal %124 {approx = true} : vector<2x4x8x1xf32> -> vector<2x4x8x1xf32>
    %126 = vector.broadcast %125 : vector<2x4x8x1xf32> to vector<2x4x8x8xf32>
    %127 = arith.mulf %122, %126 : vector<2x4x8x8xf32>
    %128 = vector.shape_cast %127 : vector<2x4x8x8xf32> to vector<8x8x8xf32>
    %129 = arith.truncf %128 : vector<8x8x8xf32> to vector<8x8x8xbf16>
    "tpu.trace_start"() <{level = 10 : i32, message = "bqk,bkd->bqd"}> : () -> ()
    %cst_36 = arith.constant dense<0.000000e+00> : vector<8x8x8xf32>
    %130 = tpu.matmul %129, %113, %cst_36 {dimension_numbers = #tpu.dot_dimension_numbers<[2], [1], [1], [2], [0, 0, 0, 1, 1, 2], [0], [0]>} : vector<8x8x8xbf16>, vector<8x8x8xbf16>, vector<8x8x8xf32> -> vector<8x8x8xf32>
    "tpu.trace_stop"() : () -> ()
    %131 = vector.shape_cast %130 : vector<8x8x8xf32> to vector<2x4x8x8xf32>
    %132 = tpu.transpose %131, [0, 2, 1, 3] : vector<2x4x8x8xf32> -> vector<2x8x4x8xf32>
    %133 = vector.shape_cast %132 : vector<2x8x4x8xf32> to vector<16x32xf32>
    %134 = arith.truncf %133 : vector<16x32xf32> to vector<16x32xbf16>
    %c0_37 = arith.constant 0 : index
    %c0_38 = arith.constant 0 : index
    %135 = vector.load %arg9[%c0_37, %c0_38] : memref<32x32xbf16, #tpu.memory_space<vmem>>, vector<32x32xbf16>
    %cst_39 = arith.constant dense<0.000000e+00> : vector<16x32xf32>
    %136 = tpu.matmul %134, %135, %cst_39 {dimension_numbers = #tpu.dot_dimension_numbers<[1], [0], [0], [1], [0, 0, 1, 1], [], []>} : vector<16x32xbf16>, vector<32x32xbf16>, vector<16x32xf32> -> vector<16x32xf32>
    %137 = vector.extract_strided_slice %5 {offsets = [6, 0], sizes = [1, 32], strides = [1, 1]} : vector<16x128xf32> to vector<1x32xf32>
    %138 = vector.broadcast %137 : vector<1x32xf32> to vector<16x32xf32>
    %139 = arith.addf %136, %138 : vector<16x32xf32>
    %140 = arith.addf %88, %139 : vector<16x32xf32>
    %141 = vector.extract_strided_slice %5 {offsets = [7, 0], sizes = [1, 32], strides = [1, 1]} : vector<16x128xf32> to vector<1x32xf32>
    %142 = vector.extract_strided_slice %5 {offsets = [8, 0], sizes = [1, 32], strides = [1, 1]} : vector<16x128xf32> to vector<1x32xf32>
    %cst_40 = arith.constant dense<0.000000e+00> : vector<16xf32>
    %143 = vector.multi_reduction <add>, %140, %cst_40 [1] : vector<16x32xf32> to vector<16xf32>
    %144 = vector.shape_cast %143 : vector<16xf32> to vector<16x1xf32>
    %cst_41 = arith.constant 3.200000e+01 : f32
    %145 = vector.broadcast %cst_41 : f32 to vector<16x1xf32>
    %146 = arith.divf %144, %145 : vector<16x1xf32>
    %147 = vector.broadcast %146 : vector<16x1xf32> to vector<16x32xf32>
    %148 = arith.subf %140, %147 : vector<16x32xf32>
    %149 = arith.mulf %148, %148 : vector<16x32xf32>
    %cst_42 = arith.constant dense<0.000000e+00> : vector<16xf32>
    %150 = vector.multi_reduction <add>, %149, %cst_42 [1] : vector<16x32xf32> to vector<16xf32>
    %151 = vector.shape_cast %150 : vector<16xf32> to vector<16x1xf32>
    %cst_43 = arith.constant 3.200000e+01 : f32
    %152 = vector.broadcast %cst_43 : f32 to vector<16x1xf32>
    %153 = arith.divf %151, %152 : vector<16x1xf32>
    %cst_44 = arith.constant 9.99999974E-6 : f32
    %154 = vector.broadcast %cst_44 : f32 to vector<16x1xf32>
    %155 = arith.addf %153, %154 : vector<16x1xf32>
    %156 = math.rsqrt %155 : vector<16x1xf32>
    %157 = vector.broadcast %156 : vector<16x1xf32> to vector<16x32xf32>
    %158 = arith.mulf %148, %157 : vector<16x32xf32>
    %159 = vector.broadcast %141 : vector<1x32xf32> to vector<16x32xf32>
    %160 = arith.mulf %158, %159 : vector<16x32xf32>
    %161 = vector.broadcast %142 : vector<1x32xf32> to vector<16x32xf32>
    %162 = arith.addf %160, %161 : vector<16x32xf32>
    %163 = arith.truncf %162 : vector<16x32xf32> to vector<16x32xbf16>
    %c0_45 = arith.constant 0 : index
    %c0_46 = arith.constant 0 : index
    %164 = vector.load %arg10[%c0_45, %c0_46] : memref<32x64xbf16, #tpu.memory_space<vmem>>, vector<32x64xbf16>
    %cst_47 = arith.constant dense<0.000000e+00> : vector<16x64xf32>
    %165 = tpu.matmul %163, %164, %cst_47 {dimension_numbers = #tpu.dot_dimension_numbers<[1], [0], [0], [1], [0, 0, 1, 1], [], []>} : vector<16x32xbf16>, vector<32x64xbf16>, vector<16x64xf32> -> vector<16x64xf32>
    %166 = vector.extract_strided_slice %5 {offsets = [9, 0], sizes = [1, 64], strides = [1, 1]} : vector<16x128xf32> to vector<1x64xf32>
    %167 = vector.broadcast %166 : vector<1x64xf32> to vector<16x64xf32>
    %168 = arith.addf %165, %167 : vector<16x64xf32>
    %cst_48 = arith.constant 0.000000e+00 : f32
    %169 = vector.broadcast %cst_48 : f32 to vector<16x64xf32>
    %170 = arith.maximumf %168, %169 : vector<16x64xf32>
    %171 = arith.truncf %170 : vector<16x64xf32> to vector<16x64xbf16>
    %c0_49 = arith.constant 0 : index
    %c0_50 = arith.constant 0 : index
    %172 = vector.load %arg11[%c0_49, %c0_50] : memref<64x32xbf16, #tpu.memory_space<vmem>>, vector<64x32xbf16>
    %cst_51 = arith.constant dense<0.000000e+00> : vector<16x32xf32>
    %173 = tpu.matmul %171, %172, %cst_51 {dimension_numbers = #tpu.dot_dimension_numbers<[1], [0], [0], [1], [0, 0, 1, 1], [], []>} : vector<16x64xbf16>, vector<64x32xbf16>, vector<16x32xf32> -> vector<16x32xf32>
    %174 = vector.extract_strided_slice %5 {offsets = [10, 0], sizes = [1, 32], strides = [1, 1]} : vector<16x128xf32> to vector<1x32xf32>
    %175 = vector.broadcast %174 : vector<1x32xf32> to vector<16x32xf32>
    %176 = arith.addf %173, %175 : vector<16x32xf32>
    %177 = arith.addf %162, %176 : vector<16x32xf32>
    %178 = vector.extract_strided_slice %5 {offsets = [11, 0], sizes = [1, 32], strides = [1, 1]} : vector<16x128xf32> to vector<1x32xf32>
    %179 = vector.extract_strided_slice %5 {offsets = [12, 0], sizes = [1, 32], strides = [1, 1]} : vector<16x128xf32> to vector<1x32xf32>
    %cst_52 = arith.constant dense<0.000000e+00> : vector<16xf32>
    %180 = vector.multi_reduction <add>, %177, %cst_52 [1] : vector<16x32xf32> to vector<16xf32>
    %181 = vector.shape_cast %180 : vector<16xf32> to vector<16x1xf32>
    %cst_53 = arith.constant 3.200000e+01 : f32
    %182 = vector.broadcast %cst_53 : f32 to vector<16x1xf32>
    %183 = arith.divf %181, %182 : vector<16x1xf32>
    %184 = vector.broadcast %183 : vector<16x1xf32> to vector<16x32xf32>
    %185 = arith.subf %177, %184 : vector<16x32xf32>
    %186 = arith.mulf %185, %185 : vector<16x32xf32>
    %cst_54 = arith.constant dense<0.000000e+00> : vector<16xf32>
    %187 = vector.multi_reduction <add>, %186, %cst_54 [1] : vector<16x32xf32> to vector<16xf32>
    %188 = vector.shape_cast %187 : vector<16xf32> to vector<16x1xf32>
    %cst_55 = arith.constant 3.200000e+01 : f32
    %189 = vector.broadcast %cst_55 : f32 to vector<16x1xf32>
    %190 = arith.divf %188, %189 : vector<16x1xf32>
    %cst_56 = arith.constant 9.99999974E-6 : f32
    %191 = vector.broadcast %cst_56 : f32 to vector<16x1xf32>
    %192 = arith.addf %190, %191 : vector<16x1xf32>
    %193 = math.rsqrt %192 : vector<16x1xf32>
    %194 = vector.broadcast %193 : vector<16x1xf32> to vector<16x32xf32>
    %195 = arith.mulf %185, %194 : vector<16x32xf32>
    %196 = vector.broadcast %178 : vector<1x32xf32> to vector<16x32xf32>
    %197 = arith.mulf %195, %196 : vector<16x32xf32>
    %198 = vector.broadcast %179 : vector<1x32xf32> to vector<16x32xf32>
    %199 = arith.addf %197, %198 : vector<16x32xf32>
    %200 = vector.shape_cast %199 : vector<16x32xf32> to vector<2x8x32xf32>
    %201 = arith.truncf %200 : vector<2x8x32xf32> to vector<2x8x32xbf16>
    %c0_57 = arith.constant 0 : index
    %c0_58 = arith.constant 0 : index
    %c0_59 = arith.constant 0 : index
    %202 = vector.load %arg13[%c0_57, %c0_58, %c0_59] : memref<2x8x32xbf16, #tpu.memory_space<vmem>>, vector<2x8x32xbf16>
    tpu.vector_store %arg13[%c0_57, %c0_58, %c0_59], %201 {strides = array<i32>} : memref<2x8x32xbf16, #tpu.memory_space<vmem>>, vector<2x8x32xbf16>,
    return
  }
  func.func @transform_0(%arg0: i32) -> (i32, i32, i32) {
    %c0_i32 = arith.constant 0 : i32
    %c0_i32_0 = arith.constant 0 : i32
    %c0_i32_1 = arith.constant 0 : i32
    %c0_i32_2 = arith.constant 0 : i32
    return %c0_i32, %c0_i32_0, %c0_i32_1 : i32, i32, i32
  }
  func.func @transform_1(%arg0: i32) -> (i32, i32, i32) {
    %c0_i32 = arith.constant 0 : i32
    %c0_i32_0 = arith.constant 0 : i32
    %c0_i32_1 = arith.constant 0 : i32
    %c0_i32_2 = arith.constant 0 : i32
    return %c0_i32, %c0_i32_0, %c0_i32_1 : i32, i32, i32
  }
  func.func @transform_2(%arg0: i32) -> (i32, i32) {
    %c0_i32 = arith.constant 0 : i32
    %c0_i32_0 = arith.constant 0 : i32
    %c0_i32_1 = arith.constant 0 : i32
    return %c0_i32, %c0_i32_0 : i32, i32
  }
  func.func @transform_3(%arg0: i32) -> (i32, i32) {
    %c0_i32 = arith.constant 0 : i32
    %c0_i32_0 = arith.constant 0 : i32
    %c0_i32_1 = arith.constant 0 : i32
    return %c0_i32, %c0_i32_0 : i32, i32
  }
  func.func @transform_4(%arg0: i32) -> (i32, i32) {
    %c0_i32 = arith.constant 0 : i32
    %c0_i32_0 = arith.constant 0 : i32
    %c0_i32_1 = arith.constant 0 : i32
    return %c0_i32, %c0_i32_0 : i32, i32
  }
  func.func @transform_5(%arg0: i32) -> (i32, i32) {
    %c0_i32 = arith.constant 0 : i32
    %c0_i32_0 = arith.constant 0 : i32
    %c0_i32_1 = arith.constant 0 : i32
    return %c0_i32, %c0_i32_0 : i32, i32
  }
  func.func @transform_6(%arg0: i32) -> (i32, i32) {
    %c0_i32 = arith.constant 0 : i32
    %c0_i32_0 = arith.constant 0 : i32
    %c0_i32_1 = arith.constant 0 : i32
    return %c0_i32, %c0_i32_0 : i32, i32
  }
  func.func @transform_7(%arg0: i32) -> (i32, i32) {
    %c0_i32 = arith.constant 0 : i32
    %c0_i32_0 = arith.constant 0 : i32
    %c0_i32_1 = arith.constant 0 : i32
    return %c0_i32, %c0_i32_0 : i32, i32
  }
  func.func @transform_8(%arg0: i32) -> (i32, i32) {
    %c0_i32 = arith.constant 0 : i32
    %c0_i32_0 = arith.constant 0 : i32
    %c0_i32_1 = arith.constant 0 : i32
    return %c0_i32, %c0_i32_0 : i32, i32
  }
  func.func @transform_9(%arg0: i32) -> (i32, i32) {
    %c0_i32 = arith.constant 0 : i32
    %c0_i32_0 = arith.constant 0 : i32
    %c0_i32_1 = arith.constant 0 : i32
    return %c0_i32, %c0_i32_0 : i32, i32
  }
  func.func @transform_10(%arg0: i32) -> (i32, i32) {
    %c0_i32 = arith.constant 0 : i32
    %c0_i32_0 = arith.constant 0 : i32
    %c0_i32_1 = arith.constant 0 : i32
    return %c0_i32, %c0_i32_0 : i32, i32
  }
  func.func @transform_11(%arg0: i32) -> (i32, i32) {
    %c0_i32 = arith.constant 0 : i32
    %c0_i32_0 = arith.constant 0 : i32
    %c0_i32_1 = arith.constant 0 : i32
    return %c0_i32, %c0_i32_0 : i32, i32
  }
  func.func @transform_12(%arg0: i32) -> (i32, i32, i32) {
    %c0_i32 = arith.constant 0 : i32
    %c0_i32_0 = arith.constant 0 : i32
    %c0_i32_1 = arith.constant 0 : i32
    %c0_i32_2 = arith.constant 0 : i32
    return %c0_i32, %c0_i32_0, %c0_i32_1 : i32, i32, i32
  }
}

</mosaic_0001>

<bundles_post_ra>
// kernel: transformer_forward.9
= control target key start
LH: loop header
LB: loop body
LE: loop exit
PB: predicated region body
PF: predicated region fallthrough
CT: control target
= control target key end

     0   :  { %v117_v0 = vmov 0.0   ;;  %vm118_vm0 = vmmov 0   ;;  %vm45_vm1 = vcmask 261120   ;;  %s157_s1 = inlined_call_operand.vmem [shape: bf16[32,128], index: 1, kind: input, shape index: {}]   ;;  %s158_s0 = inlined_call_operand.vmem [shape: bf16[16,32], index: 0, kind: input, shape index: {}]   ;;  %s159_s2 = inlined_call_operand.vmem [shape: f32[1,128], index: 2, kind: input, shape index: {}]   ;;  %s160_s3 = inlined_call_operand.vmem [shape: f32[16,128], index: 3, kind: output, shape index: {}]  }
   0x1   :  { %104 = vmatprep.subr.bf16.mxu0 %v117_v0  ;;  %v114_v1 = vld [vmem:[%s157_s1] sm:$0xff]   ;;  %108 = vmatprep.mubr.msk.bf16.mxu0 %vm118_vm0, %v117_v0  ;;  %v115_v2 = vld [vmem:[%s157_s1 + $0x8] sm:$0xff]  }
   0x2   :  { %105 = vmatpush3.bf16.msra.mxu0 %v114_v1  ;;  %v116_v3 = vld [vmem:[%s158_s0] sm:$0xff]  }
   0x3   :  { %106 = vmatprep.subr.bf16.mxu0 %v117_v0  ;;  %v96_v4 = vld [vmem:[%s159_s2] ss:$0 sm:$0xff] }
   0x6   :  { %107 = vmatpush3.bf16.msra.mxu0 %v115_v2 }
   0x9   :  { %109 = vmatmul.mubr.msk.bf16.vlgmr.msra.gmra.mrb[0].mxu0 %vm45_vm1, %v116_v3 }
  0xdc   :  { %v83_v5 = vpop.f32.mrb[0].mxu0 }
  0xdd   :  { %v84_v6 = vadd.f32 %v96_v4, %v83_v5  ;;  %v110_v7 = vpop.f32.mrb[1].mxu0 }
  0xde   :  { %v86_v8 = vpop.f32.mrb[2].mxu0 }
  0xdf   :  { %90 = vst [vmem:[%s160_s3] sm:$0xff] %v84_v6  ;;  %v87_v9 = vadd.f32 %v96_v4, %v86_v8  ;;  %v111_v10 = vpop.f32.mrb[3].mxu0 }
  0xe1   :  { %91 = vst [vmem:[%s160_s3 + $0x8] sm:$0xff] %v87_v9 }

// kernel: transformer_forward.5
= control target key start
LH: loop header
LB: loop body
LE: loop exit
PB: predicated region body
PF: predicated region fallthrough
CT: control target
= control target key end

     0   :  { %v2802_v0 = vmov 0.0   ;;  %vm2803_vm0 = vmmov 0   ;;  %vm57_vm1 = vcmask 261120   ;;  %v36_v4 = vlaneseq  ;;  %s2804_s8 = smov 104   ;;  %s2805_s9 = smov 120   ;;  %s3359_s2 = inlined_call_operand.vmem [shape: bf16[32,96], index: 2, kind: input, shape index: {}]   ;;  %s3360_s0 = inlined_call_operand.vmem [shape: bf16[2,8,32], index: 0, kind: input, shape index: {}]   ;;  %s3361_s6 = inlined_call_operand.vmem [shape: f32[8,128], index: 6, kind: input, shape index: {}]   ;;  %s3362_s1 = inlined_call_operand.vmem [shape: f32[2,8], index: 1, kind: input, shape index: {}]   ;;  %s3363_s3 = inlined_call_operand.vmem [shape: bf16[32,32], index: 3, kind: input, shape index: {}]   ;;  %s3364_s4 = inlined_call_operand.vmem [shape: bf16[32,64], index: 4, kind: input, shape index: {}]   ;;  %s3365_s5 = inlined_call_operand.vmem [shape: bf16[64,32], index: 5, kind: input, shape index: {}]   ;;  %s3366_s7 = inlined_call_operand.vmem [shape: bf16[2,8,32], index: 7, kind: output, shape index: {}]  }
   0x1   :  { %2588 = vmatprep.subr.bf16.mxu0 %v2802_v0  ;;  %v2748_v1 = vld [vmem:[%s3359_s2] sm:$0xff]   ;;  %2592 = vmatprep.mubr.msk.bf16.mxu0 %vm2803_vm0, %v2802_v0  ;;  %v2749_v2 = vld [vmem:[%s3359_s2 + $0x8] sm:$0xff]   ;;  %s2806_s10 = smov 112   ;;  %s2807_s11 = smov 96   ;;  %v2809_v21 = vmov 1983009808  }
   0x2   :  { %2596 = vmatprep.subr.bf16.mxu1 %v2802_v0  ;;  %2598 = vmatprep.mubr.msk.bf16.mxu1 %vm2803_vm0, %v2802_v0  ;;  %v27_v3 = vld [vmem:[%s3360_s0] sm:$0xff]   ;;  %v2875_v5 = vshrl.u32 %v36_v4, 7  ;;  %s2808_s12 = smov 64   ;;  %v149_v22 = vunpack.c.l.s4 %v2809_v21  ;;  %v2810_v24 = vmov 1934713408   ;;  %vm1034_vm2 = vcmask 64512  }
   0x3   :  { %2589 = vmatpush3.bf16.msra.mxu0 %v2748_v1  ;;  %v31_v7 = vld [vmem:[%s3361_s6] sm:$0xff]  ;;  %v181_v25 = vunpack.c.l.s4 %v2810_v24  ;;  %vm1520_vm3 = vcmask 1043456   ;;  %s2813_s18 = smov 8   ;;  %s2814_s19 = smov 24   ;;  %vm2184_vm4 = vcmask 130048   ;;  %vm2187_vm5 = vcmask 195584  }
   0x4   :  { %2590 = vmatprep.subr.bf16.mxu0 %v2802_v0  ;;  %v2878_v6 = vsub.s32 0, %v2875_v5  ;;  %v150_v23 = vunpack.c.0.s8 %v149_v22  ;;  %vm2400_vm6 = vcmask 523264   ;;  %vm2487_vm7 = vcmask 257024  }
   0x5   :  { %v182_v30 = vunpack.c.0.s8 %v181_v25 }
   0x6   :  { %v39_v8 = vrot.slane %v31_v7, %v2878_v6  ;;  %v2911_v27 = vsub.s32 %v150_v23, %v2875_v5 }
   0x7   :  { %2591 = vmatpush3.bf16.msra.mxu0 %v2749_v2  ;;  %v2922_v35 = vsub.s32 %v182_v30, %v2875_v5 }
   0x8   :  { %2602 = vmatprep.subr.bf16.mxu0 %v2802_v0 }
   0xa   :  { %2593 = vmatmul.mubr.msk.bf16.vlgmr.msra.gmra.mrb[0].mxu0 %vm57_vm1, %v27_v3 }
   0xb   :  { %2604 = vmatprep.mubr.msk.bf16.mxu0 %vm2803_vm0, %v2802_v0 }
  0xdd   :  { %v95_v9 = vpop.f32.mrb[0].mxu0 }
  0xde   :  { %v96_v10 = vadd.f32 %v95_v9, %v39_v8  ;;  %v2594_v11 = vpop.f32.mrb[1].mxu0 }
  0xdf   :  { %v98_v12 = vpop.f32.mrb[2].mxu0 }
  0xe0   :  { %140 = vrot.lane.b32.xlu1 %v96_v10, %s2804_s8  ;;  %128 = vrot.lane.b32.xlu0 %v96_v10, %s2805_s9  ;;  %v2595_v13 = vpop.f32.mrb[3].mxu0  ;;  %v2884_v14 = vadd.f32 %v98_v12, %v39_v8 }
  0xe4   :  { %134 = vrot.lane.b32.xlu0 %v96_v10, %s2806_s10  ;;  %130 = vrot.lane.b32.xlu1 %v2884_v14, %s2805_s9 }
  0xe8   :  { %136 = vrot.lane.b32.xlu0 %v2884_v14, %s2806_s10  ;;  %142 = vrot.lane.b32.xlu1 %v2884_v14, %s2804_s8 }
  0xec   :  { %426 = vrot.lane.b32.xlu0 %v96_v10, %s2807_s11 }
 0x152   :  { %v2889_v15 = vpop.permute.xlu0 %128  ;;  %v2891_v16 = vpop.permute.xlu1 %140 }
 0x153   :  { %430 = vrot.lane.b32.xlu1 %v2889_v15, %s2807_s11  ;;  %v162_v28 = vcombine.low %v2889_v15, %v2891_v16  ;;  %v163_v31 = vcombine.high %v2889_v15, %v2891_v16 }
 0x155   :  { %v170_v33 = vrot.slane %v162_v28, %v2911_v27  ;;  %v177_v36 = vrot.slane %v163_v31, %v2911_v27 }
 0x156   :  { %v2894_v17 = vpop.permute.xlu0 %134  ;;  %v2898_v18 = vpop.permute.xlu1 %130 }
 0x157   :  { %434 = vrot.lane.b32.xlu0 %v2894_v17, %s2807_s11  ;;  %438 = vrot.lane.b32.xlu1 %v2891_v16, %s2807_s11  ;;  %v146_v26 = vcombine.low %v96_v10, %v2894_v17  ;;  %v147_v29 = vcombine.high %v96_v10, %v2894_v17 }
 0x159   :  { %v154_v32 = vrot.slane %v146_v26, %v2911_v27  ;;  %v161_v34 = vrot.slane %v147_v29, %v2911_v27 }
 0x15a   :  { %v2902_v19 = vpop.permute.xlu0 %136  ;;  %v2904_v20 = vpop.permute.xlu1 %142 }
 0x15b   :  { %428 = vrot.lane.b32.xlu0 %v2884_v14, %s2807_s11  ;;  %432 = vrot.lane.b32.xlu1 %v2898_v18, %s2807_s11  ;;  %v178_v37 = vcombine.low %v154_v32, %v170_v33  ;;  %v179_v38 = vcombine.high %v154_v32, %v170_v33  ;;  %v194_v39 = vcombine.low %v161_v34, %v177_v36 }
 0x15c   :  { %v195_v40 = vcombine.high %v161_v34, %v177_v36  ;;  %v214_v41 = vcombine.low %v2884_v14, %v2902_v19  ;;  %v230_v42 = vcombine.low %v2898_v18, %v2904_v20  ;;  %v215_v45 = vcombine.high %v2884_v14, %v2902_v19 }
 0x15d   :  { %v186_v43 = vrot.slane %v178_v37, %v2922_v35  ;;  %v193_v44 = vrot.slane %v179_v38, %v2922_v35  ;;  %v231_v46 = vcombine.high %v2898_v18, %v2904_v20  ;;  %v202_v47 = vrot.slane %v194_v39, %v2922_v35 }
 0x15e   :  { %v209_v48 = vrot.slane %v195_v40, %v2922_v35  ;;  %v222_v49 = vrot.slane %v214_v41, %v2911_v27  ;;  %v238_v50 = vrot.slane %v230_v42, %v2911_v27  ;;  %v427_v51 = vpop.permute.xlu0 %426  ;;  %v229_v55 = vrot.slane %v215_v45, %v2911_v27 }
 0x15f   :  { %436 = vrot.lane.b32.xlu0 %v2902_v19, %s2807_s11  ;;  %440 = vrot.lane.b32.xlu1 %v2904_v20, %s2807_s11  ;;  %v282_v53 = vcombine.low %v186_v43, %v193_v44  ;;  %v2499_v54 = vcombine.high %v186_v43, %v193_v44  ;;  %v245_v56 = vrot.slane %v231_v46, %v2911_v27 }
 0x160   :  { %v298_v57 = vcombine.low %v202_v47, %v209_v48  ;;  %v2500_v58 = vcombine.high %v202_v47, %v209_v48  ;;  %v246_v59 = vcombine.low %v222_v49, %v238_v50  ;;  %v247_v60 = vcombine.high %v222_v49, %v238_v50 }
 0x161   :  { %v262_v4 = vcombine.low %v229_v55, %v245_v56  ;;  %v263_v7 = vcombine.high %v229_v55, %v245_v56  ;;  %v2942_v8 = vrot.slane %v282_v53, %v2911_v27  ;;  %v2945_v9 = vrot.slane %v2499_v54, %v2911_v27 }
 0x162   :  { %v2952_v21 = vrot.slane %v246_v59, %v2922_v35  ;;  %v2955_v22 = vrot.slane %v247_v60, %v2922_v35  ;;  %v2958_v24 = vrot.slane %v298_v57, %v2911_v27  ;;  %v2961_v25 = vrot.slane %v2500_v58, %v2911_v27 }
 0x163   :  { %730 = vrot.lane.b32.xlu1 %v96_v10, %s2808_s12  ;;  %v2964_v32 = vrot.slane %v262_v4, %v2922_v35  ;;  %v2967_v33 = vrot.slane %v263_v7, %v2922_v35  ;;  %v314_v41 = vcombine.low %v2942_v8, %v2945_v9  ;;  %v315_v42 = vcombine.high %v2942_v8, %v2945_v9 }
 0x164   :  { %v350_v39 = vcombine.low %v2952_v21, %v2955_v22  ;;  %v330_v43 = vcombine.low %v2958_v24, %v2961_v25 }
 0x1c5   :  { %v431_v52 = vpop.permute.xlu1 %430 }
 0x1c9   :  { %v435_v61 = vpop.permute.xlu0 %434  ;;  %v439_v62 = vpop.permute.xlu1 %438 }
 0x1ca   :  { %v450_v63 = vcombine.low %v427_v51, %v435_v61  ;;  %v451_v1 = vcombine.high %v427_v51, %v435_v61  ;;  %v466_v2 = vcombine.low %v431_v52, %v439_v62  ;;  %v467_v3 = vcombine.high %v431_v52, %v439_v62 }
 0x1cc   :  { %v458_v10 = vrot.slane %v450_v63, %v2911_v27  ;;  %v465_v11 = vrot.slane %v451_v1, %v2911_v27  ;;  %v474_v12 = vrot.slane %v466_v2, %v2911_v27  ;;  %v481_v13 = vrot.slane %v467_v3, %v2911_v27 }
 0x1cd   :  { %v429_v23 = vpop.permute.xlu0 %428  ;;  %v433_v31 = vpop.permute.xlu1 %432 }
 0x1ce   :  { %v482_v26 = vcombine.low %v458_v10, %v474_v12  ;;  %v483_v28 = vcombine.high %v458_v10, %v474_v12  ;;  %v498_v29 = vcombine.low %v465_v11, %v481_v13  ;;  %v499_v30 = vcombine.high %v465_v11, %v481_v13 }
 0x1d0   :  { %v490_v34 = vrot.slane %v482_v26, %v2922_v35  ;;  %v497_v36 = vrot.slane %v483_v28, %v2922_v35  ;;  %v506_v37 = vrot.slane %v498_v29, %v2922_v35  ;;  %v513_v38 = vrot.slane %v499_v30, %v2922_v35 }
 0x1d1   :  { %v437_v40 = vpop.permute.xlu0 %436  ;;  %v441_v48 = vpop.permute.xlu1 %440  ;;  %v2501_v30 = vcombine.high %v2952_v21, %v2955_v22 }
 0x1d2   :  { %v586_v44 = vcombine.low %v490_v34, %v497_v36  ;;  %v2503_v45 = vcombine.high %v490_v34, %v497_v36  ;;  %v602_v46 = vcombine.low %v506_v37, %v513_v38  ;;  %v2504_v47 = vcombine.high %v506_v37, %v513_v38 }
 0x1d3   :  { %v518_v49 = vcombine.low %v429_v23, %v437_v40  ;;  %v519_v50 = vcombine.high %v429_v23, %v437_v40  ;;  %v534_v51 = vcombine.low %v433_v31, %v441_v48  ;;  %v535_v52 = vcombine.high %v433_v31, %v441_v48 }
 0x1d4   :  { %v593_v53 = vrot.slane %v586_v44, %v2911_v27  ;;  %v601_v54 = vrot.slane %v2503_v45, %v2911_v27  ;;  %v609_v55 = vrot.slane %v602_v46, %v2911_v27  ;;  %v617_v56 = vrot.slane %v2504_v47, %v2911_v27 }
 0x1d5   :  { %v526_v57 = vrot.slane %v518_v49, %v2911_v27  ;;  %v533_v58 = vrot.slane %v519_v50, %v2911_v27  ;;  %v542_v59 = vrot.slane %v534_v51, %v2911_v27  ;;  %v549_v60 = vrot.slane %v535_v52, %v2911_v27 }
 0x1d6   :  { %v618_v61 = vcombine.low %v593_v53, %v601_v54  ;;  %v634_v62 = vcombine.low %v609_v55, %v617_v56  ;;  %v619_v63 = vcombine.high %v593_v53, %v601_v54  ;;  %v635_v1 = vcombine.high %v609_v55, %v617_v56 }
 0x1d7   :  { %v550_v2 = vcombine.low %v526_v57, %v542_v59  ;;  %v551_v3 = vcombine.high %v526_v57, %v542_v59  ;;  %v566_v4 = vcombine.low %v533_v58, %v549_v60  ;;  %v567_v7 = vcombine.high %v533_v58, %v549_v60 }
 0x1d8   :  { %v626_v10 = vrot.slane %v618_v61, %v2922_v35  ;;  %v642_v11 = vrot.slane %v634_v62, %v2922_v35  ;;  %v633_v12 = vrot.slane %v619_v63, %v2922_v35  ;;  %v649_v13 = vrot.slane %v635_v1, %v2922_v35 }
 0x1d9   :  { %v558_v23 = vrot.slane %v550_v2, %v2922_v35  ;;  %v565_v26 = vrot.slane %v551_v3, %v2922_v35  ;;  %v574_v28 = vrot.slane %v566_v4, %v2922_v35  ;;  %v581_v29 = vrot.slane %v567_v7, %v2922_v35 }
 0x1da   :  { %v650_v31 = vcombine.low %v626_v10, %v642_v11  ;;  %v651_v34 = vcombine.high %v626_v10, %v642_v11  ;;  %v322_v36 = vrot.slane %v314_v41, %v2922_v35  ;;  %v338_v47 = vrot.slane %v330_v43, %v2922_v35 }
 0x1db   :  { %v654_v37 = vcombine.low %v558_v23, %v565_v26  ;;  %v2505_v38 = vcombine.high %v558_v23, %v565_v26  ;;  %v670_v40 = vcombine.low %v574_v28, %v581_v29  ;;  %v2506_v44 = vcombine.high %v574_v28, %v581_v29 }
 0x1dc   :  { %v722_v45 = vpack.c.bf16 %v650_v31, %v650_v31  ;;  %v723_v46 = vpack.c.bf16 %v651_v34, %v651_v34  ;;  %v652_v48 = vcombine.low %v633_v12, %v649_v13  ;;  %v366_v41 = vcombine.low %v2964_v32, %v2967_v33 }
 0x1dd   :  { %v661_v49 = vrot.slane %v654_v37, %v2911_v27  ;;  %v669_v50 = vrot.slane %v2505_v38, %v2911_v27  ;;  %v677_v51 = vrot.slane %v670_v40, %v2911_v27  ;;  %v685_v52 = vrot.slane %v2506_v44, %v2911_v27 }
 0x1de   :  { %v1039_v53 = vsel %vm1034_vm2, %v722_v45, 0  ;;  %v1085_v54 = vsel %vm1034_vm2, %v723_v46, 0  ;;  %v653_v55 = vcombine.high %v633_v12, %v649_v13  ;;  %v2502_v43 = vcombine.high %v2964_v32, %v2967_v33 }
 0x1df   :  { %2597 = vmatpush3.bf16.xpose.msra.mxu1 %v1039_v53  ;;  %2603 = vmatpush3.bf16.xpose.msra.mxu0 %v1085_v54  ;;  %v686_v56 = vcombine.low %v661_v49, %v669_v50  ;;  %v702_v57 = vcombine.low %v677_v51, %v685_v52  ;;  %v331_v58 = vcombine.high %v2958_v24, %v2961_v25 }
 0x1e0   :  { %v346_v59 = vcombine.low %v322_v36, %v338_v47  ;;  %v347_v60 = vcombine.high %v322_v36, %v338_v47  ;;  %2608 = vmatprep.subr.bf16.mxu1 %v2802_v0  ;;  %2614 = vmatprep.subr.bf16.mxu0 %v2802_v0  ;;  %v724_v61 = vpack.c.bf16 %v652_v48, %v652_v48 }
 0x1e1   :  { %v725_v62 = vpack.c.bf16 %v653_v55, %v653_v55  ;;  %v694_v63 = vrot.slane %v686_v56, %v2922_v35  ;;  %v710_v1 = vrot.slane %v702_v57, %v2922_v35  ;;  %v357_v32 = vrot.slane %v350_v39, %v2911_v27 }
 0x1e2   :  { %v365_v33 = vrot.slane %v2501_v30, %v2911_v27  ;;  %v373_v24 = vrot.slane %v366_v41, %v2911_v27  ;;  %v329_v25 = vrot.slane %v315_v42, %v2922_v35  ;;  %v381_v2 = vrot.slane %v2502_v43, %v2911_v27 }
 0x1e3   :  { %v418_v3 = vpack.c.bf16 %v346_v59, %v346_v59  ;;  %v419_v4 = vpack.c.bf16 %v347_v60, %v347_v60  ;;  %v345_v7 = vrot.slane %v331_v58, %v2922_v35  ;;  %v1131_v10 = vsel %vm1034_vm2, %v724_v61, 0 }
 0x1e4   :  { %v687_v11 = vcombine.high %v661_v49, %v669_v50  ;;  %v1177_v21 = vsel %vm1034_vm2, %v725_v62, 0  ;;  %v718_v22 = vcombine.low %v694_v63, %v710_v1  ;;  %v719_v39 = vcombine.high %v694_v63, %v710_v1  ;;  %v2498_v63 = vld.sshfl [vmem:[%s3362_s1] sm:$0x11 pattern:$0x75316420] }
 0x1e5   :  { %v703_v12 = vcombine.high %v677_v51, %v685_v52  ;;  %v382_v8 = vcombine.low %v357_v32, %v365_v33  ;;  %v348_v9 = vcombine.low %v329_v25, %v345_v7  ;;  %v349_v42 = vcombine.high %v329_v25, %v345_v7 }
 0x1e6   :  { %2599 = vmatmul.mubr.msk.bf16.vlgmr.msra.gmra.mrb[0].mxu1 %vm1034_vm2, %v418_v3  ;;  %2605 = vmatmul.mubr.msk.bf16.vlgmr.msra.gmra.mrb[4].mxu0 %vm1034_vm2, %v419_v4  ;;  %v398_v13 = vcombine.low %v373_v24, %v381_v2  ;;  %v726_v23 = vpack.c.bf16 %v718_v22, %v718_v22  ;;  %v727_v26 = vpack.c.bf16 %v719_v39, %v719_v39  ;;  %v2811_v59 = vmov 1966171168  }
 0x1e7   :  { %2609 = vmatpush3.bf16.xpose.msra.mxu1 %v1131_v10  ;;  %2615 = vmatpush3.bf16.xpose.msra.mxu0 %v1177_v21  ;;  %v701_v28 = vrot.slane %v687_v11, %v2922_v35  ;;  %v717_v29 = vrot.slane %v703_v12, %v2922_v35  ;;  %v420_v30 = vpack.c.bf16 %v348_v9, %v348_v9  ;;  %v113_v60 = vunpack.c.l.s4 %v2811_v59 }
 0x1e8   :  { %2610 = vmatprep.mubr.msk.bf16.mxu1 %vm2803_vm0, %v2802_v0  ;;  %2616 = vmatprep.mubr.msk.bf16.mxu0 %vm2803_vm0, %v2802_v0  ;;  %v421_v31 = vpack.c.bf16 %v349_v42, %v349_v42  ;;  %v390_v34 = vrot.slane %v382_v8, %v2922_v35  ;;  %v406_v36 = vrot.slane %v398_v13, %v2922_v35  ;;  %v1223_v37 = vsel %vm1034_vm2, %v726_v23, 0 }
 0x1e9   :  { %2620 = vmatprep.subr.bf16.mxu1 %v2802_v0  ;;  %2626 = vmatprep.subr.bf16.mxu0 %v2802_v0  ;;  %v1269_v38 = vsel %vm1034_vm2, %v727_v26, 0  ;;  %v720_v40 = vcombine.low %v701_v28, %v717_v29  ;;  %v721_v44 = vcombine.high %v701_v28, %v717_v29  ;;  %v383_v45 = vcombine.high %v357_v32, %v365_v33 }
 0x1ea   :  { %v414_v46 = vcombine.low %v390_v34, %v406_v36  ;;  %v415_v47 = vcombine.high %v390_v34, %v406_v36  ;;  %v399_v48 = vcombine.high %v373_v24, %v381_v2  ;;  %v114_v61 = vunpack.c.0.s8 %v113_v60 }
 0x1eb   :  { %v728_v49 = vpack.c.bf16 %v720_v40, %v720_v40  ;;  %v729_v50 = vpack.c.bf16 %v721_v44, %v721_v44  ;;  %v397_v41 = vrot.slane %v383_v45, %v2922_v35  ;;  %v111_v12 = vcombine.high %v2498_v63, %v2498_v63 }
 0x1ec   :  { %v422_v51 = vpack.c.bf16 %v414_v46, %v414_v46  ;;  %v423_v52 = vpack.c.bf16 %v415_v47, %v415_v47  ;;  %v413_v53 = vrot.slane %v399_v48, %v2922_v35  ;;  %v117_v62 = vsub.s32 %v114_v61, %v2875_v5 }
 0x1ed   :  { %v1315_v54 = vsel %vm1034_vm2, %v728_v49, 0  ;;  %v1361_v55 = vsel %vm1034_vm2, %v729_v50, 0 }
 0x1ee   :  { %2611 = vmatmul.mubr.msk.bf16.vlgmr.msra.gmra.mrb[4].mxu1 %vm1034_vm2, %v420_v30  ;;  %2617 = vmatmul.mubr.msk.bf16.vlgmr.msra.gmra.mrb[8].mxu0 %vm1034_vm2, %v421_v31  ;;  %v416_v43 = vcombine.low %v397_v41, %v413_v53  ;;  %v417_v56 = vcombine.high %v397_v41, %v413_v53  ;;  %v118_v1 = vrot.slane %v2498_v63, %v117_v62 }
 0x1ef   :  { %2621 = vmatpush3.bf16.xpose.msra.mxu1 %v1223_v37  ;;  %2627 = vmatpush3.bf16.xpose.msra.mxu0 %v1269_v38  ;;  %v125_v26 = vrot.slane %v111_v12, %v117_v62 }
 0x1f0   :  { %2622 = vmatprep.mubr.msk.bf16.mxu1 %vm2803_vm0, %v2802_v0  ;;  %2628 = vmatprep.mubr.msk.bf16.mxu0 %vm2803_vm0, %v2802_v0  ;;  %v424_v57 = vpack.c.bf16 %v416_v43, %v416_v43  ;;  %v425_v58 = vpack.c.bf16 %v417_v56, %v417_v56  ;;  %v1406_v32 = vrot.slane %v118_v1, %v2878_v6  ;;  %v731_v1 = vpop.permute.xlu1 %730 }
 0x1f1   :  { %2632 = vmatprep.subr.bf16.mxu1 %v2802_v0  ;;  %2638 = vmatprep.subr.bf16.mxu0 %v2802_v0  ;;  %v1410_v37 = vrot.slane %v125_v26, %v2878_v6 }
 0x1f6   :  { %2623 = vmatmul.mubr.msk.bf16.vlgmr.msra.gmra.mrb[8].mxu1 %vm1034_vm2, %v422_v51  ;;  %2629 = vmatmul.mubr.msk.bf16.vlgmr.msra.gmra.mrb[12].mxu0 %vm1034_vm2, %v423_v52 }
 0x1f7   :  { %2633 = vmatpush3.bf16.xpose.msra.mxu1 %v1315_v54  ;;  %2639 = vmatpush3.bf16.xpose.msra.mxu0 %v1361_v55 }
 0x1f8   :  { %2634 = vmatprep.mubr.msk.bf16.mxu1 %vm2803_vm0, %v2802_v0  ;;  %2640 = vmatprep.mubr.msk.bf16.mxu0 %vm2803_vm0, %v2802_v0 }
 0x1f9   :  { %2644 = vmatprep.subr.bf16.mxu1 %v2802_v0  ;;  %2650 = vmatprep.subr.bf16.mxu0 %v2802_v0 }
 0x1fe   :  { %2635 = vmatmul.mubr.msk.bf16.vlgmr.msra.gmra.mrb[12].mxu1 %vm1034_vm2, %v424_v57  ;;  %2641 = vmatmul.mubr.msk.bf16.vlgmr.msra.gmra.mrb[16].mxu0 %vm1034_vm2, %v425_v58 }
 0x1ff   :  { %2646 = vmatprep.mubr.msk.bf16.mxu1 %vm2803_vm0, %v2802_v0  ;;  %2652 = vmatprep.mubr.msk.bf16.mxu0 %vm2803_vm0, %v2802_v0 }
 0x2b9   :  { %v1075_v33 = vpop.f32.mrb[0].mxu1  ;;  %v1121_v24 = vpop.f32.mrb[4].mxu0 }
 0x2ba   :  { %v3076_v25 = vadd.f32 %v1406_v32, %v1075_v33  ;;  %v3078_v2 = vadd.f32 %v1406_v32, %v1121_v24  ;;  %v2600_v3 = vpop.f32.mrb[1].mxu1  ;;  %v2606_v4 = vpop.f32.mrb[5].mxu0 }
 0x2bb   :  { %v1078_v7 = vpop.f32.mrb[2].mxu1  ;;  %v1124_v10 = vpop.f32.mrb[6].mxu0 }
 0x2bc   :  { %v2601_v11 = vpop.f32.mrb[3].mxu1  ;;  %v2607_v21 = vpop.f32.mrb[7].mxu0  ;;  %v1421_v22 = vsel %vm1034_vm2, %v3076_v25, -inf  ;;  %v1424_v39 = vsel %vm1034_vm2, %v3078_v2, -inf }
 0x2bd   :  { %1422 = vmax.xlane.f32.xlu0 %v1421_v22  ;;  %1425 = vmax.xlane.f32.xlu1 %v1424_v39 }
 0x2c1   :  { %v1167_v8 = vpop.f32.mrb[4].mxu1  ;;  %v1213_v9 = vpop.f32.mrb[8].mxu0 }
 0x2c2   :  { %v1415_v42 = vadd.f32 %v1406_v32, %v1167_v8  ;;  %v2612_v13 = vpop.f32.mrb[5].mxu1  ;;  %v2618_v23 = vpop.f32.mrb[9].mxu0  ;;  %v1416_v30 = vadd.f32 %v1406_v32, %v1213_v9 }
 0x2c3   :  { %v1170_v28 = vpop.f32.mrb[6].mxu1  ;;  %v1216_v29 = vpop.f32.mrb[10].mxu0 }
 0x2c4   :  { %v2613_v31 = vpop.f32.mrb[7].mxu1  ;;  %v2619_v34 = vpop.f32.mrb[11].mxu0  ;;  %v1427_v36 = vsel %vm1034_vm2, %v1415_v42, -inf  ;;  %v1430_v38 = vsel %vm1034_vm2, %v1416_v30, -inf }
 0x2c5   :  { %1428 = vmax.xlane.f32.xlu0 %v1427_v36 }
 0x2c9   :  { %v1259_v40 = vpop.f32.mrb[8].mxu1  ;;  %1431 = vmax.xlane.f32.xlu0 %v1430_v38  ;;  %v1305_v44 = vpop.f32.mrb[12].mxu0 }
 0x2ca   :  { %v1417_v45 = vadd.f32 %v1410_v37, %v1259_v40  ;;  %v1418_v46 = vadd.f32 %v1410_v37, %v1305_v44  ;;  %v2624_v47 = vpop.f32.mrb[9].mxu1  ;;  %v2630_v48 = vpop.f32.mrb[13].mxu0 }
 0x2cb   :  { %v1262_v49 = vpop.f32.mrb[10].mxu1  ;;  %v1308_v50 = vpop.f32.mrb[14].mxu0 }
 0x2cc   :  { %v2625_v51 = vpop.f32.mrb[11].mxu1  ;;  %v2631_v52 = vpop.f32.mrb[15].mxu0  ;;  %v1433_v41 = vsel %vm1034_vm2, %v1417_v45, -inf  ;;  %v1436_v53 = vsel %vm1034_vm2, %v1418_v46, -inf }
 0x2cd   :  { %1434 = vmax.xlane.f32.xlu1 %v1433_v41  ;;  %1437 = vmax.xlane.f32.xlu0 %v1436_v53 }
 0x2d1   :  { %v1351_v6 = vpop.f32.mrb[12].mxu1  ;;  %v1397_v54 = vpop.f32.mrb[16].mxu0 }
 0x2d2   :  { %v3089_v55 = vadd.f32 %v1410_v37, %v1351_v6  ;;  %v3091_v43 = vadd.f32 %v1410_v37, %v1397_v54  ;;  %v2636_v56 = vpop.f32.mrb[13].mxu1  ;;  %v2642_v57 = vpop.f32.mrb[17].mxu0 }
 0x2d3   :  { %v1354_v58 = vpop.f32.mrb[14].mxu1  ;;  %v1400_v59 = vpop.f32.mrb[18].mxu0 }
 0x2d4   :  { %v2637_v60 = vpop.f32.mrb[15].mxu1  ;;  %v2643_v61 = vpop.f32.mrb[19].mxu0  ;;  %v1439_v62 = vsel %vm1034_vm2, %v3089_v55, -inf  ;;  %v1442_v63 = vsel %vm1034_vm2, %v3091_v43, -inf }
 0x2d5   :  { %1440 = vmax.xlane.f32.xlu1 %v1439_v62  ;;  %1443 = vmax.xlane.f32.xlu0 %v1442_v63 }
 0x2e6   :  { %738 = vrot.lane.b32.xlu1 %v2894_v17, %s2808_s12 }
 0x2ea   :  { %742 = vrot.lane.b32.xlu1 %v2891_v16, %s2808_s12 }
 0x2eb   :  { %734 = vrot.lane.b32.xlu0 %v2889_v15, %s2808_s12 }
 0x2ee   :  { %732 = vrot.lane.b32.xlu1 %v2884_v14, %s2808_s12 }
 0x34a   :  { %v1423_v32 = vpop.xlane.xlu0 %1422  ;;  %v1426_v33 = vpop.xlane.xlu1 %1425 }
 0x34b   :  { %v1445_v24 = vsub.f32 %v3076_v25, %v1423_v32  ;;  %v1446_v3 = vsub.f32 %v3078_v2, %v1426_v33 }
 0x34d   :  { %v1453_v4 = vmul.f32 1.442695, %v1445_v24  ;;  %v1455_v7 = vmul.f32 1.442695, %v1446_v3 }
 0x34f   :  { %2760 = vpow2.f32 %v1453_v4 }
 0x350   :  { %2762 = vpow2.f32 %v1455_v7 }
 0x352   :  { %v1429_v17 = vpop.xlane.xlu0 %1428 }
 0x353   :  { %v1447_v10 = vsub.f32 %v1415_v42, %v1429_v17 }
 0x355   :  { %v1457_v16 = vmul.f32 1.442695, %v1447_v10 }
 0x356   :  { %v1432_v11 = vpop.xlane.xlu0 %1431 }
 0x357   :  { %2764 = vpow2.f32 %v1457_v16  ;;  %v1448_v15 = vsub.f32 %v1416_v30, %v1432_v11 }
 0x359   :  { %v3107_v21 = vpop.eup %2760  ;;  %v1459_v14 = vmul.f32 1.442695, %v1448_v15 }
 0x35a   :  { %v3109_v22 = vpop.eup %2762  ;;  %v1435_v39 = vpop.xlane.xlu1 %1434  ;;  %v1469_v25 = vsel %vm1034_vm2, %v3107_v21, 0.0 }
 0x35b   :  { %v1438_v12 = vpop.xlane.xlu0 %1437  ;;  %2766 = vpow2.f32 %v1459_v14  ;;  %v1449_v2 = vsub.f32 %v1417_v45, %v1435_v39  ;;  %1470 = vadd.xlane.f32.xlu1 %v1469_v25  ;;  %v1472_v9 = vsel %vm1034_vm2, %v3109_v22, 0.0 }
 0x35c   :  { %v1450_v8 = vsub.f32 %v1418_v46, %v1438_v12  ;;  %1473 = vadd.xlane.f32.xlu0 %v1472_v9 }
 0x35d   :  { %v1461_v42 = vmul.f32 1.442695, %v1449_v2 }
 0x35e   :  { %v1463_v13 = vmul.f32 1.442695, %v1450_v8 }
 0x35f   :  { %2768 = vpow2.f32 %v1461_v42 }
 0x360   :  { %2770 = vpow2.f32 %v1463_v13 }
 0x361   :  { %v3115_v23 = vpop.eup %2764 }
 0x362   :  { %v3117_v26 = vpop.xlane.xlu1 %1440  ;;  %v1475_v28 = vsel %vm1034_vm2, %v3115_v23, 0.0  ;;  %v3121_v29 = vpop.xlane.xlu0 %1443 }
 0x363   :  { %1476 = vadd.xlane.f32.xlu0 %v1475_v28  ;;  %v1452_v13 = vsub.f32 %v3091_v43, %v3121_v29 }
 0x365   :  { %v3123_v30 = vpop.eup %2766  ;;  %v1467_v28 = vmul.f32 1.442695, %v1452_v13 }
 0x366   :  { %v739_v31 = vpop.permute.xlu1 %738  ;;  %v1478_v34 = vsel %vm1034_vm2, %v3123_v30, 0.0  ;;  %v735_v40 = vpop.permute.xlu0 %734 }
 0x367   :  { %1479 = vadd.xlane.f32.xlu1 %v1478_v34  ;;  %v754_v37 = vcombine.low %v731_v1, %v739_v31  ;;  %v755_v38 = vcombine.high %v731_v1, %v739_v31  ;;  %2772 = vpow2.f32 %v1467_v28 }
 0x369   :  { %v3127_v36 = vpop.eup %2768  ;;  %v762_v49 = vrot.slane %v754_v37, %v2911_v27  ;;  %v769_v50 = vrot.slane %v755_v38, %v2911_v27 }
 0x36a   :  { %v743_v44 = vpop.permute.xlu1 %742  ;;  %v1481_v45 = vsel %vm1034_vm2, %v3127_v36, 0.0  ;;  %v3131_v46 = vpop.eup %2770 }
 0x36b   :  { %v770_v47 = vcombine.low %v735_v40, %v743_v44  ;;  %v771_v48 = vcombine.high %v735_v40, %v743_v44  ;;  %1482 = vadd.xlane.f32.xlu0 %v1481_v45  ;;  %v1484_v41 = vsel %vm1034_vm2, %v3131_v46, 0.0 }
 0x36d   :  { %v778_v51 = vrot.slane %v770_v47, %v2911_v27  ;;  %v785_v52 = vrot.slane %v771_v48, %v2911_v27 }
 0x36e   :  { %v733_v43 = vpop.permute.xlu1 %732 }
 0x36f   :  { %v786_v53 = vcombine.low %v762_v49, %v778_v51  ;;  %v787_v6 = vcombine.high %v762_v49, %v778_v51  ;;  %v802_v54 = vcombine.low %v769_v50, %v785_v52  ;;  %v803_v56 = vcombine.high %v769_v50, %v785_v52  ;;  %1485 = vadd.xlane.f32.xlu0 %v1484_v41 }
 0x371   :  { %v794_v57 = vrot.slane %v786_v53, %v2922_v35  ;;  %v801_v58 = vrot.slane %v787_v6, %v2922_v35  ;;  %v810_v59 = vrot.slane %v802_v54, %v2922_v35  ;;  %v817_v60 = vrot.slane %v803_v56, %v2922_v35  ;;  %v3165_v34 = vpop.eup %2772 }
 0x372   :  { %v1490_v37 = vsel %vm1034_vm2, %v3165_v34, 0.0 }
 0x373   :  { %v890_v61 = vcombine.low %v794_v57, %v801_v58  ;;  %v2507_v62 = vcombine.high %v794_v57, %v801_v58  ;;  %v906_v63 = vcombine.low %v810_v59, %v817_v60  ;;  %v2508_v1 = vcombine.high %v810_v59, %v817_v60 }
 0x375   :  { %v897_v32 = vrot.slane %v890_v61, %v2911_v27  ;;  %v905_v33 = vrot.slane %v2507_v62, %v2911_v27  ;;  %v913_v24 = vrot.slane %v906_v63, %v2911_v27  ;;  %v921_v3 = vrot.slane %v2508_v1, %v2911_v27 }
 0x377   :  { %v922_v4 = vcombine.low %v897_v32, %v905_v33  ;;  %v938_v7 = vcombine.low %v913_v24, %v921_v3  ;;  %v923_v17 = vcombine.high %v897_v32, %v905_v33  ;;  %v939_v10 = vcombine.high %v913_v24, %v921_v3 }
 0x378   :  { %740 = vrot.lane.b32.xlu1 %v2902_v19, %s2808_s12 }
 0x379   :  { %v930_v16 = vrot.slane %v922_v4, %v2922_v35  ;;  %v946_v11 = vrot.slane %v938_v7, %v2922_v35  ;;  %v937_v15 = vrot.slane %v923_v17, %v2922_v35  ;;  %v953_v14 = vrot.slane %v939_v10, %v2922_v35 }
 0x37b   :  { %v954_v39 = vcombine.low %v930_v16, %v946_v11  ;;  %v955_v12 = vcombine.high %v930_v16, %v946_v11  ;;  %v956_v25 = vcombine.low %v937_v15, %v953_v14  ;;  %v957_v2 = vcombine.high %v937_v15, %v953_v14 }
 0x37c   :  { %744 = vrot.lane.b32.xlu1 %v2904_v20, %s2808_s12  ;;  %v1451_v20 = vsub.f32 %v3089_v55, %v3117_v26 }
 0x37d   :  { %v1026_v8 = vpack.c.bf16 %v954_v39, %v954_v39  ;;  %v1027_v9 = vpack.c.bf16 %v955_v12, %v955_v12  ;;  %v1028_v48 = vpack.c.bf16 %v956_v25, %v956_v25  ;;  %v1029_v50 = vpack.c.bf16 %v957_v2, %v957_v2 }
 0x37e   :  { %v1465_v31 = vmul.f32 1.442695, %v1451_v20 }
 0x37f   :  { %v1522_v19 = vsel %vm1520_vm3, %v1026_v8, 0  ;;  %v1568_v42 = vsel %vm1520_vm3, %v1027_v9, 0  ;;  %v1614_v41 = vsel %vm1520_vm3, %v1028_v48, 0  ;;  %v1660_v6 = vsel %vm1520_vm3, %v1029_v50, 0 }
 0x380   :  { %2645 = vmatpush3.bf16.msra.mxu1 %v1522_v19  ;;  %2651 = vmatpush3.bf16.msra.mxu0 %v1568_v42  ;;  %2774 = vpow2.f32 %v1465_v31 }
 0x381   :  { %2656 = vmatprep.subr.bf16.mxu1 %v2802_v0  ;;  %2662 = vmatprep.subr.bf16.mxu0 %v2802_v0 }
 0x385   :  { %736 = vrot.lane.b32.xlu0 %v2898_v18, %s2808_s12 }
 0x38a   :  { %v3169_v38 = vpop.eup %2774 }
 0x38b   :  { %v1487_v18 = vsel %vm1034_vm2, %v3169_v38, 0.0 }
 0x3a0   :  { %1491 = vadd.xlane.f32.xlu1 %v1490_v37 }
 0x3a4   :  { %1488 = vadd.xlane.f32.xlu0 %v1487_v18 }
 0x3e8   :  { %v1471_v29 = vpop.xlane.xlu1 %1470 }
 0x3e9   :  { %2776 = vrcp.f32 %v1471_v29  ;;  %v1474_v55 = vpop.xlane.xlu0 %1473 }
 0x3ea   :  { %2778 = vrcp.f32 %v1474_v55 }
 0x3f0   :  { %v1477_v26 = vpop.xlane.xlu0 %1476 }
 0x3f1   :  { %2780 = vrcp.f32 %v1477_v26 }
 0x3f3   :  { %v2777_v40 = vpop.eup %2776 }
 0x3f4   :  { %v2779_v44 = vpop.eup %2778  ;;  %v1501_v45 = vmul.f32 %v2777_v40, %v3107_v21  ;;  %v1480_v47 = vpop.xlane.xlu1 %1479 }
 0x3f5   :  { %v1502_v49 = vmul.f32 %v2779_v44, %v3109_v22  ;;  %2782 = vrcp.f32 %v1480_v47 }
 0x3f6   :  { %v1509_v51 = vpack.c.bf16 %v1501_v45, %v1501_v45 }
 0x3f7   :  { %v1510_v52 = vpack.c.bf16 %v1502_v49, %v1502_v49 }
 0x3f8   :  { %2647 = vmatmul.mubr.msk.bf16.vlgmr.msra.gmra.mrb[16].mxu1 %vm1034_vm2, %v1509_v51  ;;  %v1483_v53 = vpop.xlane.xlu0 %1482  ;;  %v741_v54 = vpop.permute.xlu1 %740 }
 0x3f9   :  { %2653 = vmatmul.mubr.msk.bf16.vlgmr.msra.gmra.mrb[20].mxu0 %vm1034_vm2, %v1510_v52  ;;  %2657 = vmatpush3.bf16.msra.mxu1 %v1614_v41  ;;  %v822_v59 = vcombine.low %v733_v43, %v741_v54  ;;  %v823_v60 = vcombine.high %v733_v43, %v741_v54  ;;  %2784 = vrcp.f32 %v1483_v53 }
 0x3fa   :  { %2663 = vmatpush3.bf16.msra.mxu0 %v1660_v6  ;;  %2658 = vmatprep.mubr.msk.bf16.mxu1 %vm2803_vm0, %v2802_v0 }
 0x3fb   :  { %v2781_v21 = vpop.eup %2780  ;;  %2664 = vmatprep.mubr.msk.bf16.mxu0 %vm2803_vm0, %v2802_v0  ;;  %2668 = vmatprep.subr.bf16.mxu1 %v2802_v0  ;;  %v837_v24 = vrot.slane %v823_v60, %v2911_v27 }
 0x3fc   :  { %v1503_v22 = vmul.f32 %v2781_v21, %v3115_v23  ;;  %v1486_v56 = vpop.xlane.xlu0 %1485  ;;  %2674 = vmatprep.subr.bf16.mxu0 %v2802_v0  ;;  %v745_v62 = vpop.permute.xlu1 %744  ;;  %v830_v23 = vrot.slane %v822_v59, %v2911_v27 }
 0x3fd   :  { %2786 = vrcp.f32 %v1486_v56 }
 0x3fe   :  { %v1511_v57 = vpack.c.bf16 %v1503_v22, %v1503_v22 }
 0x3ff   :  { %v2783_v58 = vpop.eup %2782 }
 0x400   :  { %v1504_v61 = vmul.f32 %v2783_v58, %v3123_v30  ;;  %2659 = vmatmul.mubr.msk.bf16.vlgmr.msra.gmra.mrb[20].mxu1 %vm1034_vm2, %v1511_v57  ;;  %v737_v63 = vpop.permute.xlu0 %736 }
 0x401   :  { %v838_v1 = vcombine.low %v737_v63, %v745_v62  ;;  %v839_v32 = vcombine.high %v737_v63, %v745_v62  ;;  %2670 = vmatprep.mubr.msk.bf16.mxu1 %vm2803_vm0, %v2802_v0 }
 0x402   :  { %v1512_v33 = vpack.c.bf16 %v1504_v61, %v1504_v61 }
 0x403   :  { %v846_v3 = vrot.slane %v838_v1, %v2911_v27  ;;  %v853_v4 = vrot.slane %v839_v32, %v2911_v27  ;;  %v2785_v37 = vpop.eup %2784 }
 0x404   :  { %2665 = vmatmul.mubr.msk.bf16.vlgmr.msra.gmra.mrb[24].mxu0 %vm1034_vm2, %v1512_v33  ;;  %v1505_v48 = vmul.f32 %v2785_v37, %v3127_v36 }
 0x405   :  { %v854_v30 = vcombine.low %v830_v23, %v846_v3  ;;  %v855_v7 = vcombine.high %v830_v23, %v846_v3  ;;  %v870_v17 = vcombine.low %v837_v24, %v853_v4  ;;  %v871_v10 = vcombine.high %v837_v24, %v853_v4  ;;  %2676 = vmatprep.mubr.msk.bf16.mxu0 %vm2803_vm0, %v2802_v0 }
 0x406   :  { %v1513_v54 = vpack.c.bf16 %v1505_v48, %v1505_v48 }
 0x407   :  { %v862_v16 = vrot.slane %v854_v30, %v2922_v35  ;;  %v869_v11 = vrot.slane %v855_v7, %v2922_v35  ;;  %v878_v15 = vrot.slane %v870_v17, %v2922_v35  ;;  %v885_v14 = vrot.slane %v871_v10, %v2922_v35  ;;  %v2787_v26 = vpop.eup %2786 }
 0x408   :  { %v1506_v49 = vmul.f32 %v2787_v26, %v3131_v46 }
 0x409   :  { %v958_v39 = vcombine.low %v862_v16, %v869_v11  ;;  %v2509_v12 = vcombine.high %v862_v16, %v869_v11  ;;  %v974_v25 = vcombine.low %v878_v15, %v885_v14  ;;  %v2510_v2 = vcombine.high %v878_v15, %v885_v14 }
 0x40a   :  { %v1514_v21 = vpack.c.bf16 %v1506_v49, %v1506_v49 }
 0x40b   :  { %v965_v8 = vrot.slane %v958_v39, %v2911_v27  ;;  %v973_v9 = vrot.slane %v2509_v12, %v2911_v27  ;;  %v981_v19 = vrot.slane %v974_v25, %v2911_v27  ;;  %v989_v42 = vrot.slane %v2510_v2, %v2911_v27 }
 0x40d   :  { %v990_v13 = vcombine.low %v965_v8, %v973_v9  ;;  %v1006_v20 = vcombine.low %v981_v19, %v989_v42  ;;  %v991_v28 = vcombine.high %v965_v8, %v973_v9  ;;  %v1007_v31 = vcombine.high %v981_v19, %v989_v42 }
 0x40f   :  { %v998_v18 = vrot.slane %v990_v13, %v2922_v35  ;;  %v1014_v43 = vrot.slane %v1006_v20, %v2922_v35  ;;  %v1005_v29 = vrot.slane %v991_v28, %v2922_v35  ;;  %v1021_v55 = vrot.slane %v1007_v31, %v2922_v35 }
 0x411   :  { %v1022_v40 = vcombine.low %v998_v18, %v1014_v43  ;;  %v1023_v44 = vcombine.high %v998_v18, %v1014_v43  ;;  %v1024_v45 = vcombine.low %v1005_v29, %v1021_v55  ;;  %v1025_v47 = vcombine.high %v1005_v29, %v1021_v55 }
 0x413   :  { %v1030_v50 = vpack.c.bf16 %v1022_v40, %v1022_v40  ;;  %v1031_v51 = vpack.c.bf16 %v1023_v44, %v1023_v44  ;;  %v1032_v53 = vpack.c.bf16 %v1024_v45, %v1024_v45  ;;  %v1033_v6 = vpack.c.bf16 %v1025_v47, %v1025_v47 }
 0x415   :  { %v1706_v52 = vsel %vm1520_vm3, %v1030_v50, 0  ;;  %v1752_v41 = vsel %vm1520_vm3, %v1031_v51, 0  ;;  %v1798_v36 = vsel %vm1520_vm3, %v1032_v53, 0  ;;  %v1844_v46 = vsel %vm1520_vm3, %v1033_v6, 0 }
 0x416   :  { %2669 = vmatpush3.bf16.msra.mxu1 %v1706_v52  ;;  %2675 = vmatpush3.bf16.msra.mxu0 %v1752_v41 }
 0x417   :  { %2680 = vmatprep.subr.bf16.mxu1 %v2802_v0  ;;  %2686 = vmatprep.subr.bf16.mxu0 %v2802_v0 }
 0x419   :  { %2671 = vmatmul.mubr.msk.bf16.vlgmr.msra.gmra.mrb[24].mxu1 %vm1034_vm2, %v1513_v54  ;;  %2677 = vmatmul.mubr.msk.bf16.vlgmr.msra.gmra.mrb[28].mxu0 %vm1034_vm2, %v1514_v21 }
 0x41a   :  { %2681 = vmatpush3.bf16.msra.mxu1 %v1798_v36  ;;  %2687 = vmatpush3.bf16.msra.mxu0 %v1844_v46 }
 0x41b   :  { %2688 = vmatprep.mubr.msk.bf16.mxu0 %vm2803_vm0, %v2802_v0  ;;  %2682 = vmatprep.mubr.msk.bf16.mxu1 %vm2803_vm0, %v2802_v0 }
 0x41c   :  { %2692 = vmatprep.subr.bf16.mxu1 %v2802_v0  ;;  %2700 = vmatprep.subr.bf16.mxu0 %v2802_v0 }
 0x42d   :  { %v1492_v22 = vpop.xlane.xlu1 %1491 }
 0x42e   :  { %2788 = vrcp.f32 %v1492_v22 }
 0x431   :  { %v1489_v56 = vpop.xlane.xlu0 %1488 }
 0x432   :  { %2790 = vrcp.f32 %v1489_v56 }
 0x438   :  { %v2789_v57 = vpop.eup %2788 }
 0x439   :  { %v1508_v58 = vmul.f32 %v2789_v57, %v3165_v34 }
 0x43b   :  { %v1516_v59 = vpack.c.bf16 %v1508_v58, %v1508_v58 }
 0x43c   :  { %v2791_v60 = vpop.eup %2790 }
 0x43d   :  { %v1507_v61 = vmul.f32 %v2791_v60, %v3169_v38  ;;  %2689 = vmatmul.mubr.msk.bf16.vlgmr.msra.gmra.mrb[32].mxu0 %vm1034_vm2, %v1516_v59 }
 0x43e   :  { %2704 = vmatprep.mubr.msk.bf16.mxu0 %vm2803_vm0, %v2802_v0 }
 0x43f   :  { %v1515_v62 = vpack.c.bf16 %v1507_v61, %v1507_v61 }
 0x441   :  { %2683 = vmatmul.mubr.msk.bf16.vlgmr.msra.gmra.mrb[28].mxu1 %vm1034_vm2, %v1515_v62 }
 0x442   :  { %2696 = vmatprep.mubr.msk.bf16.mxu1 %vm2803_vm0, %v2802_v0 }
 0x4cb   :  { %v1558_v63 = vpop.f32.mrb[16].mxu1 }
 0x4cc   :  { %v1604_v1 = vpop.f32.mrb[20].mxu0  ;;  %v2648_v32 = vpop.f32.mrb[17].mxu1 }
 0x4cd   :  { %v2654_v33 = vpop.f32.mrb[21].mxu0  ;;  %v1561_v34 = vpop.f32.mrb[18].mxu1 }
 0x4ce   :  { %v1607_v23 = vpop.f32.mrb[22].mxu0  ;;  %v2649_v24 = vpop.f32.mrb[19].mxu1 }
 0x4cf   :  { %v2655_v3 = vpop.f32.mrb[23].mxu0 }
 0x4d3   :  { %v1650_v38 = vpop.f32.mrb[20].mxu1 }
 0x4d4   :  { %v1886_v4 = vcombine.low %v1558_v63, %v1650_v38  ;;  %v1887_v30 = vcombine.high %v1558_v63, %v1650_v38  ;;  %v2660_v7 = vpop.f32.mrb[21].mxu1 }
 0x4d5   :  { %v1653_v17 = vpop.f32.mrb[22].mxu1 }
 0x4d6   :  { %v2661_v10 = vpop.f32.mrb[23].mxu1  ;;  %v1894_v12 = vrot.slane %v1886_v4, %v2911_v27  ;;  %v1901_v25 = vrot.slane %v1887_v30, %v2911_v27 }
 0x4d7   :  { %v1696_v16 = vpop.f32.mrb[24].mxu0 }
 0x4d8   :  { %v1902_v11 = vcombine.low %v1604_v1, %v1696_v16  ;;  %v1903_v15 = vcombine.high %v1604_v1, %v1696_v16  ;;  %v2666_v14 = vpop.f32.mrb[25].mxu0 }
 0x4d9   :  { %v1699_v39 = vpop.f32.mrb[26].mxu0 }
 0x4da   :  { %v1910_v2 = vrot.slane %v1902_v11, %v2911_v27  ;;  %v1917_v8 = vrot.slane %v1903_v15, %v2911_v27  ;;  %v2667_v9 = vpop.f32.mrb[27].mxu0 }
 0x4dc   :  { %v1918_v19 = vcombine.low %v1894_v12, %v1910_v2  ;;  %v1919_v42 = vcombine.high %v1894_v12, %v1910_v2  ;;  %v1934_v13 = vcombine.low %v1901_v25, %v1917_v8  ;;  %v1935_v20 = vcombine.high %v1901_v25, %v1917_v8 }
 0x4de   :  { %v1926_v28 = vrot.slane %v1918_v19, %v2922_v35  ;;  %v1933_v31 = vrot.slane %v1919_v42, %v2922_v35  ;;  %v1942_v37 = vrot.slane %v1934_v13, %v2922_v35  ;;  %v1949_v18 = vrot.slane %v1935_v20, %v2922_v35 }
 0x4e0   :  { %v2022_v43 = vcombine.low %v1926_v28, %v1933_v31  ;;  %v2527_v29 = vcombine.high %v1926_v28, %v1933_v31  ;;  %v2038_v55 = vcombine.low %v1942_v37, %v1949_v18  ;;  %v2528_v26 = vcombine.high %v1942_v37, %v1949_v18  ;;  %v2751_v28 = vld [vmem:[%s3363_s3] sm:$0xff]  }
 0x4e1   :  { %2693 = vmatpush3.bf16.msra.mxu1 %v2751_v28 }
 0x4e2   :  { %v2029_v40 = vrot.slane %v2022_v43, %v2911_v27  ;;  %v2037_v44 = vrot.slane %v2527_v29, %v2911_v27  ;;  %v2045_v45 = vrot.slane %v2038_v55, %v2911_v27  ;;  %v2053_v47 = vrot.slane %v2528_v26, %v2911_v27  ;;  %2694 = vmatprep.subr.bf16.mxu1 %v2802_v0 }
 0x4e4   :  { %v2055_v48 = vcombine.high %v2029_v40, %v2037_v44  ;;  %v2071_v49 = vcombine.high %v2045_v45, %v2053_v47  ;;  %v2054_v50 = vcombine.low %v2029_v40, %v2037_v44  ;;  %v2070_v51 = vcombine.low %v2045_v45, %v2053_v47  ;;  %v2752_v44 = vld [vmem:[%s3363_s3 + $0x8] sm:$0xff]   ;;  %s2812_s3 = smov 16  }
 0x4e5   :  { %2695 = vmatpush3.bf16.msra.mxu1 %v2752_v44 }
 0x4e6   :  { %v3246_v52 = vrot.slane %v2055_v48, %v2922_v35  ;;  %v3249_v41 = vrot.slane %v2071_v49, %v2922_v35  ;;  %v3252_v53 = vrot.slane %v2054_v50, %v2922_v35  ;;  %v3255_v6 = vrot.slane %v2070_v51, %v2922_v35  ;;  %2708 = vmatprep.subr.bf16.mxu1 %v2802_v0 }
 0x4e8   :  { %v2088_v54 = vcombine.low %v3246_v52, %v3249_v41  ;;  %v2086_v21 = vcombine.low %v3252_v53, %v3255_v6  ;;  %v2087_v36 = vcombine.high %v3252_v53, %v3255_v6  ;;  %v2089_v46 = vcombine.high %v3246_v52, %v3249_v41  ;;  %v3304_v6 = vld [vmem:[%s3361_s6] sm:$0xff] }
 0x4e9   :  { %v2197_v53 = vsub.s32 1, %v2875_v5 }
 0x4ec   :  { %v1742_v22 = vpop.f32.mrb[24].mxu1  ;;  %v1788_v56 = vpop.f32.mrb[28].mxu0 }
 0x4ed   :  { %v2672_v57 = vpop.f32.mrb[25].mxu1  ;;  %v2678_v58 = vpop.f32.mrb[29].mxu0 }
 0x4ee   :  { %v1745_v59 = vpop.f32.mrb[26].mxu1  ;;  %v1791_v60 = vpop.f32.mrb[30].mxu0 }
 0x4ef   :  { %v2673_v61 = vpop.f32.mrb[27].mxu1  ;;  %v2679_v62 = vpop.f32.mrb[31].mxu0 }
 0x510   :  { %v1880_v63 = vpop.f32.mrb[32].mxu0 }
 0x511   :  { %v1970_v1 = vcombine.low %v1788_v56, %v1880_v63  ;;  %v1971_v32 = vcombine.high %v1788_v56, %v1880_v63  ;;  %v2690_v33 = vpop.f32.mrb[33].mxu0 }
 0x512   :  { %v1883_v34 = vpop.f32.mrb[34].mxu0 }
 0x513   :  { %v2691_v23 = vpop.f32.mrb[35].mxu0  ;;  %v1978_v7 = vrot.slane %v1970_v1, %v2911_v27  ;;  %v1985_v17 = vrot.slane %v1971_v32, %v2911_v27 }
 0x514   :  { %v1834_v24 = vpop.f32.mrb[28].mxu1 }
 0x515   :  { %v1954_v3 = vcombine.low %v1742_v22, %v1834_v24  ;;  %v1955_v38 = vcombine.high %v1742_v22, %v1834_v24  ;;  %v2684_v4 = vpop.f32.mrb[29].mxu1  ;;  %v2801_v24 = vld [vmem:[%s3360_s0] sm:$0xff]  }
 0x516   :  { %v1837_v30 = vpop.f32.mrb[30].mxu1 }
 0x517   :  { %v1962_v10 = vrot.slane %v1954_v3, %v2911_v27  ;;  %v1969_v16 = vrot.slane %v1955_v38, %v2911_v27  ;;  %v2685_v11 = vpop.f32.mrb[31].mxu1  ;;  %v29_v3 = vunpack.c.l.bf16 %v2801_v24 }
 0x519   :  { %v1986_v15 = vcombine.low %v1962_v10, %v1978_v7  ;;  %v1987_v14 = vcombine.high %v1962_v10, %v1978_v7  ;;  %v2002_v39 = vcombine.low %v1969_v16, %v1985_v17  ;;  %v2003_v12 = vcombine.high %v1969_v16, %v1985_v17 }
 0x51a   :  { %v30_v7 = vunpack.c.h.bf16 %v2801_v24 }
 0x51b   :  { %v1994_v25 = vrot.slane %v1986_v15, %v2922_v35  ;;  %v2001_v2 = vrot.slane %v1987_v14, %v2922_v35  ;;  %v2010_v8 = vrot.slane %v2002_v39, %v2922_v35  ;;  %v2017_v9 = vrot.slane %v2003_v12, %v2922_v35 }
 0x51d   :  { %v2090_v19 = vcombine.low %v1994_v25, %v2001_v2  ;;  %v2529_v42 = vcombine.high %v1994_v25, %v2001_v2  ;;  %v2106_v13 = vcombine.low %v2010_v8, %v2017_v9  ;;  %v2530_v20 = vcombine.high %v2010_v8, %v2017_v9 }
 0x51f   :  { %v2097_v31 = vrot.slane %v2090_v19, %v2911_v27  ;;  %v2105_v37 = vrot.slane %v2529_v42, %v2911_v27  ;;  %v2113_v18 = vrot.slane %v2106_v13, %v2911_v27  ;;  %v2121_v43 = vrot.slane %v2530_v20, %v2911_v27 }
 0x521   :  { %v2123_v29 = vcombine.high %v2097_v31, %v2105_v37  ;;  %v2139_v55 = vcombine.high %v2113_v18, %v2121_v43  ;;  %v2122_v26 = vcombine.low %v2097_v31, %v2105_v37  ;;  %v2138_v40 = vcombine.low %v2113_v18, %v2121_v43  ;;  %v2753_v31 = vld [vmem:[%s3364_s4] sm:$0xff]   ;;  %v2754_v37 = vld [vmem:[%s3364_s4 + $0x8] sm:$0xff]  }
 0x522   :  { %2701 = vmatpush3.bf16.msra.mxu0 %v2753_v31  ;;  %v2755_v18 = vld [vmem:[%s3365_s5] sm:$0xff]   ;;  %v2756_v43 = vld [vmem:[%s3365_s5 + $0x8] sm:$0xff]  }
 0x523   :  { %v2137_v45 = vrot.slane %v2123_v29, %v2922_v35  ;;  %v2153_v47 = vrot.slane %v2139_v55, %v2922_v35  ;;  %v2130_v48 = vrot.slane %v2122_v26, %v2922_v35  ;;  %v2146_v49 = vrot.slane %v2138_v40, %v2922_v35  ;;  %2702 = vmatprep.subr.bf16.mxu0 %v2802_v0 }
 0x525   :  { %v2156_v27 = vcombine.low %v2137_v45, %v2153_v47  ;;  %v2155_v50 = vcombine.high %v2130_v48, %v2146_v49  ;;  %v2154_v51 = vcombine.low %v2130_v48, %v2146_v49  ;;  %v2157_v22 = vcombine.high %v2137_v45, %v2153_v47 }
 0x526   :  { %2703 = vmatpush3.bf16.msra.mxu0 %v2754_v37  ;;  %v2286_v47 = vsub.s32 2, %v2875_v5  ;;  %v2292_v49 = vsub.s32 3, %v2875_v5 }
 0x527   :  { %v2738_v56 = vpack.i.bf16 %v2156_v27, %v2088_v54  ;;  %v2733_v57 = vpack.i.bf16 %v2155_v50, %v2087_v36  ;;  %v2743_v58 = vpack.i.bf16 %v2157_v22, %v2089_v46 }
 0x528   :  { %v2287_v48 = vrot.slane %v3304_v6, %v2286_v47 }
 0x529   :  { %2739 = vrot.lane.b32.xlu1 %v2738_v56, %s2812_s3  ;;  %2734 = vrot.lane.b32.xlu0 %v2733_v57, %s2813_s18  ;;  %v2293_v57 = vrot.slane %v3304_v6, %v2292_v49 }
 0x52d   :  { %2744 = vrot.lane.b32.xlu0 %v2743_v58, %s2814_s19 }
 0x59b   :  { %v2740_v35 = vpop.permute.xlu1 %2739  ;;  %v2735_v59 = vpop.permute.xlu0 %2734 }
 0x59c   :  { %v2737_v60 = vunpack.i.h.bf16 %v2735_v59  ;;  %v2736_v61 = vunpack.i.l.bf16 %v2735_v59  ;;  %v2742_v62 = vunpack.i.h.bf16 %v2740_v35  ;;  %v2741_v63 = vunpack.i.l.bf16 %v2740_v35 }
 0x59e   :  { %v2182_v52 = vsel %vm1034_vm2, %v2086_v21, %v2736_v61  ;;  %v2183_v41 = vsel %vm1034_vm2, %v2154_v51, %v2737_v60  ;;  %v2198_v21 = vrot.slane %v3304_v6, %v2197_v53  ;;  %v2757_v61 = vld [vmem:[%s3365_s5 + $0x10] sm:$0xff]  }
 0x59f   :  { %v2745_v54 = vpop.permute.xlu0 %2744  ;;  %v2185_v1 = vsel %vm2184_vm4, %v2182_v52, %v2741_v63  ;;  %v2186_v32 = vsel %vm2184_vm4, %v2183_v41, %v2742_v62  ;;  %v2758_v62 = vld [vmem:[%s3365_s5 + $0x18] sm:$0xff]   ;;  %v2303_v63 = vsub.s32 4, %v2875_v5 }
 0x5a0   :  { %v2747_v36 = vunpack.i.h.bf16 %v2745_v54  ;;  %v2746_v46 = vunpack.i.l.bf16 %v2745_v54 }
 0x5a1   :  { %v2304_v52 = vrot.slane %v3304_v6, %v2303_v63 }
 0x5a2   :  { %v2188_v33 = vsel %vm2187_vm5, %v2185_v1, %v2746_v46  ;;  %v2189_v34 = vsel %vm2187_vm5, %v2186_v32, %v2747_v36 }
 0x5a3   :  { %v2190_v23 = vpack.c.bf16 %v2189_v34, %v2188_v33 }
 0x5a5   :  { %2697 = vmatmul.mubr.msk.bf16.vlgmr.msra.gmra.mrb[32].mxu1 %vm57_vm1, %v2190_v23 }
 0x5a6   :  { %2716 = vmatprep.mubr.msk.bf16.mxu1 %vm2803_vm0, %v2802_v0  ;;  %2709 = vmatpush3.bf16.msra.mxu1 %v2755_v18  ;;  %v2475_v18 = vsub.s32 6, %v2875_v5 }
 0x5a7   :  { %2710 = vmatprep.subr.bf16.mxu1 %v2802_v0 }
 0x5aa   :  { %2711 = vmatpush3.bf16.msra.mxu1 %v2756_v43  ;;  %v2481_v43 = vsub.s32 7, %v2875_v5 }
 0x5ab   :  { %2712 = vmatprep.subr.bf16.mxu1 %v2802_v0 }
 0x5ae   :  { %2713 = vmatpush3.bf16.msra.mxu1 %v2757_v61 }
 0x5af   :  { %2714 = vmatprep.subr.bf16.mxu1 %v2802_v0  ;;  %v2374_v0 = vsub.s32 5, %v2875_v5 }
 0x5b1   :  { %v2375_v53 = vrot.slane %v3304_v6, %v2374_v0 }
 0x5b2   :  { %2715 = vmatpush3.bf16.msra.mxu1 %v2758_v62 }
 0x678   :  { %v2248_v38 = vpop.f32.mrb[32].mxu1 }
 0x679   :  { %v2249_v4 = vadd.f32 %v2248_v38, %v2198_v21  ;;  %v2698_v30 = vpop.f32.mrb[33].mxu1 }
 0x67a   :  { %v2251_v17 = vpop.f32.mrb[34].mxu1 }
 0x67b   :  { %v2252_v10 = vadd.f32 %v2251_v17, %v2198_v21  ;;  %v2699_v16 = vpop.f32.mrb[35].mxu1  ;;  %v2255_v11 = vadd.f32 %v2249_v4, %v29_v3 }
 0x67d   :  { %v2257_v15 = vsel %vm57_vm1, %v2255_v11, 0.0  ;;  %v2256_v14 = vadd.f32 %v2252_v10, %v30_v7 }
 0x67e   :  { %2258 = vadd.xlane.f32.xlu1 %v2257_v15 }
 0x67f   :  { %v2260_v39 = vsel %vm57_vm1, %v2256_v14, 0.0 }
 0x680   :  { %2261 = vadd.xlane.f32.xlu0 %v2260_v39 }
 0x70b   :  { %v2259_v12 = vpop.xlane.xlu1 %2258 }
 0x70c   :  { %v2264_v25 = vmul.f32 0.03125, %v2259_v12 }
 0x70d   :  { %v2262_v2 = vpop.xlane.xlu0 %2261 }
 0x70e   :  { %v2266_v8 = vsub.f32 %v2255_v11, %v2264_v25  ;;  %v2265_v9 = vmul.f32 0.03125, %v2262_v2 }
 0x710   :  { %v2267_v19 = vsub.f32 %v2256_v14, %v2265_v9  ;;  %v2268_v42 = vmul.f32 %v2266_v8, %v2266_v8 }
 0x712   :  { %v2270_v13 = vsel %vm57_vm1, %v2268_v42, 0.0  ;;  %v2269_v20 = vmul.f32 %v2267_v19, %v2267_v19 }
 0x713   :  { %2271 = vadd.xlane.f32.xlu0 %v2270_v13 }
 0x714   :  { %v2273_v28 = vsel %vm57_vm1, %v2269_v20, 0.0 }
 0x715   :  { %2274 = vadd.xlane.f32.xlu1 %v2273_v28 }
 0x7a0   :  { %v2272_v29 = vpop.xlane.xlu0 %2271 }
 0x7a1   :  { %v2276_v55 = vmul.f32 0.03125, %v2272_v29  ;;  %v2476_v29 = vrot.slane %v3304_v6, %v2475_v18 }
 0x7a2   :  { %v2275_v26 = vpop.xlane.xlu1 %2274 }
 0x7a3   :  { %v2278_v40 = vadd.f32 1e-05, %v2276_v55  ;;  %v2277_v44 = vmul.f32 0.03125, %v2275_v26  ;;  %v2482_v26 = vrot.slane %v3304_v6, %v2481_v43 }
 0x7a5   :  { %2792 = vrsqrt.f32 %v2278_v40  ;;  %v2279_v45 = vadd.f32 1e-05, %v2277_v44 }
 0x7a7   :  { %2794 = vrsqrt.f32 %v2279_v45 }
 0x7af   :  { %v2793_v27 = vpop.eup %2792 }
 0x7b0   :  { %v2282_v50 = vmul.f32 %v2793_v27, %v2266_v8 }
 0x7b1   :  { %v2795_v51 = vpop.eup %2794 }
 0x7b2   :  { %v2288_v22 = vmul.f32 %v2287_v48, %v2282_v50  ;;  %v2283_v56 = vmul.f32 %v2795_v51, %v2267_v19 }
 0x7b4   :  { %v2289_v58 = vmul.f32 %v2287_v48, %v2283_v56  ;;  %v2294_v35 = vadd.f32 %v2293_v57, %v2288_v22 }
 0x7b6   :  { %v2295_v59 = vadd.f32 %v2293_v57, %v2289_v58 }
 0x7b8   :  { %v2296_v60 = vpack.c.bf16 %v2295_v59, %v2294_v35 }
 0x7ba   :  { %2705 = vmatmul.mubr.msk.bf16.vlgmr.msra.gmra.mrb[36].mxu0 %vm57_vm1, %v2296_v60 }
 0x88d   :  { %v2354_v41 = vpop.f32.mrb[36].mxu0 }
 0x88e   :  { %v2355_v54 = vadd.f32 %v2354_v41, %v2304_v52  ;;  %v2706_v36 = vpop.f32.mrb[37].mxu0 }
 0x88f   :  { %v2357_v46 = vpop.f32.mrb[38].mxu0 }
 0x890   :  { %v2358_v1 = vadd.f32 %v2357_v46, %v2304_v52  ;;  %v2707_v32 = vpop.f32.mrb[39].mxu0  ;;  %v2361_v33 = vmax.f32 %v2355_v54, 0.0 }
 0x892   :  { %v2362_v34 = vmax.f32 %v2358_v1, 0.0 }
 0x894   :  { %v2363_v23 = vpack.c.bf16 %v2362_v34, %v2361_v33 }
 0x896   :  { %2717 = vmatmul.mubr.msk.bf16.vlgmr.msra.gmra.mrb[36].mxu1 %vm2400_vm6, %v2363_v23 }
 0x969   :  { %v2438_v21 = vpop.f32.mrb[36].mxu1 }
 0x96a   :  { %v2439_v24 = vadd.f32 %v2438_v21, %v2375_v53  ;;  %v2718_v3 = vpop.f32.mrb[37].mxu1 }
 0x96b   :  { %v2441_v38 = vpop.f32.mrb[38].mxu1 }
 0x96c   :  { %v2442_v4 = vadd.f32 %v2441_v38, %v2375_v53  ;;  %v2719_v30 = vpop.f32.mrb[39].mxu1  ;;  %v2445_v7 = vadd.f32 %v2439_v24, %v2294_v35 }
 0x96e   :  { %v2447_v17 = vsel %vm57_vm1, %v2445_v7, 0.0  ;;  %v2446_v10 = vadd.f32 %v2442_v4, %v2295_v59 }
 0x96f   :  { %2448 = vadd.xlane.f32.xlu0 %v2447_v17 }
 0x970   :  { %v2450_v16 = vsel %vm57_vm1, %v2446_v10, 0.0 }
 0x971   :  { %2451 = vadd.xlane.f32.xlu1 %v2450_v16 }
 0x9fc   :  { %v2449_v11 = vpop.xlane.xlu0 %2448 }
 0x9fd   :  { %v2453_v15 = vmul.f32 0.03125, %v2449_v11 }
 0x9fe   :  { %v2452_v14 = vpop.xlane.xlu1 %2451 }
 0x9ff   :  { %v2455_v39 = vsub.f32 %v2445_v7, %v2453_v15  ;;  %v2454_v12 = vmul.f32 0.03125, %v2452_v14 }
 0xa01   :  { %v2456_v25 = vsub.f32 %v2446_v10, %v2454_v12  ;;  %v2457_v2 = vmul.f32 %v2455_v39, %v2455_v39 }
 0xa03   :  { %v2459_v8 = vsel %vm57_vm1, %v2457_v2, 0.0  ;;  %v2458_v9 = vmul.f32 %v2456_v25, %v2456_v25 }
 0xa04   :  { %2460 = vadd.xlane.f32.xlu0 %v2459_v8 }
 0xa05   :  { %v2462_v19 = vsel %vm57_vm1, %v2458_v9, 0.0 }
 0xa06   :  { %2463 = vadd.xlane.f32.xlu1 %v2462_v19 }
 0xa91   :  { %v2461_v42 = vpop.xlane.xlu0 %2460 }
 0xa92   :  { %v2465_v13 = vmul.f32 0.03125, %v2461_v42 }
 0xa93   :  { %v2464_v20 = vpop.xlane.xlu1 %2463 }
 0xa94   :  { %v2467_v28 = vadd.f32 1e-05, %v2465_v13  ;;  %v2466_v31 = vmul.f32 0.03125, %v2464_v20 }
 0xa96   :  { %2796 = vrsqrt.f32 %v2467_v28  ;;  %v2468_v37 = vadd.f32 1e-05, %v2466_v31 }
 0xa98   :  { %2798 = vrsqrt.f32 %v2468_v37 }
 0xaa0   :  { %v2797_v55 = vpop.eup %2796 }
 0xaa1   :  { %v2471_v40 = vmul.f32 %v2797_v55, %v2455_v39 }
 0xaa2   :  { %v2799_v44 = vpop.eup %2798 }
 0xaa3   :  { %v2477_v45 = vmul.f32 %v2476_v29, %v2471_v40  ;;  %v2472_v47 = vmul.f32 %v2799_v44, %v2456_v25 }
 0xaa5   :  { %v2483_v48 = vadd.f32 %v2482_v26, %v2477_v45  ;;  %v2478_v49 = vmul.f32 %v2476_v29, %v2472_v47 }
 0xaa7   :  { %v2485_v27 = vpack.c.bf16 %v2483_v48, %v2483_v48  ;;  %v2484_v50 = vadd.f32 %v2482_v26, %v2478_v49 }
 0xaa9   :  { %2488 = vst.msk [vmem:[%s3366_s7] sm:$0xf] %vm2487_vm7, %v2485_v27  ;;  %v2486_v51 = vpack.c.bf16 %v2484_v50, %v2484_v50 }
 0xaab   :  { %2489 = vst.msk [vmem:[%s3366_s7 + $0x4] sm:$0xf] %vm2487_vm7, %v2486_v51 }

// kernel: transformer_forward.7
= control target key start
LH: loop header
LB: loop body
LE: loop exit
PB: predicated region body
PF: predicated region fallthrough
CT: control target
= control target key end

     0   :  { %v5391_v0 = vmov 0.0   ;;  %vm5392_vm0 = vmmov 0   ;;  %vm122_vm1 = vcmask 261120   ;;  %v50_v4 = vlaneseq  ;;  %s5393_s28 = smov 104   ;;  %s5394_s29 = smov 120   ;;  %s6459_s4 = inlined_call_operand.vmem [shape: bf16[32,96], index: 4, kind: input, shape index: {}]   ;;  %s6460_s0 = inlined_call_operand.vmem [shape: bf16[2,8,32], index: 0, kind: input, shape index: {}]   ;;  %s6461_s11 = inlined_call_operand.vmem [shape: f32[16,128], index: 11, kind: input, shape index: {}]   ;;  %s6462_s2 = inlined_call_operand.vmem [shape: f32[2,8], index: 2, kind: input, shape index: {}]   ;;  %s6463_s5 = inlined_call_operand.vmem [shape: bf16[32,32], index: 5, kind: input, shape index: {}]   ;;  %s6464_s7 = inlined_call_operand.vmem [shape: bf16[32,64], index: 7, kind: input, shape index: {}]   ;;  %s6465_s1 = inlined_call_operand.vmem [shape: bf16[2,8,32], index: 1, kind: input, shape index: {}]   ;;  %s6466_s6 = inlined_call_operand.vmem [shape: bf16[32,32], index: 6, kind: input, shape index: {}]   ;;  %s6467_s3 = inlined_call_operand.vmem [shape: f32[2,8], index: 3, kind: input, shape index: {}]   ;;  %s6468_s8 = inlined_call_operand.vmem [shape: bf16[32,32], index: 8, kind: input, shape index: {}]   ;;  %s6469_s9 = inlined_call_operand.vmem [shape: bf16[32,64], index: 9, kind: input, shape index: {}]   ;;  %s6470_s10 = inlined_call_operand.vmem [shape: bf16[64,32], index: 10, kind: input, shape index: {}]   ;;  %s6471_s12 = inlined_call_operand.vmem [shape: bf16[2,8,32], index: 12, kind: output, shape index: {}]  }
   0x1   :  { %4997 = vmatprep.subr.bf16.mxu1 %v5391_v0  ;;  %v5293_v1 = vld [vmem:[%s6459_s4] sm:$0xff]   ;;  %5001 = vmatprep.mubr.msk.bf16.mxu1 %vm5392_vm0, %v5391_v0  ;;  %v5294_v2 = vld [vmem:[%s6459_s4 + $0x8] sm:$0xff]   ;;  %s5395_s30 = smov 112   ;;  %s5396_s13 = smov 96   ;;  %v5398_v25 = vmov 1983009808  }
   0x2   :  { %5011 = vmatprep.subr.bf16.mxu0 %v5391_v0  ;;  %5013 = vmatprep.mubr.msk.bf16.mxu0 %vm5392_vm0, %v5391_v0  ;;  %v42_v3 = vld [vmem:[%s6460_s0] sm:$0xff]   ;;  %v5491_v5 = vshrl.u32 %v50_v4, 7  ;;  %s5397_s16 = smov 64   ;;  %v190_v26 = vunpack.c.l.s4 %v5398_v25  ;;  %v5399_v28 = vmov 1934713408   ;;  %vm1075_vm2 = vcmask 64512  }
   0x3   :  { %4998 = vmatpush3.bf16.msra.mxu1 %v5293_v1  ;;  %v48_v7 = vld [vmem:[%s6461_s11] sm:$0xff]  ;;  %v222_v29 = vunpack.c.l.s4 %v5399_v28  ;;  %vm1551_vm4 = vcmask 1043456   ;;  %s5401_s20 = smov 16   ;;  %s5402_s21 = smov 8   ;;  %vm2215_vm5 = vcmask 130048   ;;  %vm2218_vm6 = vcmask 195584  }
   0x4   :  { %4999 = vmatprep.subr.bf16.mxu1 %v5391_v0  ;;  %v5494_v6 = vsub.s32 0, %v5491_v5  ;;  %v5531_v19 = vsub.s32 1, %v5491_v5  ;;  %v56_v20 = vld [vmem:[%s6462_s2] sm:$0x3]  ;;  %v191_v27 = vunpack.c.0.s8 %v190_v26  ;;  %vm4726_vm7 = vcmask 523264  }
   0x5   :  { %v223_v33 = vunpack.c.0.s8 %v222_v29  ;;  %vm4813_vm8 = vcmask 257024  }
   0x6   :  { %v104_v8 = vrot.slane %v48_v7, %v5494_v6  ;;  %v67_v23 = vrot.slane %v56_v20, %v5531_v19  ;;  %v60_v24 = vrot.slane %v56_v20, %v5494_v6  ;;  %v5549_v31 = vsub.s32 %v191_v27, %v5491_v5 }
   0x7   :  { %5000 = vmatpush3.bf16.msra.mxu1 %v5294_v2  ;;  %v5559_v38 = vsub.s32 %v223_v33, %v5491_v5 }
   0x8   :  { %5005 = vmatprep.subr.bf16.mxu1 %v5391_v0 }
   0xa   :  { %5002 = vmatmul.mubr.msk.bf16.vlgmr.msra.gmra.mrb[0].mxu1 %vm122_vm1, %v42_v3 }
   0xb   :  { %5007 = vmatprep.mubr.msk.bf16.mxu1 %vm5392_vm0, %v5391_v0 }
  0xdd   :  { %v160_v9 = vpop.f32.mrb[0].mxu1 }
  0xde   :  { %v161_v10 = vadd.f32 %v160_v9, %v104_v8  ;;  %v5003_v11 = vpop.f32.mrb[1].mxu1 }
  0xdf   :  { %v163_v12 = vpop.f32.mrb[2].mxu1 }
  0xe0   :  { %181 = vrot.lane.b32.xlu1 %v161_v10, %s5393_s28  ;;  %169 = vrot.lane.b32.xlu0 %v161_v10, %s5394_s29  ;;  %v5004_v13 = vpop.f32.mrb[3].mxu1  ;;  %v5502_v14 = vadd.f32 %v163_v12, %v104_v8 }
  0xe4   :  { %175 = vrot.lane.b32.xlu0 %v161_v10, %s5395_s30  ;;  %171 = vrot.lane.b32.xlu1 %v5502_v14, %s5394_s29 }
  0xe8   :  { %177 = vrot.lane.b32.xlu0 %v5502_v14, %s5395_s30  ;;  %183 = vrot.lane.b32.xlu1 %v5502_v14, %s5393_s28 }
  0xec   :  { %467 = vrot.lane.b32.xlu0 %v161_v10, %s5396_s13 }
 0x152   :  { %v5512_v15 = vpop.permute.xlu0 %169  ;;  %v5514_v16 = vpop.permute.xlu1 %181 }
 0x153   :  { %471 = vrot.lane.b32.xlu1 %v5512_v15, %s5396_s13  ;;  %v203_v32 = vcombine.low %v5512_v15, %v5514_v16  ;;  %v204_v36 = vcombine.high %v5512_v15, %v5514_v16 }
 0x155   :  { %v211_v37 = vrot.slane %v203_v32, %v5549_v31  ;;  %v218_v42 = vrot.slane %v204_v36, %v5549_v31 }
 0x156   :  { %v5518_v17 = vpop.permute.xlu0 %175  ;;  %v5524_v18 = vpop.permute.xlu1 %171 }
 0x157   :  { %475 = vrot.lane.b32.xlu0 %v5518_v17, %s5396_s13  ;;  %479 = vrot.lane.b32.xlu1 %v5514_v16, %s5396_s13  ;;  %v187_v30 = vcombine.low %v161_v10, %v5518_v17  ;;  %v188_v34 = vcombine.high %v161_v10, %v5518_v17 }
 0x159   :  { %v195_v35 = vrot.slane %v187_v30, %v5549_v31  ;;  %v202_v39 = vrot.slane %v188_v34, %v5549_v31 }
 0x15a   :  { %v5536_v21 = vpop.permute.xlu0 %177  ;;  %v5538_v22 = vpop.permute.xlu1 %183 }
 0x15b   :  { %469 = vrot.lane.b32.xlu0 %v5502_v14, %s5396_s13  ;;  %473 = vrot.lane.b32.xlu1 %v5524_v18, %s5396_s13  ;;  %v219_v40 = vcombine.low %v195_v35, %v211_v37  ;;  %v220_v41 = vcombine.high %v195_v35, %v211_v37  ;;  %v255_v43 = vcombine.low %v5502_v14, %v5536_v21 }
 0x15c   :  { %v256_v44 = vcombine.high %v5502_v14, %v5536_v21  ;;  %v271_v45 = vcombine.low %v5524_v18, %v5538_v22  ;;  %v272_v46 = vcombine.high %v5524_v18, %v5538_v22  ;;  %v235_v49 = vcombine.low %v202_v39, %v218_v42 }
 0x15d   :  { %v227_v47 = vrot.slane %v219_v40, %v5559_v38  ;;  %v234_v48 = vrot.slane %v220_v41, %v5559_v38  ;;  %v236_v50 = vcombine.high %v202_v39, %v218_v42  ;;  %v263_v51 = vrot.slane %v255_v43, %v5549_v31 }
 0x15e   :  { %v270_v52 = vrot.slane %v256_v44, %v5549_v31  ;;  %v279_v53 = vrot.slane %v271_v45, %v5549_v31  ;;  %v286_v54 = vrot.slane %v272_v46, %v5549_v31  ;;  %v468_v55 = vpop.permute.xlu0 %467  ;;  %v243_v57 = vrot.slane %v235_v49, %v5559_v38 }
 0x15f   :  { %477 = vrot.lane.b32.xlu0 %v5536_v21, %s5396_s13  ;;  %481 = vrot.lane.b32.xlu1 %v5538_v22, %s5396_s13  ;;  %v250_v58 = vrot.slane %v236_v50, %v5559_v38  ;;  %v323_v59 = vcombine.low %v227_v47, %v234_v48  ;;  %v4825_v60 = vcombine.high %v227_v47, %v234_v48 }
 0x160   :  { %v287_v61 = vcombine.low %v263_v51, %v279_v53  ;;  %v288_v62 = vcombine.high %v263_v51, %v279_v53  ;;  %v303_v63 = vcombine.low %v270_v52, %v286_v54  ;;  %v304_v1 = vcombine.high %v270_v52, %v286_v54 }
 0x161   :  { %v5580_v11 = vrot.slane %v323_v59, %v5549_v31  ;;  %v5583_v12 = vrot.slane %v4825_v60, %v5549_v31  ;;  %v339_v13 = vcombine.low %v243_v57, %v250_v58  ;;  %v4826_v20 = vcombine.high %v243_v57, %v250_v58 }
 0x162   :  { %v5590_v27 = vrot.slane %v287_v61, %v5559_v38  ;;  %v5593_v28 = vrot.slane %v288_v62, %v5559_v38  ;;  %v5596_v29 = vrot.slane %v303_v63, %v5559_v38  ;;  %v5599_v30 = vrot.slane %v304_v1, %v5559_v38 }
 0x163   :  { %69 = vbcast.lane.b32.xlu1 %v67_v23, 256  ;;  %62 = vbcast.lane.b32.xlu0 %v60_v24, 256  ;;  %v5602_v39 = vrot.slane %v339_v13, %v5549_v31  ;;  %v5605_v40 = vrot.slane %v4826_v20, %v5549_v31  ;;  %v355_v49 = vcombine.low %v5580_v11, %v5583_v12 }
 0x164   :  { %v391_v45 = vcombine.low %v5590_v27, %v5593_v28  ;;  %v4827_v46 = vcombine.high %v5590_v27, %v5593_v28  ;;  %v407_v47 = vcombine.low %v5596_v29, %v5599_v30 }
 0x167   :  { %771 = vrot.lane.b32.xlu1 %v161_v10, %s5397_s16 }
 0x1c5   :  { %v472_v56 = vpop.permute.xlu1 %471 }
 0x1c9   :  { %v476_v2 = vpop.permute.xlu0 %475  ;;  %v480_v3 = vpop.permute.xlu1 %479 }
 0x1ca   :  { %v491_v7 = vcombine.low %v468_v55, %v476_v2  ;;  %v492_v8 = vcombine.high %v468_v55, %v476_v2  ;;  %v507_v9 = vcombine.low %v472_v56, %v480_v3  ;;  %v508_v10 = vcombine.high %v472_v56, %v480_v3 }
 0x1cc   :  { %v499_v23 = vrot.slane %v491_v7, %v5549_v31  ;;  %v506_v24 = vrot.slane %v492_v8, %v5549_v31  ;;  %v515_v25 = vrot.slane %v507_v9, %v5549_v31  ;;  %v522_v26 = vrot.slane %v508_v10, %v5549_v31 }
 0x1cd   :  { %v470_v32 = vpop.permute.xlu0 %469  ;;  %v474_v37 = vpop.permute.xlu1 %473 }
 0x1ce   :  { %v523_v33 = vcombine.low %v499_v23, %v515_v25  ;;  %v524_v34 = vcombine.high %v499_v23, %v515_v25  ;;  %v539_v35 = vcombine.low %v506_v24, %v522_v26  ;;  %v540_v36 = vcombine.high %v506_v24, %v522_v26 }
 0x1d0   :  { %v531_v41 = vrot.slane %v523_v33, %v5559_v38  ;;  %v538_v42 = vrot.slane %v524_v34, %v5559_v38  ;;  %v547_v43 = vrot.slane %v539_v35, %v5559_v38  ;;  %v554_v44 = vrot.slane %v540_v36, %v5559_v38 }
 0x1d1   :  { %v478_v48 = vpop.permute.xlu0 %477  ;;  %v482_v54 = vpop.permute.xlu1 %481 }
 0x1d2   :  { %v627_v50 = vcombine.low %v531_v41, %v538_v42  ;;  %v4829_v51 = vcombine.high %v531_v41, %v538_v42  ;;  %v643_v52 = vcombine.low %v547_v43, %v554_v44  ;;  %v4830_v53 = vcombine.high %v547_v43, %v554_v44 }
 0x1d3   :  { %v559_v55 = vcombine.low %v470_v32, %v478_v48  ;;  %v560_v56 = vcombine.high %v470_v32, %v478_v48  ;;  %v575_v57 = vcombine.low %v474_v37, %v482_v54  ;;  %v576_v58 = vcombine.high %v474_v37, %v482_v54 }
 0x1d4   :  { %v634_v59 = vrot.slane %v627_v50, %v5549_v31  ;;  %v642_v60 = vrot.slane %v4829_v51, %v5549_v31  ;;  %v650_v61 = vrot.slane %v643_v52, %v5549_v31  ;;  %v658_v62 = vrot.slane %v4830_v53, %v5549_v31 }
 0x1d5   :  { %v567_v63 = vrot.slane %v559_v55, %v5549_v31  ;;  %v574_v1 = vrot.slane %v560_v56, %v5549_v31  ;;  %v583_v2 = vrot.slane %v575_v57, %v5549_v31  ;;  %v590_v3 = vrot.slane %v576_v58, %v5549_v31 }
 0x1d6   :  { %v659_v7 = vcombine.low %v634_v59, %v642_v60  ;;  %v675_v8 = vcombine.low %v650_v61, %v658_v62  ;;  %v660_v9 = vcombine.high %v634_v59, %v642_v60  ;;  %v676_v10 = vcombine.high %v650_v61, %v658_v62 }
 0x1d7   :  { %v591_v13 = vcombine.low %v567_v63, %v583_v2  ;;  %v592_v20 = vcombine.high %v567_v63, %v583_v2  ;;  %v607_v23 = vcombine.low %v574_v1, %v590_v3  ;;  %v608_v24 = vcombine.high %v574_v1, %v590_v3 }
 0x1d8   :  { %v667_v25 = vrot.slane %v659_v7, %v5559_v38  ;;  %v683_v26 = vrot.slane %v675_v8, %v5559_v38  ;;  %v371_v32 = vcombine.low %v5602_v39, %v5605_v40  ;;  %v674_v33 = vrot.slane %v660_v9, %v5559_v38 }
 0x1d9   :  { %v599_v34 = vrot.slane %v591_v13, %v5559_v38  ;;  %v606_v35 = vrot.slane %v592_v20, %v5559_v38  ;;  %v615_v36 = vrot.slane %v607_v23, %v5559_v38  ;;  %v622_v37 = vrot.slane %v608_v24, %v5559_v38 }
 0x1da   :  { %v691_v41 = vcombine.low %v667_v25, %v683_v26  ;;  %v692_v42 = vcombine.high %v667_v25, %v683_v26  ;;  %v363_v43 = vrot.slane %v355_v49, %v5559_v38  ;;  %v690_v44 = vrot.slane %v676_v10, %v5559_v38 }
 0x1db   :  { %v695_v48 = vcombine.low %v599_v34, %v606_v35  ;;  %v4831_v50 = vcombine.high %v599_v34, %v606_v35  ;;  %v711_v51 = vcombine.low %v615_v36, %v622_v37  ;;  %v4832_v52 = vcombine.high %v615_v36, %v622_v37 }
 0x1dc   :  { %v763_v53 = vpack.c.bf16 %v691_v41, %v691_v41  ;;  %v764_v54 = vpack.c.bf16 %v692_v42, %v692_v42  ;;  %v379_v55 = vrot.slane %v371_v32, %v5559_v38  ;;  %v693_v56 = vcombine.low %v674_v33, %v690_v44 }
 0x1dd   :  { %v702_v57 = vrot.slane %v695_v48, %v5549_v31  ;;  %v710_v58 = vrot.slane %v4831_v50, %v5549_v31  ;;  %v718_v59 = vrot.slane %v711_v51, %v5549_v31  ;;  %v726_v60 = vrot.slane %v4832_v52, %v5549_v31 }
 0x1de   :  { %v4828_v49 = vcombine.high %v5596_v29, %v5599_v30  ;;  %v1080_v61 = vsel %vm1075_vm2, %v763_v53, 0  ;;  %v1126_v62 = vsel %vm1075_vm2, %v764_v54, 0  ;;  %v694_v63 = vcombine.high %v674_v33, %v690_v44 }
 0x1df   :  { %5006 = vmatpush3.bf16.xpose.msra.mxu1 %v1080_v61  ;;  %5012 = vmatpush3.bf16.xpose.msra.mxu0 %v1126_v62  ;;  %v356_v1 = vcombine.high %v5580_v11, %v5583_v12  ;;  %v727_v2 = vcombine.low %v702_v57, %v710_v58  ;;  %v743_v3 = vcombine.low %v718_v59, %v726_v60 }
 0x1e0   :  { %v387_v7 = vcombine.low %v363_v43, %v379_v55  ;;  %v388_v8 = vcombine.high %v363_v43, %v379_v55  ;;  %5017 = vmatprep.subr.bf16.mxu1 %v5391_v0  ;;  %5023 = vmatprep.subr.bf16.mxu0 %v5391_v0  ;;  %v372_v9 = vcombine.high %v5602_v39, %v5605_v40 }
 0x1e1   :  { %v765_v10 = vpack.c.bf16 %v693_v56, %v693_v56  ;;  %v766_v13 = vpack.c.bf16 %v694_v63, %v694_v63  ;;  %v735_v20 = vrot.slane %v727_v2, %v5559_v38  ;;  %v751_v23 = vrot.slane %v743_v3, %v5559_v38 }
 0x1e2   :  { %v398_v11 = vrot.slane %v391_v45, %v5549_v31  ;;  %v406_v12 = vrot.slane %v4827_v46, %v5549_v31  ;;  %v414_v39 = vrot.slane %v407_v47, %v5549_v31  ;;  %v422_v40 = vrot.slane %v4828_v49, %v5549_v31 }
 0x1e3   :  { %v459_v24 = vpack.c.bf16 %v387_v7, %v387_v7  ;;  %v460_v25 = vpack.c.bf16 %v388_v8, %v388_v8  ;;  %v370_v26 = vrot.slane %v356_v1, %v5559_v38  ;;  %v386_v32 = vrot.slane %v372_v9, %v5559_v38 }
 0x1e4   :  { %v1172_v45 = vsel %vm1075_vm2, %v765_v10, 0  ;;  %v728_v33 = vcombine.high %v702_v57, %v710_v58  ;;  %v1218_v27 = vsel %vm1075_vm2, %v766_v13, 0  ;;  %v759_v28 = vcombine.low %v735_v20, %v751_v23 }
 0x1e5   :  { %v760_v29 = vcombine.high %v735_v20, %v751_v23  ;;  %v744_v30 = vcombine.high %v718_v59, %v726_v60  ;;  %v423_v46 = vcombine.low %v398_v11, %v406_v12  ;;  %v389_v47 = vcombine.low %v370_v26, %v386_v32  ;;  %v63_v23 = vpop.permute.xlu0 %62 }
 0x1e6   :  { %5008 = vmatmul.mubr.msk.bf16.vlgmr.msra.gmra.mrb[4].mxu1 %vm1075_vm2, %v459_v24  ;;  %5014 = vmatmul.mubr.msk.bf16.vlgmr.msra.gmra.mrb[0].mxu0 %vm1075_vm2, %v460_v25  ;;  %v390_v34 = vcombine.high %v370_v26, %v386_v32  ;;  %v439_v35 = vcombine.low %v414_v39, %v422_v40  ;;  %v767_v36 = vpack.c.bf16 %v759_v28, %v759_v28  ;;  %v53_v10 = vand.u32 127, %v50_v4 }
 0x1e7   :  { %5018 = vmatpush3.bf16.xpose.msra.mxu1 %v1172_v45  ;;  %5024 = vmatpush3.bf16.xpose.msra.mxu0 %v1218_v27  ;;  %v768_v37 = vpack.c.bf16 %v760_v29, %v760_v29  ;;  %v742_v41 = vrot.slane %v728_v33, %v5559_v38  ;;  %v758_v42 = vrot.slane %v744_v30, %v5559_v38  ;;  %v5400_v13 = vmov -1e+09  }
 0x1e8   :  { %5019 = vmatprep.mubr.msk.bf16.mxu1 %vm5392_vm0, %v5391_v0  ;;  %5025 = vmatprep.mubr.msk.bf16.mxu0 %vm5392_vm0, %v5391_v0  ;;  %v461_v43 = vpack.c.bf16 %v389_v47, %v389_v47  ;;  %v462_v44 = vpack.c.bf16 %v390_v34, %v390_v34  ;;  %v431_v48 = vrot.slane %v423_v46, %v5559_v38  ;;  %v1264_v51 = vsel %vm1075_vm2, %v767_v36, 0 }
 0x1e9   :  { %5029 = vmatprep.subr.bf16.mxu1 %v5391_v0  ;;  %5035 = vmatprep.subr.bf16.mxu0 %v5391_v0  ;;  %v447_v50 = vrot.slane %v439_v35, %v5559_v38  ;;  %v1310_v52 = vsel %vm1075_vm2, %v768_v37, 0  ;;  %v761_v53 = vcombine.low %v742_v41, %v758_v42  ;;  %v762_v54 = vcombine.high %v742_v41, %v758_v42 }
 0x1ea   :  { %v424_v55 = vcombine.high %v398_v11, %v406_v12  ;;  %v440_v58 = vcombine.high %v414_v39, %v422_v40  ;;  %vm54_vm3 = vcmp.ge.s32.totalorder %v5491_v5, %v53_v10 }
 0x1eb   :  { %v455_v56 = vcombine.low %v431_v48, %v447_v50  ;;  %v456_v57 = vcombine.high %v431_v48, %v447_v50  ;;  %v769_v59 = vpack.c.bf16 %v761_v53, %v761_v53  ;;  %v770_v60 = vpack.c.bf16 %v762_v54, %v762_v54 }
 0x1ec   :  { %v438_v62 = vrot.slane %v424_v55, %v5559_v38  ;;  %v454_v63 = vrot.slane %v440_v58, %v5559_v38  ;;  %v55_v20 = vsel %vm54_vm3, 0.0, %v5400_v13 }
 0x1ed   :  { %v463_v49 = vpack.c.bf16 %v455_v56, %v455_v56  ;;  %v464_v61 = vpack.c.bf16 %v456_v57, %v456_v57  ;;  %v1356_v1 = vsel %vm1075_vm2, %v769_v59, 0  ;;  %v1402_v2 = vsel %vm1075_vm2, %v770_v60, 0 }
 0x1ee   :  { %5020 = vmatmul.mubr.msk.bf16.vlgmr.msra.gmra.mrb[8].mxu1 %vm1075_vm2, %v461_v43  ;;  %5026 = vmatmul.mubr.msk.bf16.vlgmr.msra.gmra.mrb[4].mxu0 %vm1075_vm2, %v462_v44  ;;  %v457_v3 = vcombine.low %v438_v62, %v454_v63  ;;  %v458_v7 = vcombine.high %v438_v62, %v454_v63  ;;  %v71_v11 = vadd.f32 %v63_v23, %v55_v20  ;;  %v70_v44 = vpop.permute.xlu1 %69 }
 0x1ef   :  { %5030 = vmatpush3.bf16.xpose.msra.mxu1 %v1264_v51  ;;  %5036 = vmatpush3.bf16.xpose.msra.mxu0 %v1310_v52  ;;  %v72_v48 = vadd.f32 %v70_v44, %v55_v20 }
 0x1f0   :  { %5031 = vmatprep.mubr.msk.bf16.mxu1 %vm5392_vm0, %v5391_v0  ;;  %5037 = vmatprep.mubr.msk.bf16.mxu0 %vm5392_vm0, %v5391_v0  ;;  %v465_v8 = vpack.c.bf16 %v457_v3, %v457_v3  ;;  %v466_v9 = vpack.c.bf16 %v458_v7, %v458_v7 }
 0x1f1   :  { %5041 = vmatprep.subr.bf16.mxu1 %v5391_v0  ;;  %5047 = vmatprep.subr.bf16.mxu0 %v5391_v0 }
 0x1f6   :  { %5032 = vmatmul.mubr.msk.bf16.vlgmr.msra.gmra.mrb[12].mxu1 %vm1075_vm2, %v463_v49  ;;  %5038 = vmatmul.mubr.msk.bf16.vlgmr.msra.gmra.mrb[8].mxu0 %vm1075_vm2, %v464_v61 }
 0x1f7   :  { %5042 = vmatpush3.bf16.xpose.msra.mxu1 %v1356_v1  ;;  %5048 = vmatpush3.bf16.xpose.msra.mxu0 %v1402_v2 }
 0x1f8   :  { %5043 = vmatprep.mubr.msk.bf16.mxu1 %vm5392_vm0, %v5391_v0  ;;  %5049 = vmatprep.mubr.msk.bf16.mxu0 %vm5392_vm0, %v5391_v0 }
 0x1f9   :  { %5053 = vmatprep.subr.bf16.mxu1 %v5391_v0  ;;  %5059 = vmatprep.subr.bf16.mxu0 %v5391_v0 }
 0x1fe   :  { %5044 = vmatmul.mubr.msk.bf16.vlgmr.msra.gmra.mrb[16].mxu1 %vm1075_vm2, %v465_v8  ;;  %5050 = vmatmul.mubr.msk.bf16.vlgmr.msra.gmra.mrb[12].mxu0 %vm1075_vm2, %v466_v9 }
 0x1ff   :  { %5055 = vmatprep.mubr.msk.bf16.mxu1 %vm5392_vm0, %v5391_v0  ;;  %5061 = vmatprep.mubr.msk.bf16.mxu0 %vm5392_vm0, %v5391_v0 }
 0x2b9   :  { %v1116_v12 = vpop.f32.mrb[4].mxu1  ;;  %v1162_v39 = vpop.f32.mrb[0].mxu0 }
 0x2ba   :  { %v5714_v40 = vadd.f32 %v1116_v12, %v71_v11  ;;  %v5716_v24 = vadd.f32 %v1162_v39, %v71_v11  ;;  %v5009_v25 = vpop.f32.mrb[5].mxu1  ;;  %v5015_v26 = vpop.f32.mrb[1].mxu0 }
 0x2bb   :  { %v1119_v32 = vpop.f32.mrb[6].mxu1  ;;  %v1165_v45 = vpop.f32.mrb[2].mxu0 }
 0x2bc   :  { %v5010_v33 = vpop.f32.mrb[7].mxu1  ;;  %v5016_v27 = vpop.f32.mrb[3].mxu0  ;;  %v1455_v4 = vsel %vm1075_vm2, %v5716_v24, -inf  ;;  %v1452_v28 = vsel %vm1075_vm2, %v5714_v40, -inf }
 0x2bd   :  { %1456 = vmax.xlane.f32.xlu1 %v1455_v4  ;;  %1453 = vmax.xlane.f32.xlu0 %v1452_v28 }
 0x2c1   :  { %v1208_v29 = vpop.f32.mrb[8].mxu1  ;;  %v1254_v30 = vpop.f32.mrb[4].mxu0 }
 0x2c2   :  { %v1446_v46 = vadd.f32 %v1208_v29, %v71_v11  ;;  %v5021_v47 = vpop.f32.mrb[9].mxu1  ;;  %v5027_v34 = vpop.f32.mrb[5].mxu0  ;;  %v1447_v37 = vadd.f32 %v1254_v30, %v71_v11 }
 0x2c3   :  { %v1211_v35 = vpop.f32.mrb[10].mxu1  ;;  %v1257_v36 = vpop.f32.mrb[6].mxu0 }
 0x2c4   :  { %v5022_v41 = vpop.f32.mrb[11].mxu1  ;;  %v5028_v42 = vpop.f32.mrb[7].mxu0  ;;  %v1458_v43 = vsel %vm1075_vm2, %v1446_v46, -inf  ;;  %v1461_v50 = vsel %vm1075_vm2, %v1447_v37, -inf }
 0x2c5   :  { %1459 = vmax.xlane.f32.xlu0 %v1458_v43  ;;  %v772_v11 = vpop.permute.xlu1 %771 }
 0x2c9   :  { %v1346_v51 = vpop.f32.mrb[8].mxu0  ;;  %1462 = vmax.xlane.f32.xlu0 %v1461_v50  ;;  %v1300_v52 = vpop.f32.mrb[12].mxu1 }
 0x2ca   :  { %v1449_v53 = vadd.f32 %v1346_v51, %v72_v48  ;;  %v1448_v54 = vadd.f32 %v1300_v52, %v72_v48  ;;  %v5033_v55 = vpop.f32.mrb[13].mxu1  ;;  %v5039_v56 = vpop.f32.mrb[9].mxu0 }
 0x2cb   :  { %v1303_v57 = vpop.f32.mrb[14].mxu1  ;;  %v1349_v58 = vpop.f32.mrb[10].mxu0 }
 0x2cc   :  { %v5034_v59 = vpop.f32.mrb[15].mxu1  ;;  %v5040_v60 = vpop.f32.mrb[11].mxu0  ;;  %v1467_v49 = vsel %vm1075_vm2, %v1449_v53, -inf  ;;  %v1464_v61 = vsel %vm1075_vm2, %v1448_v54, -inf }
 0x2cd   :  { %1468 = vmax.xlane.f32.xlu0 %v1467_v49  ;;  %1465 = vmax.xlane.f32.xlu1 %v1464_v61 }
 0x2d1   :  { %v1392_v62 = vpop.f32.mrb[16].mxu1  ;;  %v1438_v63 = vpop.f32.mrb[12].mxu0 }
 0x2d2   :  { %v5726_v1 = vadd.f32 %v1392_v62, %v72_v48  ;;  %v5728_v2 = vadd.f32 %v1438_v63, %v72_v48  ;;  %v5045_v3 = vpop.f32.mrb[17].mxu1  ;;  %v5051_v7 = vpop.f32.mrb[13].mxu0 }
 0x2d3   :  { %v1395_v8 = vpop.f32.mrb[18].mxu1  ;;  %v1441_v9 = vpop.f32.mrb[14].mxu0 }
 0x2d4   :  { %v5046_v10 = vpop.f32.mrb[19].mxu1  ;;  %v5052_v13 = vpop.f32.mrb[15].mxu0  ;;  %v1473_v20 = vsel %vm1075_vm2, %v5728_v2, -inf  ;;  %v1470_v23 = vsel %vm1075_vm2, %v5726_v1, -inf }
 0x2d5   :  { %1474 = vmax.xlane.f32.xlu0 %v1473_v20  ;;  %1471 = vmax.xlane.f32.xlu1 %v1470_v23 }
 0x2e6   :  { %779 = vrot.lane.b32.xlu1 %v5518_v17, %s5397_s16 }
 0x2ea   :  { %783 = vrot.lane.b32.xlu1 %v5514_v16, %s5397_s16 }
 0x2eb   :  { %775 = vrot.lane.b32.xlu0 %v5512_v15, %s5397_s16 }
 0x2ee   :  { %773 = vrot.lane.b32.xlu1 %v5502_v14, %s5397_s16 }
 0x34a   :  { %v1457_v12 = vpop.xlane.xlu1 %1456  ;;  %v1454_v39 = vpop.xlane.xlu0 %1453 }
 0x34b   :  { %v1477_v25 = vsub.f32 %v5716_v24, %v1457_v12  ;;  %v1476_v26 = vsub.f32 %v5714_v40, %v1454_v39 }
 0x34d   :  { %v1486_v32 = vmul.f32 1.442695, %v1477_v25  ;;  %v1484_v45 = vmul.f32 1.442695, %v1476_v26 }
 0x34f   :  { %5312 = vpow2.f32 %v1486_v32 }
 0x350   :  { %5314 = vpow2.f32 %v1484_v45 }
 0x352   :  { %v1460_v17 = vpop.xlane.xlu0 %1459 }
 0x353   :  { %v1478_v33 = vsub.f32 %v1446_v46, %v1460_v17 }
 0x355   :  { %v1488_v16 = vmul.f32 1.442695, %v1478_v33 }
 0x356   :  { %v1463_v27 = vpop.xlane.xlu0 %1462 }
 0x357   :  { %5316 = vpow2.f32 %v1488_v16  ;;  %v1479_v15 = vsub.f32 %v1447_v37, %v1463_v27 }
 0x359   :  { %v5744_v4 = vpop.eup %5312  ;;  %v1490_v14 = vmul.f32 1.442695, %v1479_v15 }
 0x35a   :  { %v5746_v28 = vpop.eup %5314  ;;  %v1469_v29 = vpop.xlane.xlu0 %1468  ;;  %v1503_v40 = vsel %vm1075_vm2, %v5744_v4, 0.0 }
 0x35b   :  { %v1466_v30 = vpop.xlane.xlu1 %1465  ;;  %5318 = vpow2.f32 %v1490_v14  ;;  %v1481_v24 = vsub.f32 %v1449_v53, %v1469_v29  ;;  %1504 = vadd.xlane.f32.xlu0 %v1503_v40  ;;  %v1500_v46 = vsel %vm1075_vm2, %v5746_v28, 0.0 }
 0x35c   :  { %v1480_v47 = vsub.f32 %v1448_v54, %v1466_v30  ;;  %1501 = vadd.xlane.f32.xlu1 %v1500_v46 }
 0x35d   :  { %v1494_v34 = vmul.f32 1.442695, %v1481_v24 }
 0x35e   :  { %v1492_v35 = vmul.f32 1.442695, %v1480_v47 }
 0x360   :  { %5320 = vpow2.f32 %v1492_v35 }
 0x361   :  { %v5752_v36 = vpop.eup %5316  ;;  %5322 = vpow2.f32 %v1494_v34 }
 0x362   :  { %v5754_v37 = vpop.xlane.xlu1 %1471  ;;  %v1506_v41 = vsel %vm1075_vm2, %v5752_v36, 0.0  ;;  %v1475_v42 = vpop.xlane.xlu0 %1474 }
 0x363   :  { %1507 = vadd.xlane.f32.xlu0 %v1506_v41 }
 0x365   :  { %v5758_v43 = vpop.eup %5318 }
 0x366   :  { %v780_v44 = vpop.permute.xlu1 %779  ;;  %v1509_v48 = vsel %vm1075_vm2, %v5758_v43, 0.0  ;;  %v776_v53 = vpop.permute.xlu0 %775 }
 0x367   :  { %1510 = vadd.xlane.f32.xlu1 %v1509_v48  ;;  %v795_v50 = vcombine.low %v772_v11, %v780_v44  ;;  %v796_v51 = vcombine.high %v772_v11, %v780_v44  ;;  %v1483_v44 = vsub.f32 %v5728_v2, %v1475_v42 }
 0x369   :  { %v803_v59 = vrot.slane %v795_v50, %v5549_v31  ;;  %v810_v60 = vrot.slane %v796_v51, %v5549_v31  ;;  %v1498_v48 = vmul.f32 1.442695, %v1483_v44 }
 0x36a   :  { %v5762_v52 = vpop.eup %5320  ;;  %v784_v54 = vpop.permute.xlu1 %783 }
 0x36b   :  { %v5764_v55 = vpop.eup %5322  ;;  %v811_v56 = vcombine.low %v776_v53, %v784_v54  ;;  %v812_v57 = vcombine.high %v776_v53, %v784_v54  ;;  %v1512_v58 = vsel %vm1075_vm2, %v5762_v52, 0.0  ;;  %5324 = vpow2.f32 %v1498_v48 }
 0x36c   :  { %1513 = vadd.xlane.f32.xlu0 %v1512_v58  ;;  %v1515_v62 = vsel %vm1075_vm2, %v5764_v55, 0.0 }
 0x36d   :  { %v819_v49 = vrot.slane %v811_v56, %v5549_v31  ;;  %v826_v61 = vrot.slane %v812_v57, %v5549_v31 }
 0x36e   :  { %v774_v2 = vpop.permute.xlu1 %773 }
 0x36f   :  { %v827_v63 = vcombine.low %v803_v59, %v819_v49  ;;  %v828_v3 = vcombine.high %v803_v59, %v819_v49  ;;  %v843_v7 = vcombine.low %v810_v60, %v826_v61  ;;  %v844_v8 = vcombine.high %v810_v60, %v826_v61 }
 0x370   :  { %1516 = vadd.xlane.f32.xlu0 %v1515_v62 }
 0x371   :  { %v835_v9 = vrot.slane %v827_v63, %v5559_v38  ;;  %v842_v10 = vrot.slane %v828_v3, %v5559_v38  ;;  %v851_v13 = vrot.slane %v843_v7, %v5559_v38  ;;  %v858_v20 = vrot.slane %v844_v8, %v5559_v38 }
 0x373   :  { %v931_v23 = vcombine.low %v835_v9, %v842_v10  ;;  %v4833_v11 = vcombine.high %v835_v9, %v842_v10  ;;  %v947_v12 = vcombine.low %v851_v13, %v858_v20  ;;  %v4834_v39 = vcombine.high %v851_v13, %v858_v20 }
 0x375   :  { %v938_v25 = vrot.slane %v931_v23, %v5549_v31  ;;  %v946_v26 = vrot.slane %v4833_v11, %v5549_v31  ;;  %v954_v32 = vrot.slane %v947_v12, %v5549_v31  ;;  %v962_v45 = vrot.slane %v4834_v39, %v5549_v31  ;;  %v5799_v51 = vpop.eup %5324 }
 0x376   :  { %v1521_v53 = vsel %vm1075_vm2, %v5799_v51, 0.0 }
 0x377   :  { %v963_v17 = vcombine.low %v938_v25, %v946_v26  ;;  %v979_v33 = vcombine.low %v954_v32, %v962_v45  ;;  %v964_v16 = vcombine.high %v938_v25, %v946_v26  ;;  %v980_v27 = vcombine.high %v954_v32, %v962_v45 }
 0x378   :  { %781 = vrot.lane.b32.xlu1 %v5536_v21, %s5397_s16 }
 0x379   :  { %v971_v15 = vrot.slane %v963_v17, %v5559_v38  ;;  %v987_v14 = vrot.slane %v979_v33, %v5559_v38  ;;  %v978_v29 = vrot.slane %v964_v16, %v5559_v38  ;;  %v994_v30 = vrot.slane %v980_v27, %v5559_v38 }
 0x37b   :  { %v995_v40 = vcombine.low %v971_v15, %v987_v14  ;;  %v996_v24 = vcombine.high %v971_v15, %v987_v14  ;;  %v997_v47 = vcombine.low %v978_v29, %v994_v30  ;;  %v998_v46 = vcombine.high %v978_v29, %v994_v30 }
 0x37c   :  { %785 = vrot.lane.b32.xlu1 %v5538_v22, %s5397_s16  ;;  %v1482_v22 = vsub.f32 %v5726_v1, %v5754_v37 }
 0x37d   :  { %v1067_v34 = vpack.c.bf16 %v995_v40, %v995_v40  ;;  %v1068_v35 = vpack.c.bf16 %v996_v24, %v996_v24  ;;  %v1070_v60 = vpack.c.bf16 %v998_v46, %v998_v46  ;;  %v1069_v61 = vpack.c.bf16 %v997_v47, %v997_v47 }
 0x37e   :  { %v1496_v50 = vmul.f32 1.442695, %v1482_v22 }
 0x37f   :  { %v1553_v21 = vsel %vm1551_vm4, %v1067_v34, 0  ;;  %v1599_v41 = vsel %vm1551_vm4, %v1068_v35, 0  ;;  %v1691_v3 = vsel %vm1551_vm4, %v1070_v60, 0  ;;  %v1645_v8 = vsel %vm1551_vm4, %v1069_v61, 0 }
 0x380   :  { %5054 = vmatpush3.bf16.msra.mxu1 %v1553_v21  ;;  %5060 = vmatpush3.bf16.msra.mxu0 %v1599_v41  ;;  %5326 = vpow2.f32 %v1496_v50 }
 0x381   :  { %5065 = vmatprep.subr.bf16.mxu1 %v5391_v0  ;;  %5071 = vmatprep.subr.bf16.mxu0 %v5391_v0 }
 0x386   :  { %777 = vrot.lane.b32.xlu0 %v5524_v18, %s5397_s16 }
 0x38a   :  { %v5803_v54 = vpop.eup %5326 }
 0x38b   :  { %v1518_v18 = vsel %vm1075_vm2, %v5803_v54, 0.0 }
 0x3a0   :  { %1522 = vadd.xlane.f32.xlu1 %v1521_v53 }
 0x3a5   :  { %1519 = vadd.xlane.f32.xlu0 %v1518_v18 }
 0x3e8   :  { %v1505_v42 = vpop.xlane.xlu0 %1504 }
 0x3e9   :  { %5328 = vrcp.f32 %v1505_v42  ;;  %v1502_v56 = vpop.xlane.xlu1 %1501 }
 0x3ea   :  { %5330 = vrcp.f32 %v1502_v56 }
 0x3f0   :  { %v1508_v1 = vpop.xlane.xlu0 %1507 }
 0x3f1   :  { %5332 = vrcp.f32 %v1508_v1 }
 0x3f3   :  { %v5329_v37 = vpop.eup %5328 }
 0x3f4   :  { %v5331_v57 = vpop.eup %5330  ;;  %v1533_v58 = vmul.f32 %v5329_v37, %v5744_v4  ;;  %v1511_v59 = vpop.xlane.xlu1 %1510 }
 0x3f5   :  { %v1532_v49 = vmul.f32 %v5331_v57, %v5746_v28  ;;  %5334 = vrcp.f32 %v1511_v59 }
 0x3f6   :  { %v1541_v62 = vpack.c.bf16 %v1533_v58, %v1533_v58 }
 0x3f7   :  { %v1540_v63 = vpack.c.bf16 %v1532_v49, %v1532_v49 }
 0x3f8   :  { %5062 = vmatmul.mubr.msk.bf16.vlgmr.msra.gmra.mrb[16].mxu0 %vm1075_vm2, %v1541_v62  ;;  %v782_v28 = vpop.permute.xlu1 %781 }
 0x3f9   :  { %v1514_v7 = vpop.xlane.xlu0 %1513  ;;  %5056 = vmatmul.mubr.msk.bf16.vlgmr.msra.gmra.mrb[20].mxu1 %vm1075_vm2, %v1540_v63  ;;  %5072 = vmatpush3.bf16.msra.mxu0 %v1691_v3  ;;  %v863_v11 = vcombine.low %v774_v2, %v782_v28  ;;  %v864_v12 = vcombine.high %v774_v2, %v782_v28 }
 0x3fa   :  { %5066 = vmatpush3.bf16.msra.mxu1 %v1645_v8  ;;  %5067 = vmatprep.mubr.msk.bf16.mxu1 %vm5392_vm0, %v5391_v0  ;;  %5336 = vrcp.f32 %v1514_v7 }
 0x3fb   :  { %v5333_v4 = vpop.eup %5332  ;;  %5073 = vmatprep.mubr.msk.bf16.mxu0 %vm5392_vm0, %v5391_v0  ;;  %5077 = vmatprep.subr.bf16.mxu1 %v5391_v0  ;;  %v878_v17 = vrot.slane %v864_v12, %v5549_v31 }
 0x3fc   :  { %v1534_v9 = vmul.f32 %v5333_v4, %v5752_v36  ;;  %5083 = vmatprep.subr.bf16.mxu0 %v5391_v0  ;;  %v786_v39 = vpop.permute.xlu1 %785  ;;  %v871_v36 = vrot.slane %v863_v11, %v5549_v31 }
 0x3fd   :  { %v1517_v10 = vpop.xlane.xlu0 %1516 }
 0x3fe   :  { %v1542_v13 = vpack.c.bf16 %v1534_v9, %v1534_v9  ;;  %5338 = vrcp.f32 %v1517_v10 }
 0x3ff   :  { %v5335_v20 = vpop.eup %5334 }
 0x400   :  { %v1535_v23 = vmul.f32 %v5335_v20, %v5758_v43 }
 0x401   :  { %v778_v25 = vpop.permute.xlu0 %777  ;;  %5068 = vmatmul.mubr.msk.bf16.vlgmr.msra.gmra.mrb[24].mxu1 %vm1075_vm2, %v1542_v13 }
 0x402   :  { %v879_v26 = vcombine.low %v778_v25, %v786_v39  ;;  %v880_v32 = vcombine.high %v778_v25, %v786_v39  ;;  %v1543_v45 = vpack.c.bf16 %v1535_v23, %v1535_v23  ;;  %5079 = vmatprep.mubr.msk.bf16.mxu1 %vm5392_vm0, %v5391_v0 }
 0x404   :  { %v887_v33 = vrot.slane %v879_v26, %v5549_v31  ;;  %v894_v43 = vrot.slane %v880_v32, %v5549_v31  ;;  %5074 = vmatmul.mubr.msk.bf16.vlgmr.msra.gmra.mrb[20].mxu0 %vm1075_vm2, %v1543_v45  ;;  %v5337_v2 = vpop.eup %5336 }
 0x405   :  { %5085 = vmatprep.mubr.msk.bf16.mxu0 %vm5392_vm0, %v5391_v0  ;;  %v1536_v61 = vmul.f32 %v5337_v2, %v5762_v52 }
 0x406   :  { %v895_v16 = vcombine.low %v871_v36, %v887_v33  ;;  %v896_v27 = vcombine.high %v871_v36, %v887_v33  ;;  %v911_v15 = vcombine.low %v878_v17, %v894_v43  ;;  %v912_v14 = vcombine.high %v878_v17, %v894_v43 }
 0x407   :  { %v1544_v9 = vpack.c.bf16 %v1536_v61, %v1536_v61 }
 0x408   :  { %v903_v29 = vrot.slane %v895_v16, %v5559_v38  ;;  %v910_v30 = vrot.slane %v896_v27, %v5559_v38  ;;  %v919_v40 = vrot.slane %v911_v15, %v5559_v38  ;;  %v926_v24 = vrot.slane %v912_v14, %v5559_v38  ;;  %v5339_v57 = vpop.eup %5338 }
 0x409   :  { %v1537_v62 = vmul.f32 %v5339_v57, %v5764_v55 }
 0x40a   :  { %v999_v47 = vcombine.low %v903_v29, %v910_v30  ;;  %v4835_v46 = vcombine.high %v903_v29, %v910_v30  ;;  %v1015_v34 = vcombine.low %v919_v40, %v926_v24  ;;  %v4836_v35 = vcombine.high %v919_v40, %v926_v24 }
 0x40b   :  { %v1545_v10 = vpack.c.bf16 %v1537_v62, %v1537_v62 }
 0x40c   :  { %v1006_v21 = vrot.slane %v999_v47, %v5549_v31  ;;  %v1014_v41 = vrot.slane %v4835_v46, %v5549_v31  ;;  %v1022_v44 = vrot.slane %v1015_v34, %v5549_v31  ;;  %v1030_v48 = vrot.slane %v4836_v35, %v5549_v31 }
 0x40e   :  { %v1031_v22 = vcombine.low %v1006_v21, %v1014_v41  ;;  %v1047_v50 = vcombine.low %v1022_v44, %v1030_v48  ;;  %v1032_v53 = vcombine.high %v1006_v21, %v1014_v41  ;;  %v1048_v18 = vcombine.high %v1022_v44, %v1030_v48 }
 0x410   :  { %v1039_v42 = vrot.slane %v1031_v22, %v5559_v38  ;;  %v1055_v56 = vrot.slane %v1047_v50, %v5559_v38  ;;  %v1046_v1 = vrot.slane %v1032_v53, %v5559_v38  ;;  %v1062_v37 = vrot.slane %v1048_v18, %v5559_v38 }
 0x412   :  { %v1063_v58 = vcombine.low %v1039_v42, %v1055_v56  ;;  %v1064_v59 = vcombine.high %v1039_v42, %v1055_v56  ;;  %v1065_v60 = vcombine.low %v1046_v1, %v1062_v37  ;;  %v1066_v49 = vcombine.high %v1046_v1, %v1062_v37 }
 0x414   :  { %v1071_v63 = vpack.c.bf16 %v1063_v58, %v1063_v58  ;;  %v1072_v3 = vpack.c.bf16 %v1064_v59, %v1064_v59  ;;  %v1073_v4 = vpack.c.bf16 %v1065_v60, %v1065_v60  ;;  %v1074_v28 = vpack.c.bf16 %v1066_v49, %v1066_v49 }
 0x416   :  { %v1737_v7 = vsel %vm1551_vm4, %v1071_v63, 0  ;;  %v1783_v8 = vsel %vm1551_vm4, %v1072_v3, 0  ;;  %v1829_v52 = vsel %vm1551_vm4, %v1073_v4, 0  ;;  %v1875_v55 = vsel %vm1551_vm4, %v1074_v28, 0 }
 0x417   :  { %5078 = vmatpush3.bf16.msra.mxu1 %v1737_v7  ;;  %5084 = vmatpush3.bf16.msra.mxu0 %v1783_v8 }
 0x418   :  { %5089 = vmatprep.subr.bf16.mxu1 %v5391_v0  ;;  %5095 = vmatprep.subr.bf16.mxu0 %v5391_v0 }
 0x41a   :  { %5080 = vmatmul.mubr.msk.bf16.vlgmr.msra.gmra.mrb[28].mxu1 %vm1075_vm2, %v1544_v9  ;;  %5086 = vmatmul.mubr.msk.bf16.vlgmr.msra.gmra.mrb[24].mxu0 %vm1075_vm2, %v1545_v10 }
 0x41b   :  { %5090 = vmatpush3.bf16.msra.mxu1 %v1829_v52  ;;  %5096 = vmatpush3.bf16.msra.mxu0 %v1875_v55 }
 0x41c   :  { %5097 = vmatprep.mubr.msk.bf16.mxu0 %vm5392_vm0, %v5391_v0  ;;  %5091 = vmatprep.mubr.msk.bf16.mxu1 %vm5392_vm0, %v5391_v0 }
 0x41d   :  { %5101 = vmatprep.subr.bf16.mxu1 %v5391_v0  ;;  %5109 = vmatprep.subr.bf16.mxu0 %v5391_v0 }
 0x42d   :  { %v1523_v13 = vpop.xlane.xlu1 %1522 }
 0x42e   :  { %5340 = vrcp.f32 %v1523_v13 }
 0x432   :  { %v1520_v20 = vpop.xlane.xlu0 %1519 }
 0x433   :  { %5342 = vrcp.f32 %v1520_v20 }
 0x438   :  { %v5341_v23 = vpop.eup %5340 }
 0x439   :  { %v1539_v11 = vmul.f32 %v5341_v23, %v5799_v51 }
 0x43b   :  { %v1547_v12 = vpack.c.bf16 %v1539_v11, %v1539_v11 }
 0x43d   :  { %v5343_v39 = vpop.eup %5342  ;;  %5098 = vmatmul.mubr.msk.bf16.vlgmr.msra.gmra.mrb[28].mxu0 %vm1075_vm2, %v1547_v12 }
 0x43e   :  { %v1538_v25 = vmul.f32 %v5343_v39, %v5803_v54  ;;  %5113 = vmatprep.mubr.msk.bf16.mxu0 %vm5392_vm0, %v5391_v0 }
 0x440   :  { %v1546_v26 = vpack.c.bf16 %v1538_v25, %v1538_v25 }
 0x442   :  { %5092 = vmatmul.mubr.msk.bf16.vlgmr.msra.gmra.mrb[32].mxu1 %vm1075_vm2, %v1546_v26 }
 0x443   :  { %5105 = vmatprep.mubr.msk.bf16.mxu1 %vm5392_vm0, %v5391_v0 }
 0x4cb   :  { %v1635_v32 = vpop.f32.mrb[16].mxu0 }
 0x4cc   :  { %v1589_v45 = vpop.f32.mrb[20].mxu1  ;;  %v5063_v36 = vpop.f32.mrb[17].mxu0 }
 0x4cd   :  { %v5057_v17 = vpop.f32.mrb[21].mxu1  ;;  %v1638_v51 = vpop.f32.mrb[18].mxu0 }
 0x4ce   :  { %v1592_v33 = vpop.f32.mrb[22].mxu1  ;;  %v5064_v43 = vpop.f32.mrb[19].mxu0 }
 0x4cf   :  { %v5058_v16 = vpop.f32.mrb[23].mxu1 }
 0x4d4   :  { %v1681_v27 = vpop.f32.mrb[24].mxu1 }
 0x4d5   :  { %v1917_v15 = vcombine.low %v1589_v45, %v1681_v27  ;;  %v1918_v54 = vcombine.high %v1589_v45, %v1681_v27  ;;  %v5069_v14 = vpop.f32.mrb[25].mxu1 }
 0x4d6   :  { %v1684_v29 = vpop.f32.mrb[26].mxu1 }
 0x4d7   :  { %v5070_v30 = vpop.f32.mrb[27].mxu1  ;;  %v1727_v40 = vpop.f32.mrb[20].mxu0  ;;  %v1925_v35 = vrot.slane %v1917_v15, %v5549_v31  ;;  %v1932_v21 = vrot.slane %v1918_v54, %v5549_v31 }
 0x4d8   :  { %v1933_v24 = vcombine.low %v1635_v32, %v1727_v40  ;;  %v1934_v47 = vcombine.high %v1635_v32, %v1727_v40  ;;  %v5075_v46 = vpop.f32.mrb[21].mxu0 }
 0x4d9   :  { %v1730_v34 = vpop.f32.mrb[22].mxu0 }
 0x4da   :  { %v1941_v41 = vrot.slane %v1933_v24, %v5549_v31  ;;  %v1948_v44 = vrot.slane %v1934_v47, %v5549_v31  ;;  %v5076_v48 = vpop.f32.mrb[23].mxu0 }
 0x4dc   :  { %v1949_v22 = vcombine.low %v1925_v35, %v1941_v41  ;;  %v1950_v50 = vcombine.high %v1925_v35, %v1941_v41  ;;  %v1965_v53 = vcombine.low %v1932_v21, %v1948_v44  ;;  %v1966_v18 = vcombine.high %v1932_v21, %v1948_v44 }
 0x4de   :  { %v1957_v2 = vrot.slane %v1949_v22, %v5559_v38  ;;  %v1964_v42 = vrot.slane %v1950_v50, %v5559_v38  ;;  %v1973_v56 = vrot.slane %v1965_v53, %v5559_v38  ;;  %v1980_v1 = vrot.slane %v1966_v18, %v5559_v38 }
 0x4e0   :  { %v2053_v37 = vcombine.low %v1957_v2, %v1964_v42  ;;  %v4853_v57 = vcombine.high %v1957_v2, %v1964_v42  ;;  %v2069_v58 = vcombine.low %v1973_v56, %v1980_v1  ;;  %v4854_v59 = vcombine.high %v1973_v56, %v1980_v1 }
 0x4e2   :  { %v2060_v60 = vrot.slane %v2053_v37, %v5549_v31  ;;  %v2068_v49 = vrot.slane %v4853_v57, %v5549_v31  ;;  %v2076_v61 = vrot.slane %v2069_v58, %v5549_v31  ;;  %v2084_v62 = vrot.slane %v4854_v59, %v5549_v31  ;;  %v5296_v58 = vld [vmem:[%s6463_s5] sm:$0xff]  }
 0x4e3   :  { %5102 = vmatpush3.bf16.msra.mxu1 %v5296_v58 }
 0x4e4   :  { %v2086_v63 = vcombine.high %v2060_v60, %v2068_v49  ;;  %v2102_v3 = vcombine.high %v2076_v61, %v2084_v62  ;;  %v2085_v7 = vcombine.low %v2060_v60, %v2068_v49  ;;  %v2101_v8 = vcombine.low %v2076_v61, %v2084_v62  ;;  %5103 = vmatprep.subr.bf16.mxu1 %v5391_v0 }
 0x4e6   :  { %v5880_v4 = vrot.slane %v2086_v63, %v5559_v38  ;;  %v5883_v28 = vrot.slane %v2102_v3, %v5559_v38  ;;  %v5886_v9 = vrot.slane %v2085_v7, %v5559_v38  ;;  %v5889_v10 = vrot.slane %v2101_v8, %v5559_v38  ;;  %v5297_v8 = vld [vmem:[%s6463_s5 + $0x8] sm:$0xff]   ;;  %s5403_s5 = smov 24  }
 0x4e7   :  { %5104 = vmatpush3.bf16.msra.mxu1 %v5297_v8 }
 0x4e8   :  { %v2119_v52 = vcombine.low %v5880_v4, %v5883_v28  ;;  %v2117_v55 = vcombine.low %v5886_v9, %v5889_v10  ;;  %v2118_v13 = vcombine.high %v5886_v9, %v5889_v10  ;;  %v2120_v20 = vcombine.high %v5880_v4, %v5883_v28  ;;  %5117 = vmatprep.subr.bf16.mxu1 %v5391_v0  ;;  %v5944_v9 = vld [vmem:[%s6461_s11] sm:$0xff] }
 0x4e9   :  { %v2229_v10 = vrot.slane %v5944_v9, %v5531_v19 }
 0x4ed   :  { %v1773_v23 = vpop.f32.mrb[28].mxu1  ;;  %v1819_v11 = vpop.f32.mrb[24].mxu0 }
 0x4ee   :  { %v5081_v12 = vpop.f32.mrb[29].mxu1  ;;  %v5087_v39 = vpop.f32.mrb[25].mxu0 }
 0x4ef   :  { %v1776_v25 = vpop.f32.mrb[30].mxu1  ;;  %v1822_v26 = vpop.f32.mrb[26].mxu0 }
 0x4f0   :  { %v5082_v32 = vpop.f32.mrb[31].mxu1  ;;  %v5088_v45 = vpop.f32.mrb[27].mxu0 }
 0x510   :  { %v1911_v36 = vpop.f32.mrb[28].mxu0 }
 0x511   :  { %v2001_v17 = vcombine.low %v1819_v11, %v1911_v36  ;;  %v2002_v51 = vcombine.high %v1819_v11, %v1911_v36  ;;  %v5099_v33 = vpop.f32.mrb[29].mxu0 }
 0x512   :  { %v1914_v43 = vpop.f32.mrb[30].mxu0 }
 0x513   :  { %v5100_v16 = vpop.f32.mrb[31].mxu0  ;;  %v2009_v30 = vrot.slane %v2001_v17, %v5549_v31  ;;  %v2016_v40 = vrot.slane %v2002_v51, %v5549_v31 }
 0x515   :  { %v1865_v27 = vpop.f32.mrb[32].mxu1 }
 0x516   :  { %v1985_v15 = vcombine.low %v1773_v23, %v1865_v27  ;;  %v1986_v54 = vcombine.high %v1773_v23, %v1865_v27  ;;  %v5093_v14 = vpop.f32.mrb[33].mxu1 }
 0x517   :  { %v1868_v29 = vpop.f32.mrb[34].mxu1 }
 0x518   :  { %v1993_v24 = vrot.slane %v1985_v15, %v5549_v31  ;;  %v2000_v47 = vrot.slane %v1986_v54, %v5549_v31  ;;  %v5094_v46 = vpop.f32.mrb[35].mxu1 }
 0x51a   :  { %v2017_v34 = vcombine.low %v1993_v24, %v2009_v30  ;;  %v2018_v35 = vcombine.high %v1993_v24, %v2009_v30  ;;  %v2033_v21 = vcombine.low %v2000_v47, %v2016_v40  ;;  %v2034_v41 = vcombine.high %v2000_v47, %v2016_v40 }
 0x51c   :  { %v2025_v44 = vrot.slane %v2017_v34, %v5559_v38  ;;  %v2032_v48 = vrot.slane %v2018_v35, %v5559_v38  ;;  %v2041_v22 = vrot.slane %v2033_v21, %v5559_v38  ;;  %v2048_v50 = vrot.slane %v2034_v41, %v5559_v38 }
 0x51e   :  { %v2121_v53 = vcombine.low %v2025_v44, %v2032_v48  ;;  %v4855_v18 = vcombine.high %v2025_v44, %v2032_v48  ;;  %v2137_v2 = vcombine.low %v2041_v22, %v2048_v50  ;;  %v4856_v42 = vcombine.high %v2041_v22, %v2048_v50  ;;  %v5298_v22 = vld [vmem:[%s6464_s7] sm:$0xff]   ;;  %v5299_v50 = vld [vmem:[%s6464_s7 + $0x8] sm:$0xff]  }
 0x520   :  { %v2128_v56 = vrot.slane %v2121_v53, %v5549_v31  ;;  %v2136_v1 = vrot.slane %v4855_v18, %v5549_v31  ;;  %v2144_v37 = vrot.slane %v2137_v2, %v5549_v31  ;;  %v2152_v57 = vrot.slane %v4856_v42, %v5549_v31  ;;  %v5300_v53 = vld [vmem:[%s6465_s1] sm:$0xff]  }
 0x522   :  { %v2154_v59 = vcombine.high %v2128_v56, %v2136_v1  ;;  %v2170_v60 = vcombine.high %v2144_v37, %v2152_v57  ;;  %v2153_v49 = vcombine.low %v2128_v56, %v2136_v1  ;;  %v2169_v61 = vcombine.low %v2144_v37, %v2152_v57 }
 0x524   :  { %v2168_v62 = vrot.slane %v2154_v59, %v5559_v38  ;;  %v2184_v63 = vrot.slane %v2170_v60, %v5559_v38  ;;  %v2161_v3 = vrot.slane %v2153_v49, %v5559_v38  ;;  %v2177_v7 = vrot.slane %v2169_v61, %v5559_v38  ;;  %v5301_v49 = vld [vmem:[%s6466_s6] sm:$0xff]   ;;  %v5302_v61 = vld [vmem:[%s6466_s6 + $0x8] sm:$0xff]  }
 0x525   :  { %5110 = vmatpush3.bf16.msra.mxu0 %v5301_v49 }
 0x526   :  { %v2187_v23 = vcombine.low %v2168_v62, %v2184_v63  ;;  %v2186_v11 = vcombine.high %v2161_v3, %v2177_v7  ;;  %v2185_v12 = vcombine.low %v2161_v3, %v2177_v7  ;;  %v2188_v39 = vcombine.high %v2168_v62, %v2184_v63  ;;  %5111 = vmatprep.subr.bf16.mxu0 %v5391_v0 }
 0x527   :  { %v2398_v62 = vsub.s32 5, %v5491_v5 }
 0x528   :  { %v5268_v25 = vpack.i.bf16 %v2187_v23, %v2119_v52  ;;  %v5263_v26 = vpack.i.bf16 %v2186_v11, %v2118_v13  ;;  %v5273_v32 = vpack.i.bf16 %v2188_v39, %v2120_v20 }
 0x529   :  { %5112 = vmatpush3.bf16.msra.mxu0 %v5302_v61  ;;  %v2399_v63 = vrot.slane %v5944_v9, %v2398_v62 }
 0x52a   :  { %5269 = vrot.lane.b32.xlu1 %v5268_v25, %s5401_s20  ;;  %5264 = vrot.lane.b32.xlu0 %v5263_v26, %s5402_s21 }
 0x52b   :  { %5125 = vmatprep.subr.bf16.mxu0 %v5391_v0 }
 0x52e   :  { %5274 = vrot.lane.b32.xlu0 %v5273_v32, %s5403_s5 }
 0x59c   :  { %v5270_v45 = vpop.permute.xlu1 %5269  ;;  %v5265_v36 = vpop.permute.xlu0 %5264 }
 0x59d   :  { %v5267_v17 = vunpack.i.h.bf16 %v5265_v36  ;;  %v5266_v51 = vunpack.i.l.bf16 %v5265_v36  ;;  %v5272_v33 = vunpack.i.h.bf16 %v5270_v45  ;;  %v5271_v43 = vunpack.i.l.bf16 %v5270_v45 }
 0x59f   :  { %v2213_v4 = vsel %vm1075_vm2, %v2117_v55, %v5266_v51  ;;  %v2214_v28 = vsel %vm1075_vm2, %v2185_v12, %v5267_v17  ;;  %v5389_v55 = vld [vmem:[%s6460_s0] sm:$0xff]   ;;  %v2317_v17 = vsub.s32 2, %v5491_v5 }
 0x5a0   :  { %v5275_v52 = vpop.permute.xlu0 %5274  ;;  %v2216_v16 = vsel %vm2215_vm5, %v2213_v4, %v5271_v43  ;;  %v2217_v27 = vsel %vm2215_vm5, %v2214_v28, %v5272_v33  ;;  %v44_v29 = vunpack.c.l.bf16 %v5389_v55  ;;  %v45_v47 = vunpack.c.h.bf16 %v5389_v55 }
 0x5a1   :  { %v5277_v13 = vunpack.i.h.bf16 %v5275_v52  ;;  %v5276_v20 = vunpack.i.l.bf16 %v5275_v52  ;;  %v2318_v51 = vrot.slane %v5944_v9, %v2317_v17  ;;  %v2323_v33 = vsub.s32 3, %v5491_v5 }
 0x5a3   :  { %v2219_v15 = vsel %vm2218_vm6, %v2216_v16, %v5276_v20  ;;  %v2220_v54 = vsel %vm2218_vm6, %v2217_v27, %v5277_v13  ;;  %v2324_v20 = vrot.slane %v5944_v9, %v2323_v33 }
 0x5a4   :  { %v2221_v14 = vpack.c.bf16 %v2220_v54, %v2219_v15 }
 0x5a6   :  { %5106 = vmatmul.mubr.msk.bf16.vlgmr.msra.gmra.mrb[36].mxu1 %vm122_vm1, %v2221_v14 }
 0x5a7   :  { %5121 = vmatprep.mubr.msk.bf16.mxu1 %vm5392_vm0, %v5391_v0  ;;  %5118 = vmatpush3.bf16.msra.mxu1 %v5298_v22 }
 0x5a8   :  { %5119 = vmatprep.subr.bf16.mxu1 %v5391_v0 }
 0x5ab   :  { %5120 = vmatpush3.bf16.msra.mxu1 %v5299_v50 }
 0x5ac   :  { %5131 = vmatprep.subr.bf16.mxu1 %v5391_v0 }
 0x5ae   :  { %5122 = vmatmul.mubr.msk.bf16.vlgmr.msra.gmra.mrb[40].mxu1 %vm122_vm1, %v5300_v53 }
 0x5af   :  { %5133 = vmatprep.mubr.msk.bf16.mxu1 %vm5392_vm0, %v5391_v0 }
 0x679   :  { %v2279_v30 = vpop.f32.mrb[36].mxu1 }
 0x67a   :  { %v2280_v40 = vadd.f32 %v2279_v30, %v2229_v10  ;;  %v5107_v24 = vpop.f32.mrb[37].mxu1 }
 0x67b   :  { %v2282_v46 = vpop.f32.mrb[38].mxu1 }
 0x67c   :  { %v2283_v34 = vadd.f32 %v2282_v46, %v2229_v10  ;;  %v5108_v35 = vpop.f32.mrb[39].mxu1  ;;  %v2286_v21 = vadd.f32 %v2280_v40, %v44_v29 }
 0x67e   :  { %v2288_v41 = vsel %vm122_vm1, %v2286_v21, 0.0  ;;  %v2287_v44 = vadd.f32 %v2283_v34, %v45_v47 }
 0x67f   :  { %2289 = vadd.xlane.f32.xlu1 %v2288_v41 }
 0x680   :  { %v2291_v48 = vsel %vm122_vm1, %v2287_v44, 0.0 }
 0x681   :  { %2292 = vadd.xlane.f32.xlu0 %v2291_v48  ;;  %v2454_v3 = vpop.f32.mrb[40].mxu1 }
 0x682   :  { %v5979_v7 = vadd.f32 %v2454_v3, %v2399_v63  ;;  %v5123_v8 = vpop.f32.mrb[41].mxu1 }
 0x683   :  { %v2457_v23 = vpop.f32.mrb[42].mxu1 }
 0x684   :  { %v5985_v11 = vadd.f32 %v2457_v23, %v2399_v63  ;;  %v5124_v12 = vpop.f32.mrb[43].mxu1 }
 0x70c   :  { %v2290_v18 = vpop.xlane.xlu1 %2289 }
 0x70d   :  { %v2295_v2 = vmul.f32 0.03125, %v2290_v18 }
 0x70e   :  { %v2293_v42 = vpop.xlane.xlu0 %2292 }
 0x70f   :  { %v2297_v56 = vsub.f32 %v2286_v21, %v2295_v2  ;;  %v2296_v1 = vmul.f32 0.03125, %v2293_v42 }
 0x711   :  { %v2298_v37 = vsub.f32 %v2287_v44, %v2296_v1  ;;  %v2299_v57 = vmul.f32 %v2297_v56, %v2297_v56 }
 0x713   :  { %v2301_v58 = vsel %vm122_vm1, %v2299_v57, 0.0  ;;  %v2300_v59 = vmul.f32 %v2298_v37, %v2298_v37 }
 0x714   :  { %2302 = vadd.xlane.f32.xlu0 %v2301_v58 }
 0x715   :  { %v2304_v60 = vsel %vm122_vm1, %v2300_v59, 0.0 }
 0x716   :  { %2305 = vadd.xlane.f32.xlu1 %v2304_v60 }
 0x727   :  { %2769 = vrot.lane.b32.xlu1 %v5979_v7, %s5395_s30 }
 0x72a   :  { %2763 = vrot.lane.b32.xlu0 %v5979_v7, %s5394_s29 }
 0x72b   :  { %2775 = vrot.lane.b32.xlu1 %v5979_v7, %s5393_s28 }
 0x7a1   :  { %v2303_v39 = vpop.xlane.xlu0 %2302 }
 0x7a2   :  { %v2307_v25 = vmul.f32 0.03125, %v2303_v39 }
 0x7a3   :  { %v2306_v26 = vpop.xlane.xlu1 %2305 }
 0x7a4   :  { %v2309_v32 = vadd.f32 1e-05, %v2307_v25  ;;  %v2308_v45 = vmul.f32 0.03125, %v2306_v26 }
 0x7a5   :  { %v2764_v10 = vpop.permute.xlu0 %2763 }
 0x7a6   :  { %5344 = vrsqrt.f32 %v2309_v32  ;;  %v2310_v36 = vadd.f32 1e-05, %v2308_v45 }
 0x7a7   :  { %v6006_v14 = vpop.permute.xlu1 %2769 }
 0x7a8   :  { %5346 = vrsqrt.f32 %v2310_v36  ;;  %v2781_v29 = vcombine.low %v5979_v7, %v6006_v14  ;;  %v2782_v30 = vcombine.high %v5979_v7, %v6006_v14 }
 0x7aa   :  { %v2789_v47 = vrot.slane %v2781_v29, %v5549_v31  ;;  %v2796_v46 = vrot.slane %v2782_v30, %v5549_v31 }
 0x7ab   :  { %v6008_v55 = vpop.permute.xlu1 %2775 }
 0x7ac   :  { %v2797_v40 = vcombine.low %v2764_v10, %v6008_v55  ;;  %v2798_v24 = vcombine.high %v2764_v10, %v6008_v55 }
 0x7ae   :  { %v2805_v34 = vrot.slane %v2797_v40, %v5549_v31  ;;  %v2812_v35 = vrot.slane %v2798_v24, %v5549_v31 }
 0x7b0   :  { %v5345_v43 = vpop.eup %5344  ;;  %v2813_v21 = vcombine.low %v2789_v47, %v2805_v34  ;;  %v2814_v41 = vcombine.high %v2789_v47, %v2805_v34  ;;  %v2829_v44 = vcombine.low %v2796_v46, %v2812_v35  ;;  %v2830_v48 = vcombine.high %v2796_v46, %v2812_v35 }
 0x7b1   :  { %v2313_v4 = vmul.f32 %v5345_v43, %v2297_v56  ;;  %v2334_v43 = vsub.s32 4, %v5491_v5 }
 0x7b2   :  { %v5347_v28 = vpop.eup %5346  ;;  %v2821_v22 = vrot.slane %v2813_v21, %v5559_v38  ;;  %v2828_v50 = vrot.slane %v2814_v41, %v5559_v38  ;;  %v2837_v53 = vrot.slane %v2829_v44, %v5559_v38  ;;  %v2844_v18 = vrot.slane %v2830_v48, %v5559_v38 }
 0x7b3   :  { %v2319_v52 = vmul.f32 %v2318_v51, %v2313_v4  ;;  %v2314_v13 = vmul.f32 %v5347_v28, %v2298_v37  ;;  %v2335_v4 = vrot.slane %v5944_v9, %v2334_v43 }
 0x7b4   :  { %v2917_v2 = vcombine.low %v2821_v22, %v2828_v50  ;;  %v4871_v42 = vcombine.high %v2821_v22, %v2828_v50  ;;  %v2933_v56 = vcombine.low %v2837_v53, %v2844_v18  ;;  %v4872_v1 = vcombine.high %v2837_v53, %v2844_v18 }
 0x7b5   :  { %v2320_v16 = vmul.f32 %v2318_v51, %v2314_v13  ;;  %v5997_v27 = vadd.f32 %v2324_v20, %v2319_v52 }
 0x7b6   :  { %v2924_v37 = vrot.slane %v2917_v2, %v5549_v31  ;;  %v2932_v57 = vrot.slane %v4871_v42, %v5549_v31  ;;  %v2940_v58 = vrot.slane %v2933_v56, %v5549_v31  ;;  %v2948_v59 = vrot.slane %v4872_v1, %v5549_v31 }
 0x7b7   :  { %v5999_v15 = vadd.f32 %v2324_v20, %v2320_v16 }
 0x7b8   :  { %v2949_v60 = vcombine.low %v2924_v37, %v2932_v57  ;;  %v2965_v49 = vcombine.low %v2940_v58, %v2948_v59  ;;  %v2950_v63 = vcombine.high %v2924_v37, %v2932_v57  ;;  %v2966_v3 = vcombine.high %v2940_v58, %v2948_v59 }
 0x7b9   :  { %v2327_v54 = vpack.c.bf16 %v5999_v15, %v5997_v27 }
 0x7ba   :  { %v2957_v61 = vrot.slane %v2949_v60, %v5559_v38  ;;  %v2973_v62 = vrot.slane %v2965_v49, %v5559_v38  ;;  %v2964_v12 = vrot.slane %v2950_v63, %v5559_v38  ;;  %v2980_v39 = vrot.slane %v2966_v3, %v5559_v38 }
 0x7bb   :  { %5114 = vmatmul.mubr.msk.bf16.vlgmr.msra.gmra.mrb[32].mxu0 %vm122_vm1, %v2327_v54 }
 0x7bc   :  { %5127 = vmatprep.mubr.msk.bf16.mxu0 %vm5392_vm0, %v5391_v0  ;;  %v2981_v8 = vcombine.low %v2957_v61, %v2973_v62  ;;  %v2982_v23 = vcombine.high %v2957_v61, %v2973_v62  ;;  %v6032_v32 = vcombine.low %v2964_v12, %v2980_v39  ;;  %v6034_v45 = vcombine.high %v2964_v12, %v2980_v39 }
 0x7be   :  { %v3053_v25 = vpack.c.bf16 %v2981_v8, %v2981_v8  ;;  %v3054_v26 = vpack.c.bf16 %v2982_v23, %v2982_v23  ;;  %v3055_v41 = vpack.c.bf16 %v6032_v32, %v6032_v32 }
 0x7c0   :  { %v3369_v36 = vsel %vm1075_vm2, %v3053_v25, 0  ;;  %v3415_v51 = vsel %vm1075_vm2, %v3054_v26, 0 }
 0x7c1   :  { %5126 = vmatpush3.bf16.xpose.msra.mxu0 %v3369_v36  ;;  %5132 = vmatpush3.bf16.xpose.msra.mxu1 %v3415_v51 }
 0x7c2   :  { %5137 = vmatprep.subr.bf16.mxu0 %v5391_v0  ;;  %5143 = vmatprep.subr.bf16.mxu1 %v5391_v0 }
 0x88e   :  { %v2385_v28 = vpop.f32.mrb[32].mxu0 }
 0x88f   :  { %v2386_v52 = vadd.f32 %v2385_v28, %v2335_v4  ;;  %v5115_v13 = vpop.f32.mrb[33].mxu0 }
 0x890   :  { %v2388_v20 = vpop.f32.mrb[34].mxu0 }
 0x891   :  { %2469 = vrot.lane.b32.xlu1 %v2386_v52, %s5395_s30  ;;  %2463 = vrot.lane.b32.xlu0 %v2386_v52, %s5394_s29  ;;  %v5116_v16 = vpop.f32.mrb[35].mxu0  ;;  %v6053_v9 = vadd.f32 %v2388_v20, %v2335_v4 }
 0x895   :  { %2765 = vrot.lane.b32.xlu1 %v5985_v11, %s5394_s29  ;;  %2475 = vrot.lane.b32.xlu0 %v2386_v52, %s5393_s28 }
 0x899   :  { %2777 = vrot.lane.b32.xlu1 %v5985_v11, %s5393_s28  ;;  %2771 = vrot.lane.b32.xlu0 %v5985_v11, %s5395_s30 }
 0x89d   :  { %2471 = vrot.lane.b32.xlu1 %v6053_v9, %s5395_s30  ;;  %2465 = vrot.lane.b32.xlu0 %v6053_v9, %s5394_s29 }
 0x8a1   :  { %3065 = vrot.lane.b32.xlu1 %v2764_v10, %s5396_s13  ;;  %2477 = vrot.lane.b32.xlu0 %v6053_v9, %s5393_s28 }
 0x8a5   :  { %3061 = vrot.lane.b32.xlu0 %v5979_v7, %s5396_s13  ;;  %3069 = vrot.lane.b32.xlu1 %v6006_v14, %s5396_s13 }
 0x8a9   :  { %3073 = vrot.lane.b32.xlu0 %v6008_v55, %s5396_s13 }
 0x903   :  { %v2464_v54 = vpop.permute.xlu0 %2463  ;;  %v2470_v29 = vpop.permute.xlu1 %2469 }
 0x904   :  { %v2481_v30 = vcombine.low %v2386_v52, %v2470_v29  ;;  %v2482_v40 = vcombine.high %v2386_v52, %v2470_v29  ;;  %v3056_v52 = vpack.c.bf16 %v6034_v45, %v6034_v45 }
 0x906   :  { %v2489_v34 = vrot.slane %v2481_v30, %v5549_v31  ;;  %v2496_v35 = vrot.slane %v2482_v40, %v5549_v31 }
 0x907   :  { %v2476_v24 = vpop.permute.xlu0 %2475  ;;  %v6068_v47 = vpop.permute.xlu1 %2765 }
 0x908   :  { %v2497_v10 = vcombine.low %v2464_v54, %v2476_v24  ;;  %v2498_v46 = vcombine.high %v2464_v54, %v2476_v24  ;;  %v3461_v54 = vsel %vm1075_vm2, %v3055_v41, 0 }
 0x90a   :  { %v2505_v7 = vrot.slane %v2497_v10, %v5549_v31  ;;  %v2512_v14 = vrot.slane %v2498_v46, %v5549_v31 }
 0x90b   :  { %v6074_v21 = vpop.permute.xlu0 %2771  ;;  %v6076_v55 = vpop.permute.xlu1 %2777 }
 0x90c   :  { %v2513_v44 = vcombine.low %v2489_v34, %v2505_v7  ;;  %v2514_v48 = vcombine.high %v2489_v34, %v2505_v7  ;;  %v2529_v22 = vcombine.low %v2496_v35, %v2512_v14  ;;  %v2530_v50 = vcombine.high %v2496_v35, %v2512_v14 }
 0x90d   :  { %v2849_v53 = vcombine.low %v5985_v11, %v6074_v21  ;;  %v2850_v18 = vcombine.high %v5985_v11, %v6074_v21  ;;  %v2865_v2 = vcombine.low %v6068_v47, %v6076_v55  ;;  %v2866_v42 = vcombine.high %v6068_v47, %v6076_v55 }
 0x90e   :  { %v2521_v56 = vrot.slane %v2513_v44, %v5559_v38  ;;  %v2528_v1 = vrot.slane %v2514_v48, %v5559_v38  ;;  %v2537_v37 = vrot.slane %v2529_v22, %v5559_v38  ;;  %v2544_v57 = vrot.slane %v2530_v50, %v5559_v38 }
 0x90f   :  { %v2857_v58 = vrot.slane %v2849_v53, %v5549_v31  ;;  %v2864_v59 = vrot.slane %v2850_v18, %v5549_v31  ;;  %v2873_v60 = vrot.slane %v2865_v2, %v5549_v31  ;;  %v2880_v49 = vrot.slane %v2866_v42, %v5549_v31  ;;  %v2466_v61 = vpop.permute.xlu0 %2465  ;;  %v2472_v62 = vpop.permute.xlu1 %2471 }
 0x910   :  { %v2617_v63 = vcombine.low %v2521_v56, %v2528_v1  ;;  %v4867_v3 = vcombine.high %v2521_v56, %v2528_v1  ;;  %v2633_v8 = vcombine.low %v2537_v37, %v2544_v57  ;;  %v4868_v23 = vcombine.high %v2537_v37, %v2544_v57 }
 0x911   :  { %v2881_v12 = vcombine.low %v2857_v58, %v2873_v60  ;;  %v2882_v39 = vcombine.high %v2857_v58, %v2873_v60  ;;  %v2897_v51 = vcombine.low %v2864_v59, %v2880_v49  ;;  %v2898_v24 = vcombine.high %v2864_v59, %v2880_v49 }
 0x912   :  { %v2624_v25 = vrot.slane %v2617_v63, %v5549_v31  ;;  %v2632_v26 = vrot.slane %v4867_v3, %v5549_v31  ;;  %v2640_v32 = vrot.slane %v2633_v8, %v5549_v31  ;;  %v2648_v36 = vrot.slane %v4868_v23, %v5549_v31 }
 0x913   :  { %v2478_v4 = vpop.permute.xlu0 %2477  ;;  %v3066_v28 = vpop.permute.xlu1 %3065  ;;  %v6104_v30 = vrot.slane %v2881_v12, %v5559_v38  ;;  %v6107_v40 = vrot.slane %v2882_v39, %v5559_v38  ;;  %v2549_v10 = vcombine.low %v6053_v9, %v2472_v62  ;;  %v2550_v46 = vcombine.high %v6053_v9, %v2472_v62 }
 0x914   :  { %v2649_v13 = vcombine.low %v2624_v25, %v2632_v26  ;;  %v2650_v20 = vcombine.high %v2624_v25, %v2632_v26  ;;  %v2665_v16 = vcombine.low %v2640_v32, %v2648_v36  ;;  %v2666_v29 = vcombine.high %v2640_v32, %v2648_v36 }
 0x915   :  { %v2565_v34 = vcombine.low %v2466_v61, %v2478_v4  ;;  %v2566_v35 = vcombine.high %v2466_v61, %v2478_v4  ;;  %v6112_v45 = vrot.slane %v2897_v51, %v5559_v38  ;;  %v2557_v22 = vrot.slane %v2549_v10, %v5549_v31 }
 0x916   :  { %v2657_v41 = vrot.slane %v2649_v13, %v5559_v38  ;;  %v2673_v44 = vrot.slane %v2665_v16, %v5559_v38  ;;  %v2664_v48 = vrot.slane %v2650_v20, %v5559_v38  ;;  %v2564_v50 = vrot.slane %v2550_v46, %v5549_v31 }
 0x917   :  { %v3062_v7 = vpop.permute.xlu0 %3061  ;;  %v3070_v14 = vpop.permute.xlu1 %3069  ;;  %v2573_v53 = vrot.slane %v2565_v34, %v5549_v31  ;;  %v2580_v9 = vrot.slane %v2566_v35, %v5549_v31  ;;  %v2680_v56 = vrot.slane %v2666_v29, %v5559_v38  ;;  %v2912_v59 = vrot.slane %v2898_v24, %v5559_v38 }
 0x918   :  { %v3085_v18 = vcombine.low %v3062_v7, %v3070_v14  ;;  %v2681_v2 = vcombine.low %v2657_v41, %v2673_v44  ;;  %v2682_v42 = vcombine.high %v2657_v41, %v2673_v44  ;;  %v3086_v60 = vcombine.high %v3062_v7, %v3070_v14 }
 0x919   :  { %v2581_v1 = vcombine.low %v2557_v22, %v2573_v53  ;;  %v2582_v37 = vcombine.high %v2557_v22, %v2573_v53  ;;  %v2597_v57 = vcombine.low %v2564_v50, %v2580_v9  ;;  %v2598_v58 = vcombine.high %v2564_v50, %v2580_v9 }
 0x91a   :  { %v2753_v61 = vpack.c.bf16 %v2681_v2, %v2681_v2  ;;  %v2754_v62 = vpack.c.bf16 %v2682_v42, %v2682_v42  ;;  %v2985_v12 = vcombine.low %v6104_v30, %v6107_v40  ;;  %v3507_v26 = vsel %vm1075_vm2, %v3056_v52, 0 }
 0x91b   :  { %v3074_v49 = vpop.permute.xlu0 %3073  ;;  %v2589_v63 = vrot.slane %v2581_v1, %v5559_v38  ;;  %v2596_v3 = vrot.slane %v2582_v37, %v5559_v38  ;;  %v2605_v8 = vrot.slane %v2597_v57, %v5559_v38  ;;  %v2612_v23 = vrot.slane %v2598_v58, %v5559_v38 }
 0x91c   :  { %v3101_v39 = vcombine.low %v3066_v28, %v3074_v49  ;;  %v3102_v25 = vcombine.high %v3066_v28, %v3074_v49  ;;  %5128 = vmatmul.mubr.msk.bf16.vlgmr.msra.gmra.mrb[36].mxu0 %vm1075_vm2, %v2753_v61  ;;  %5134 = vmatmul.mubr.msk.bf16.vlgmr.msra.gmra.mrb[44].mxu1 %vm1075_vm2, %v2754_v62  ;;  %v4873_v32 = vcombine.high %v6104_v30, %v6107_v40 }
 0x91d   :  { %v2685_v36 = vcombine.low %v2589_v63, %v2596_v3  ;;  %v3093_v51 = vrot.slane %v3085_v18, %v5549_v31  ;;  %5138 = vmatpush3.bf16.xpose.msra.mxu0 %v3461_v54  ;;  %v2683_v4 = vcombine.low %v2664_v48, %v2680_v56  ;;  %v3100_v13 = vrot.slane %v3086_v60, %v5549_v31 }
 0x91e   :  { %v3109_v20 = vrot.slane %v3101_v39, %v5549_v31  ;;  %v3116_v28 = vrot.slane %v3102_v25, %v5549_v31  ;;  %5144 = vmatpush3.bf16.xpose.msra.mxu1 %v3507_v26  ;;  %5139 = vmatprep.mubr.msk.bf16.mxu0 %vm5392_vm0, %v5391_v0  ;;  %v3001_v52 = vcombine.low %v6112_v45, %v2912_v59 }
 0x91f   :  { %v4869_v16 = vcombine.high %v2589_v63, %v2596_v3  ;;  %v2701_v29 = vcombine.low %v2605_v8, %v2612_v23  ;;  %v4870_v30 = vcombine.high %v2605_v8, %v2612_v23  ;;  %5145 = vmatprep.mubr.msk.bf16.mxu1 %vm5392_vm0, %v5391_v0  ;;  %5149 = vmatprep.subr.bf16.mxu0 %v5391_v0 }
 0x920   :  { %v3117_v54 = vcombine.low %v3093_v51, %v3109_v20  ;;  %v3118_v40 = vcombine.high %v3093_v51, %v3109_v20  ;;  %v3133_v24 = vcombine.low %v3100_v13, %v3116_v28  ;;  %v3134_v10 = vcombine.high %v3100_v13, %v3116_v28  ;;  %5155 = vmatprep.subr.bf16.mxu1 %v5391_v0 }
 0x921   :  { %v4874_v46 = vcombine.high %v6112_v45, %v2912_v59  ;;  %v6146_v34 = vrot.slane %v2685_v36, %v5549_v31  ;;  %v2755_v35 = vpack.c.bf16 %v2683_v4, %v2683_v4  ;;  %v2684_v22 = vcombine.high %v2664_v48, %v2680_v56 }
 0x922   :  { %v3125_v7 = vrot.slane %v3117_v54, %v5559_v38  ;;  %v3132_v14 = vrot.slane %v3118_v40, %v5559_v38  ;;  %v3141_v41 = vrot.slane %v3133_v24, %v5559_v38  ;;  %v3148_v44 = vrot.slane %v3134_v10, %v5559_v38 }
 0x923   :  { %v2992_v50 = vrot.slane %v2985_v12, %v5549_v31  ;;  %v3000_v53 = vrot.slane %v4873_v32, %v5549_v31  ;;  %v3008_v45 = vrot.slane %v3001_v52, %v5549_v31  ;;  %v2700_v9 = vrot.slane %v4869_v16, %v5549_v31 }
 0x924   :  { %v2708_v18 = vrot.slane %v2701_v29, %v5549_v31  ;;  %v2716_v2 = vrot.slane %v4870_v30, %v5549_v31  ;;  %v3221_v42 = vcombine.low %v3125_v7, %v3132_v14  ;;  %5140 = vmatmul.mubr.msk.bf16.vlgmr.msra.gmra.mrb[40].mxu0 %vm1075_vm2, %v2755_v35  ;;  %v4875_v1 = vcombine.high %v3125_v7, %v3132_v14 }
 0x925   :  { %v2756_v37 = vpack.c.bf16 %v2684_v22, %v2684_v22  ;;  %v3016_v57 = vrot.slane %v4874_v46, %v5549_v31  ;;  %v3017_v48 = vcombine.low %v2992_v50, %v3000_v53  ;;  %5151 = vmatprep.mubr.msk.bf16.mxu0 %vm5392_vm0, %v5391_v0  ;;  %v3237_v56 = vcombine.low %v3141_v41, %v3148_v44 }
 0x926   :  { %v4876_v58 = vcombine.high %v3141_v41, %v3148_v44  ;;  %v3018_v49 = vcombine.high %v2992_v50, %v3000_v53  ;;  %v2717_v61 = vcombine.low %v6146_v34, %v2700_v9  ;;  %v2733_v63 = vcombine.low %v2708_v18, %v2716_v2 }
 0x927   :  { %5146 = vmatmul.mubr.msk.bf16.vlgmr.msra.gmra.mrb[48].mxu1 %vm1075_vm2, %v2756_v37  ;;  %v3025_v59 = vrot.slane %v3017_v48, %v5559_v38  ;;  %v3033_v60 = vcombine.low %v3008_v45, %v3016_v57  ;;  %v3034_v62 = vcombine.high %v3008_v45, %v3016_v57  ;;  %v3228_v3 = vrot.slane %v3221_v42, %v5549_v31 }
 0x928   :  { %5157 = vmatprep.mubr.msk.bf16.mxu1 %vm5392_vm0, %v5391_v0  ;;  %v3236_v8 = vrot.slane %v4875_v1, %v5549_v31  ;;  %v3244_v12 = vrot.slane %v3237_v56, %v5549_v31  ;;  %v3252_v39 = vrot.slane %v4876_v58, %v5549_v31  ;;  %v3032_v25 = vrot.slane %v3018_v49, %v5559_v38 }
 0x929   :  { %v3041_v23 = vrot.slane %v3033_v60, %v5559_v38  ;;  %v3048_v26 = vrot.slane %v3034_v62, %v5559_v38  ;;  %v2725_v51 = vrot.slane %v2717_v61, %v5559_v38  ;;  %v2741_v20 = vrot.slane %v2733_v63, %v5559_v38 }
 0x92a   :  { %v3254_v28 = vcombine.high %v3228_v3, %v3236_v8  ;;  %v3253_v29 = vcombine.low %v3228_v3, %v3236_v8  ;;  %v3270_v30 = vcombine.high %v3244_v12, %v3252_v39  ;;  %v3269_v24 = vcombine.low %v3244_v12, %v3252_v39  ;;  %v4820_v39 = vld.sshfl [vmem:[%s6467_s3] sm:$0x11 pattern:$0x75316420] }
 0x92b   :  { %v3049_v32 = vcombine.low %v3025_v59, %v3041_v23  ;;  %v3050_v36 = vcombine.high %v3025_v59, %v3041_v23  ;;  %v3051_v52 = vcombine.low %v3032_v25, %v3048_v26  ;;  %v3052_v16 = vcombine.high %v3032_v25, %v3048_v26 }
 0x92c   :  { %v3268_v10 = vrot.slane %v3254_v28, %v5559_v38  ;;  %v2718_v46 = vcombine.high %v6146_v34, %v2700_v9  ;;  %v3284_v35 = vrot.slane %v3270_v30, %v5559_v38  ;;  %v2734_v7 = vcombine.high %v2708_v18, %v2716_v2 }
 0x92d   :  { %v3057_v4 = vpack.c.bf16 %v3049_v32, %v3049_v32  ;;  %v3058_v13 = vpack.c.bf16 %v3050_v36, %v3050_v36  ;;  %v2749_v14 = vcombine.low %v2725_v51, %v2741_v20  ;;  %v2750_v41 = vcombine.high %v2725_v51, %v2741_v20 }
 0x92e   :  { %v6184_v44 = vcombine.low %v3268_v10, %v3284_v35  ;;  %v6186_v22 = vcombine.high %v3268_v10, %v3284_v35  ;;  %v3059_v50 = vpack.c.bf16 %v3051_v52, %v3051_v52  ;;  %v3060_v53 = vpack.c.bf16 %v3052_v16, %v3052_v16 }
 0x92f   :  { %v3553_v54 = vsel %vm1075_vm2, %v3057_v4, 0  ;;  %v3599_v40 = vsel %vm1075_vm2, %v3058_v13, 0  ;;  %v3261_v45 = vrot.slane %v3253_v29, %v5559_v38  ;;  %v3277_v34 = vrot.slane %v3269_v24, %v5559_v38 }
 0x930   :  { %5150 = vmatpush3.bf16.xpose.msra.mxu0 %v3553_v54  ;;  %5156 = vmatpush3.bf16.xpose.msra.mxu1 %v3599_v40  ;;  %v2757_v9 = vpack.c.bf16 %v2749_v14, %v2749_v14  ;;  %v2758_v42 = vpack.c.bf16 %v2750_v41, %v2750_v41  ;;  %v2732_v18 = vrot.slane %v2718_v46, %v5559_v38  ;;  %v3645_v1 = vsel %vm1075_vm2, %v3059_v50, 0 }
 0x931   :  { %5161 = vmatprep.subr.bf16.mxu0 %v5391_v0  ;;  %5167 = vmatprep.subr.bf16.mxu1 %v5391_v0  ;;  %v2748_v2 = vrot.slane %v2734_v7, %v5559_v38  ;;  %v3691_v37 = vsel %vm1075_vm2, %v3060_v53, 0  ;;  %v3285_v57 = vcombine.low %v3261_v45, %v3277_v34  ;;  %v3286_v48 = vcombine.high %v3261_v45, %v3277_v34 }
 0x932   :  { %v5404_v3 = vmov 1966171168  }
 0x933   :  { %v2751_v56 = vcombine.low %v2732_v18, %v2748_v2  ;;  %v2752_v58 = vcombine.high %v2732_v18, %v2748_v2  ;;  %v3357_v59 = vpack.c.bf16 %v3285_v57, %v3285_v57  ;;  %v3358_v60 = vpack.c.bf16 %v3286_v48, %v3286_v48 }
 0x934   :  { %v84_v8 = vunpack.c.l.s4 %v5404_v3 }
 0x935   :  { %v2759_v49 = vpack.c.bf16 %v2751_v56, %v2751_v56  ;;  %v2760_v61 = vpack.c.bf16 %v2752_v58, %v2752_v58  ;;  %v3851_v62 = vsel %vm1551_vm4, %v3357_v59, 0  ;;  %v3897_v63 = vsel %vm1551_vm4, %v3358_v60, 0 }
 0x936   :  { %v85_v23 = vunpack.c.0.s8 %v84_v8 }
 0x937   :  { %5152 = vmatmul.mubr.msk.bf16.vlgmr.msra.gmra.mrb[44].mxu0 %vm1075_vm2, %v2757_v9  ;;  %5158 = vmatmul.mubr.msk.bf16.vlgmr.msra.gmra.mrb[52].mxu1 %vm1075_vm2, %v2758_v42  ;;  %v82_v9 = vcombine.high %v4820_v39, %v4820_v39 }
 0x938   :  { %5162 = vmatpush3.bf16.xpose.msra.mxu0 %v3645_v1  ;;  %5168 = vmatpush3.bf16.xpose.msra.mxu1 %v3691_v37  ;;  %v88_v12 = vsub.s32 %v85_v23, %v5491_v5 }
 0x939   :  { %5163 = vmatprep.mubr.msk.bf16.mxu0 %vm5392_vm0, %v5391_v0  ;;  %5169 = vmatprep.mubr.msk.bf16.mxu1 %vm5392_vm0, %v5391_v0 }
 0x93a   :  { %5173 = vmatprep.subr.bf16.mxu0 %v5391_v0  ;;  %5179 = vmatprep.subr.bf16.mxu1 %v5391_v0  ;;  %v89_v25 = vrot.slane %v4820_v39, %v88_v12  ;;  %v96_v42 = vrot.slane %v82_v9, %v88_v12 }
 0x93c   :  { %v3736_v26 = vrot.slane %v89_v25, %v5494_v6  ;;  %v3740_v18 = vrot.slane %v96_v42, %v5494_v6 }
 0x93f   :  { %5164 = vmatmul.mubr.msk.bf16.vlgmr.msra.gmra.mrb[48].mxu0 %vm1075_vm2, %v2759_v49  ;;  %5170 = vmatmul.mubr.msk.bf16.vlgmr.msra.gmra.mrb[56].mxu1 %vm1075_vm2, %v2760_v61 }
 0x940   :  { %5174 = vmatpush3.bf16.msra.mxu0 %v3851_v62  ;;  %5180 = vmatpush3.bf16.msra.mxu1 %v3897_v63 }
 0x941   :  { %5175 = vmatprep.mubr.msk.bf16.mxu0 %vm5392_vm0, %v5391_v0  ;;  %5181 = vmatprep.mubr.msk.bf16.mxu1 %vm5392_vm0, %v5391_v0 }
 0x942   :  { %5185 = vmatprep.subr.bf16.mxu0 %v5391_v0  ;;  %5191 = vmatprep.subr.bf16.mxu1 %v5391_v0 }
 0x9ef   :  { %v3405_v32 = vpop.f32.mrb[36].mxu0  ;;  %v3451_v36 = vpop.f32.mrb[44].mxu1 }
 0x9f0   :  { %v6217_v51 = vadd.f32 %v3736_v26, %v3405_v32  ;;  %v3744_v4 = vadd.f32 %v3736_v26, %v3451_v36  ;;  %v5129_v13 = vpop.f32.mrb[37].mxu0  ;;  %v5135_v20 = vpop.f32.mrb[45].mxu1 }
 0x9f1   :  { %v3408_v28 = vpop.f32.mrb[38].mxu0  ;;  %v3454_v52 = vpop.f32.mrb[46].mxu1 }
 0x9f2   :  { %v5130_v16 = vpop.f32.mrb[39].mxu0  ;;  %v5136_v29 = vpop.f32.mrb[47].mxu1  ;;  %v3754_v30 = vsel %vm1075_vm2, %v3744_v4, -inf  ;;  %v3751_v54 = vsel %vm1075_vm2, %v6217_v51, -inf }
 0x9f3   :  { %3755 = vmax.xlane.f32.xlu0 %v3754_v30  ;;  %3752 = vmax.xlane.f32.xlu1 %v3751_v54 }
 0x9f7   :  { %v3497_v40 = vpop.f32.mrb[40].mxu0 }
 0x9f8   :  { %v3745_v24 = vadd.f32 %v3736_v26, %v3497_v40  ;;  %v5141_v10 = vpop.f32.mrb[41].mxu0 }
 0x9f9   :  { %v3500_v46 = vpop.f32.mrb[42].mxu0 }
 0x9fa   :  { %v3543_v35 = vpop.f32.mrb[48].mxu1  ;;  %v5142_v7 = vpop.f32.mrb[43].mxu0  ;;  %v3757_v14 = vsel %vm1075_vm2, %v3745_v24, -inf }
 0x9fb   :  { %v3746_v41 = vadd.f32 %v3736_v26, %v3543_v35  ;;  %v5147_v50 = vpop.f32.mrb[49].mxu1  ;;  %3758 = vmax.xlane.f32.xlu0 %v3757_v14 }
 0x9fc   :  { %v3546_v53 = vpop.f32.mrb[50].mxu1 }
 0x9fd   :  { %v5148_v45 = vpop.f32.mrb[51].mxu1  ;;  %v3760_v34 = vsel %vm1075_vm2, %v3746_v41, -inf }
 0x9fe   :  { %3761 = vmax.xlane.f32.xlu1 %v3760_v34 }
 0xa0a   :  { %v3589_v2 = vpop.f32.mrb[44].mxu0  ;;  %v3635_v1 = vpop.f32.mrb[52].mxu1 }
 0xa0b   :  { %v3747_v37 = vadd.f32 %v3740_v18, %v3589_v2  ;;  %v3748_v57 = vadd.f32 %v3740_v18, %v3635_v1  ;;  %v5153_v48 = vpop.f32.mrb[45].mxu0  ;;  %v5159_v56 = vpop.f32.mrb[53].mxu1 }
 0xa0c   :  { %v3592_v58 = vpop.f32.mrb[46].mxu0  ;;  %v3638_v59 = vpop.f32.mrb[54].mxu1 }
 0xa0d   :  { %v5154_v60 = vpop.f32.mrb[47].mxu0  ;;  %v5160_v49 = vpop.f32.mrb[55].mxu1  ;;  %v3766_v61 = vsel %vm1075_vm2, %v3748_v57, -inf  ;;  %v3763_v62 = vsel %vm1075_vm2, %v3747_v37, -inf }
 0xa0e   :  { %3767 = vmax.xlane.f32.xlu1 %v3766_v61  ;;  %3764 = vmax.xlane.f32.xlu0 %v3763_v62 }
 0xa12   :  { %v3681_v63 = vpop.f32.mrb[48].mxu0  ;;  %v3727_v3 = vpop.f32.mrb[56].mxu1 }
 0xa13   :  { %v6227_v8 = vadd.f32 %v3740_v18, %v3681_v63  ;;  %v3750_v23 = vadd.f32 %v3740_v18, %v3727_v3  ;;  %v5165_v12 = vpop.f32.mrb[49].mxu0  ;;  %v5171_v39 = vpop.f32.mrb[57].mxu1 }
 0xa14   :  { %v3684_v25 = vpop.f32.mrb[50].mxu0  ;;  %v3730_v26 = vpop.f32.mrb[58].mxu1 }
 0xa15   :  { %v5166_v32 = vpop.f32.mrb[51].mxu0  ;;  %v5172_v36 = vpop.f32.mrb[59].mxu1  ;;  %v3772_v13 = vsel %vm1075_vm2, %v3750_v23, -inf  ;;  %v3769_v20 = vsel %vm1075_vm2, %v6227_v8, -inf }
 0xa16   :  { %3773 = vmax.xlane.f32.xlu1 %v3772_v13  ;;  %3770 = vmax.xlane.f32.xlu0 %v3769_v20  ;;  %v3360_v13 = vpack.c.bf16 %v6186_v22, %v6186_v22 }
 0xa27   :  { %3067 = vrot.lane.b32.xlu1 %v6068_v47, %s5396_s13 }
 0xa2c   :  { %3063 = vrot.lane.b32.xlu0 %v5985_v11, %s5396_s13 }
 0xa80   :  { %v3756_v28 = vpop.xlane.xlu0 %3755  ;;  %v3753_v52 = vpop.xlane.xlu1 %3752 }
 0xa81   :  { %v3776_v16 = vsub.f32 %v3744_v4, %v3756_v28  ;;  %v3775_v29 = vsub.f32 %v6217_v51, %v3753_v52  ;;  %v3359_v28 = vpack.c.bf16 %v6184_v44, %v6184_v44 }
 0xa83   :  { %v3785_v30 = vmul.f32 1.442695, %v3776_v16  ;;  %v3783_v54 = vmul.f32 1.442695, %v3775_v29  ;;  %v3989_v29 = vsel %vm1551_vm4, %v3360_v13, 0 }
 0xa85   :  { %5348 = vpow2.f32 %v3785_v30  ;;  %v3943_v30 = vsel %vm1551_vm4, %v3359_v28, 0 }
 0xa86   :  { %5350 = vpow2.f32 %v3783_v54 }
 0xa88   :  { %v3759_v40 = vpop.xlane.xlu0 %3758 }
 0xa89   :  { %v3777_v10 = vsub.f32 %v3745_v24, %v3759_v40 }
 0xa8b   :  { %v3787_v46 = vmul.f32 1.442695, %v3777_v10  ;;  %v3762_v35 = vpop.xlane.xlu1 %3761 }
 0xa8c   :  { %v3778_v7 = vsub.f32 %v3746_v41, %v3762_v35 }
 0xa8d   :  { %5352 = vpow2.f32 %v3787_v46 }
 0xa8e   :  { %v3789_v14 = vmul.f32 1.442695, %v3778_v7 }
 0xa8f   :  { %v5349_v47 = vpop.eup %5348 }
 0xa90   :  { %v5351_v50 = vpop.eup %5350  ;;  %5354 = vpow2.f32 %v3789_v14  ;;  %v3802_v11 = vsel %vm1075_vm2, %v5349_v47, 0.0 }
 0xa91   :  { %3803 = vadd.xlane.f32.xlu1 %v3802_v11  ;;  %v3799_v4 = vsel %vm1075_vm2, %v5351_v50, 0.0 }
 0xa92   :  { %3800 = vadd.xlane.f32.xlu0 %v3799_v4 }
 0xa97   :  { %v6239_v51 = vpop.eup %5352 }
 0xa98   :  { %v3805_v53 = vsel %vm1075_vm2, %v6239_v51, 0.0 }
 0xa99   :  { %3806 = vadd.xlane.f32.xlu1 %v3805_v53 }
 0xa9a   :  { %v6243_v24 = vpop.eup %5354 }
 0xa9b   :  { %v3765_v41 = vpop.xlane.xlu0 %3764  ;;  %v3768_v45 = vpop.xlane.xlu1 %3767  ;;  %v3808_v34 = vsel %vm1075_vm2, %v6243_v24, 0.0 }
 0xa9c   :  { %v3779_v9 = vsub.f32 %v3747_v37, %v3765_v41  ;;  %v3780_v42 = vsub.f32 %v3748_v57, %v3768_v45  ;;  %3809 = vadd.xlane.f32.xlu0 %v3808_v34 }
 0xa9e   :  { %v3791_v18 = vmul.f32 1.442695, %v3779_v9  ;;  %v3793_v2 = vmul.f32 1.442695, %v3780_v42 }
 0xaa0   :  { %5356 = vpow2.f32 %v3791_v18 }
 0xaa1   :  { %5358 = vpow2.f32 %v3793_v2 }
 0xaa3   :  { %v3774_v37 = vpop.xlane.xlu1 %3773  ;;  %v3771_v57 = vpop.xlane.xlu0 %3770 }
 0xaa4   :  { %v3782_v59 = vsub.f32 %v3750_v23, %v3774_v37  ;;  %v3781_v60 = vsub.f32 %v6227_v8, %v3771_v57 }
 0xaa6   :  { %v3797_v49 = vmul.f32 1.442695, %v3782_v59  ;;  %v3795_v61 = vmul.f32 1.442695, %v3781_v60 }
 0xaa7   :  { %v3064_v23 = vpop.permute.xlu0 %3063 }
 0xaa8   :  { %5360 = vpow2.f32 %v3797_v49 }
 0xaa9   :  { %5362 = vpow2.f32 %v3795_v61 }
 0xaaa   :  { %v6247_v1 = vpop.eup %5356 }
 0xaab   :  { %v6249_v48 = vpop.eup %5358  ;;  %v3811_v56 = vsel %vm1075_vm2, %v6247_v1, 0.0 }
 0xaac   :  { %3812 = vadd.xlane.f32.xlu0 %v3811_v56  ;;  %v3814_v58 = vsel %vm1075_vm2, %v6249_v48, 0.0 }
 0xaad   :  { %3815 = vadd.xlane.f32.xlu1 %v3814_v58 }
 0xab2   :  { %v6260_v62 = vpop.eup %5360 }
 0xab3   :  { %v6262_v63 = vpop.eup %5362  ;;  %v3820_v3 = vsel %vm1075_vm2, %v6260_v62, 0.0 }
 0xabe   :  { %3071 = vrot.lane.b32.xlu1 %v6074_v21, %s5396_s13  ;;  %v3817_v21 = vsel %vm1075_vm2, %v6262_v63, 0.0 }
 0xac2   :  { %3075 = vrot.lane.b32.xlu0 %v6076_v55, %s5396_s13  ;;  %v3068_v55 = vpop.permute.xlu1 %3067 }
 0xae1   :  { %3821 = vadd.xlane.f32.xlu0 %v3820_v3 }
 0xae2   :  { %3818 = vadd.xlane.f32.xlu1 %v3817_v21 }
 0xb1e   :  { %v3804_v12 = vpop.xlane.xlu1 %3803 }
 0xb1f   :  { %v3801_v8 = vpop.xlane.xlu0 %3800  ;;  %5364 = vrcp.f32 %v3804_v12 }
 0xb20   :  { %5366 = vrcp.f32 %v3801_v8 }
 0xb26   :  { %v3807_v39 = vpop.xlane.xlu1 %3806 }
 0xb27   :  { %5368 = vrcp.f32 %v3807_v39 }
 0xb29   :  { %v5365_v25 = vpop.eup %5364  ;;  %v3810_v26 = vpop.xlane.xlu0 %3809 }
 0xb2a   :  { %v5367_v32 = vpop.eup %5366  ;;  %v3832_v36 = vmul.f32 %v5365_v25, %v5349_v47  ;;  %5370 = vrcp.f32 %v3810_v26 }
 0xb2b   :  { %v3831_v20 = vmul.f32 %v5367_v32, %v5351_v50 }
 0xb2c   :  { %v3840_v52 = vpack.c.bf16 %v3832_v36, %v3832_v36 }
 0xb2d   :  { %v3839_v16 = vpack.c.bf16 %v3831_v20, %v3831_v20 }
 0xb2e   :  { %5182 = vmatmul.mubr.msk.bf16.vlgmr.msra.gmra.mrb[60].mxu1 %vm1075_vm2, %v3840_v52 }
 0xb2f   :  { %5176 = vmatmul.mubr.msk.bf16.vlgmr.msra.gmra.mrb[52].mxu0 %vm1075_vm2, %v3839_v16  ;;  %5192 = vmatpush3.bf16.msra.mxu1 %v3989_v29 }
 0xb30   :  { %5186 = vmatpush3.bf16.msra.mxu0 %v3943_v30  ;;  %5187 = vmatprep.mubr.msk.bf16.mxu0 %vm5392_vm0, %v5391_v0 }
 0xb31   :  { %v5369_v22 = vpop.eup %5368  ;;  %5193 = vmatprep.mubr.msk.bf16.mxu1 %vm5392_vm0, %v5391_v0  ;;  %5197 = vmatprep.subr.bf16.mxu0 %v5391_v0 }
 0xb32   :  { %v3833_v44 = vmul.f32 %v5369_v22, %v6239_v51  ;;  %5203 = vmatprep.subr.bf16.mxu1 %v5391_v0 }
 0xb34   :  { %v5371_v54 = vpop.eup %5370  ;;  %v3841_v40 = vpack.c.bf16 %v3833_v44, %v3833_v44 }
 0xb35   :  { %v3834_v10 = vmul.f32 %v5371_v54, %v6243_v24 }
 0xb37   :  { %5188 = vmatmul.mubr.msk.bf16.vlgmr.msra.gmra.mrb[56].mxu0 %vm1075_vm2, %v3841_v40  ;;  %v3842_v46 = vpack.c.bf16 %v3834_v10, %v3834_v10 }
 0xb38   :  { %5199 = vmatprep.mubr.msk.bf16.mxu0 %vm5392_vm0, %v5391_v0 }
 0xb39   :  { %v3813_v35 = vpop.xlane.xlu0 %3812  ;;  %5194 = vmatmul.mubr.msk.bf16.vlgmr.msra.gmra.mrb[64].mxu1 %vm1075_vm2, %v3842_v46 }
 0xb3a   :  { %v3816_v7 = vpop.xlane.xlu1 %3815  ;;  %5205 = vmatprep.mubr.msk.bf16.mxu1 %vm5392_vm0, %v5391_v0  ;;  %5372 = vrcp.f32 %v3813_v35 }
 0xb3b   :  { %5374 = vrcp.f32 %v3816_v7 }
 0xb3d   :  { %v3076_v14 = vpop.permute.xlu0 %3075 }
 0xb3e   :  { %v3169_v47 = vcombine.low %v3068_v55, %v3076_v14  ;;  %v3170_v50 = vcombine.high %v3068_v55, %v3076_v14  ;;  %v3072_v11 = vpop.permute.xlu1 %3071 }
 0xb3f   :  { %v3153_v4 = vcombine.low %v3064_v23, %v3072_v11  ;;  %v3154_v51 = vcombine.high %v3064_v23, %v3072_v11 }
 0xb40   :  { %v3177_v53 = vrot.slane %v3169_v47, %v5549_v31  ;;  %v3184_v24 = vrot.slane %v3170_v50, %v5549_v31 }
 0xb41   :  { %v3161_v41 = vrot.slane %v3153_v4, %v5549_v31  ;;  %v3168_v45 = vrot.slane %v3154_v51, %v5549_v31 }
 0xb43   :  { %v3185_v34 = vcombine.low %v3161_v41, %v3177_v53  ;;  %v3186_v9 = vcombine.high %v3161_v41, %v3177_v53  ;;  %v3201_v42 = vcombine.low %v3168_v45, %v3184_v24  ;;  %v3202_v18 = vcombine.high %v3168_v45, %v3184_v24 }
 0xb44   :  { %v5373_v32 = vpop.eup %5372 }
 0xb45   :  { %v3193_v2 = vrot.slane %v3185_v34, %v5559_v38  ;;  %v3200_v56 = vrot.slane %v3186_v9, %v5559_v38  ;;  %v3209_v58 = vrot.slane %v3201_v42, %v5559_v38  ;;  %v3216_v37 = vrot.slane %v3202_v18, %v5559_v38  ;;  %v5375_v20 = vpop.eup %5374 }
 0xb46   :  { %v3835_v30 = vmul.f32 %v5373_v32, %v6247_v1  ;;  %v3836_v22 = vmul.f32 %v5375_v20, %v6249_v48 }
 0xb47   :  { %v3289_v57 = vcombine.low %v3193_v2, %v3200_v56  ;;  %v4877_v59 = vcombine.high %v3193_v2, %v3200_v56  ;;  %v3305_v60 = vcombine.low %v3209_v58, %v3216_v37  ;;  %v4878_v49 = vcombine.high %v3209_v58, %v3216_v37 }
 0xb48   :  { %v3843_v7 = vpack.c.bf16 %v3835_v30, %v3835_v30  ;;  %v3844_v14 = vpack.c.bf16 %v3836_v22, %v3836_v22 }
 0xb49   :  { %v3296_v61 = vrot.slane %v3289_v57, %v5549_v31  ;;  %v3304_v3 = vrot.slane %v4877_v59, %v5549_v31  ;;  %v3312_v21 = vrot.slane %v3305_v60, %v5549_v31  ;;  %v3320_v55 = vrot.slane %v4878_v49, %v5549_v31 }
 0xb4b   :  { %v3321_v23 = vcombine.low %v3296_v61, %v3304_v3  ;;  %v3322_v12 = vcombine.high %v3296_v61, %v3304_v3  ;;  %v3337_v8 = vcombine.low %v3312_v21, %v3320_v55  ;;  %v3338_v39 = vcombine.high %v3312_v21, %v3320_v55 }
 0xb4d   :  { %v3329_v25 = vrot.slane %v3321_v23, %v5559_v38  ;;  %v3336_v26 = vrot.slane %v3322_v12, %v5559_v38  ;;  %v3345_v36 = vrot.slane %v3337_v8, %v5559_v38  ;;  %v3352_v13 = vrot.slane %v3338_v39, %v5559_v38 }
 0xb4f   :  { %v3353_v28 = vcombine.low %v3329_v25, %v3345_v36  ;;  %v3354_v52 = vcombine.high %v3329_v25, %v3345_v36  ;;  %v3355_v16 = vcombine.low %v3336_v26, %v3352_v13  ;;  %v3356_v29 = vcombine.high %v3336_v26, %v3352_v13 }
 0xb51   :  { %v3361_v44 = vpack.c.bf16 %v3353_v28, %v3353_v28  ;;  %v3362_v54 = vpack.c.bf16 %v3354_v52, %v3354_v52  ;;  %v3363_v46 = vpack.c.bf16 %v3355_v16, %v3355_v16  ;;  %v3364_v35 = vpack.c.bf16 %v3356_v29, %v3356_v29 }
 0xb53   :  { %v4035_v40 = vsel %vm1551_vm4, %v3361_v44, 0  ;;  %v4081_v10 = vsel %vm1551_vm4, %v3362_v54, 0  ;;  %v4127_v1 = vsel %vm1551_vm4, %v3363_v46, 0  ;;  %v4173_v48 = vsel %vm1551_vm4, %v3364_v35, 0 }
 0xb54   :  { %5198 = vmatpush3.bf16.msra.mxu0 %v4035_v40  ;;  %5204 = vmatpush3.bf16.msra.mxu1 %v4081_v10 }
 0xb55   :  { %5209 = vmatprep.subr.bf16.mxu0 %v5391_v0  ;;  %5215 = vmatprep.subr.bf16.mxu1 %v5391_v0 }
 0xb57   :  { %5200 = vmatmul.mubr.msk.bf16.vlgmr.msra.gmra.mrb[60].mxu0 %vm1075_vm2, %v3843_v7  ;;  %5206 = vmatmul.mubr.msk.bf16.vlgmr.msra.gmra.mrb[68].mxu1 %vm1075_vm2, %v3844_v14 }
 0xb58   :  { %5210 = vmatpush3.bf16.msra.mxu0 %v4127_v1  ;;  %5216 = vmatpush3.bf16.msra.mxu1 %v4173_v48 }
 0xb59   :  { %5211 = vmatprep.mubr.msk.bf16.mxu0 %vm5392_vm0, %v5391_v0  ;;  %5217 = vmatprep.mubr.msk.bf16.mxu1 %vm5392_vm0, %v5391_v0 }
 0xb5a   :  { %5221 = vmatprep.subr.bf16.mxu0 %v5391_v0  ;;  %5229 = vmatprep.subr.bf16.mxu1 %v5391_v0 }
 0xb6e   :  { %v3822_v47 = vpop.xlane.xlu0 %3821 }
 0xb6f   :  { %5376 = vrcp.f32 %v3822_v47  ;;  %v3819_v50 = vpop.xlane.xlu1 %3818 }
 0xb70   :  { %5378 = vrcp.f32 %v3819_v50 }
 0xb79   :  { %v5377_v11 = vpop.eup %5376 }
 0xb7a   :  { %v5379_v4 = vpop.eup %5378  ;;  %v3838_v51 = vmul.f32 %v5377_v11, %v6260_v62 }
 0xb7b   :  { %v3837_v53 = vmul.f32 %v5379_v4, %v6262_v63 }
 0xb7c   :  { %v3846_v24 = vpack.c.bf16 %v3838_v51, %v3838_v51 }
 0xb7d   :  { %v3845_v41 = vpack.c.bf16 %v3837_v53, %v3837_v53 }
 0xb7e   :  { %5218 = vmatmul.mubr.msk.bf16.vlgmr.msra.gmra.mrb[72].mxu1 %vm1075_vm2, %v3846_v24 }
 0xb7f   :  { %5212 = vmatmul.mubr.msk.bf16.vlgmr.msra.gmra.mrb[64].mxu0 %vm1075_vm2, %v3845_v41  ;;  %5233 = vmatprep.mubr.msk.bf16.mxu1 %vm5392_vm0, %v5391_v0 }
 0xb80   :  { %5225 = vmatprep.mubr.msk.bf16.mxu0 %vm5392_vm0, %v5391_v0 }
 0xc01   :  { %v3933_v45 = vpop.f32.mrb[60].mxu1 }
 0xc02   :  { %v3887_v34 = vpop.f32.mrb[52].mxu0  ;;  %v5183_v9 = vpop.f32.mrb[61].mxu1 }
 0xc03   :  { %v5177_v42 = vpop.f32.mrb[53].mxu0  ;;  %v3936_v18 = vpop.f32.mrb[62].mxu1 }
 0xc04   :  { %v3890_v62 = vpop.f32.mrb[54].mxu0  ;;  %v5184_v2 = vpop.f32.mrb[63].mxu1 }
 0xc05   :  { %v5178_v63 = vpop.f32.mrb[55].mxu0 }
 0xc0a   :  { %v3979_v56 = vpop.f32.mrb[56].mxu0 }
 0xc0b   :  { %v4215_v58 = vcombine.low %v3887_v34, %v3979_v56  ;;  %v4216_v37 = vcombine.high %v3887_v34, %v3979_v56  ;;  %v5189_v57 = vpop.f32.mrb[57].mxu0 }
 0xc0c   :  { %v4025_v59 = vpop.f32.mrb[64].mxu1  ;;  %v3982_v60 = vpop.f32.mrb[58].mxu0 }
 0xc0d   :  { %v4223_v49 = vrot.slane %v4215_v58, %v5549_v31  ;;  %v4230_v61 = vrot.slane %v4216_v37, %v5549_v31  ;;  %v4231_v3 = vcombine.low %v3933_v45, %v4025_v59  ;;  %v4232_v21 = vcombine.high %v3933_v45, %v4025_v59  ;;  %v5195_v55 = vpop.f32.mrb[65].mxu1  ;;  %v5190_v23 = vpop.f32.mrb[59].mxu0 }
 0xc0e   :  { %v4028_v12 = vpop.f32.mrb[66].mxu1 }
 0xc0f   :  { %v4239_v8 = vrot.slane %v4231_v3, %v5549_v31  ;;  %v4246_v39 = vrot.slane %v4232_v21, %v5549_v31  ;;  %v5196_v25 = vpop.f32.mrb[67].mxu1 }
 0xc11   :  { %v4247_v26 = vcombine.low %v4223_v49, %v4239_v8  ;;  %v4248_v32 = vcombine.high %v4223_v49, %v4239_v8  ;;  %v4263_v36 = vcombine.low %v4230_v61, %v4246_v39  ;;  %v4264_v13 = vcombine.high %v4230_v61, %v4246_v39 }
 0xc13   :  { %v4255_v20 = vrot.slane %v4247_v26, %v5559_v38  ;;  %v4262_v28 = vrot.slane %v4248_v32, %v5559_v38  ;;  %v4271_v52 = vrot.slane %v4263_v36, %v5559_v38  ;;  %v4278_v16 = vrot.slane %v4264_v13, %v5559_v38 }
 0xc15   :  { %v4351_v29 = vcombine.low %v4255_v20, %v4262_v28  ;;  %v4895_v30 = vcombine.high %v4255_v20, %v4262_v28  ;;  %v4367_v22 = vcombine.low %v4271_v52, %v4278_v16  ;;  %v4896_v44 = vcombine.high %v4271_v52, %v4278_v16 }
 0xc17   :  { %v4358_v54 = vrot.slane %v4351_v29, %v5549_v31  ;;  %v4366_v40 = vrot.slane %v4895_v30, %v5549_v31  ;;  %v4374_v10 = vrot.slane %v4367_v22, %v5549_v31  ;;  %v4382_v46 = vrot.slane %v4896_v44, %v5549_v31 }
 0xc19   :  { %v4384_v35 = vcombine.high %v4358_v54, %v4366_v40  ;;  %v4400_v7 = vcombine.high %v4374_v10, %v4382_v46  ;;  %v4383_v14 = vcombine.low %v4358_v54, %v4366_v40  ;;  %v4399_v1 = vcombine.low %v4374_v10, %v4382_v46  ;;  %v5303_v46 = vld [vmem:[%s6468_s8] sm:$0xff]  }
 0xc1a   :  { %5222 = vmatpush3.bf16.msra.mxu0 %v5303_v46  ;;  %v5306_v46 = vld [vmem:[%s6469_s9 + $0x8] sm:$0xff]  }
 0xc1b   :  { %v6343_v48 = vrot.slane %v4384_v35, %v5559_v38  ;;  %v6346_v47 = vrot.slane %v4400_v7, %v5559_v38  ;;  %v6349_v50 = vrot.slane %v4383_v14, %v5559_v38  ;;  %v6352_v11 = vrot.slane %v4399_v1, %v5559_v38  ;;  %5223 = vmatprep.subr.bf16.mxu0 %v5391_v0 }
 0xc1d   :  { %v4417_v4 = vcombine.low %v6343_v48, %v6346_v47  ;;  %v4415_v51 = vcombine.low %v6349_v50, %v6352_v11  ;;  %v4416_v53 = vcombine.high %v6349_v50, %v6352_v11  ;;  %v4418_v24 = vcombine.high %v6343_v48, %v6346_v47  ;;  %v5390_v11 = vld [vmem:[%s6461_s11] sm:$0xff] }
 0xc1e   :  { %v4524_v50 = vsub.s32 6, %v5491_v5 }
 0xc2a   :  { %v4071_v41 = vpop.f32.mrb[60].mxu0  ;;  %v4117_v45 = vpop.f32.mrb[68].mxu1 }
 0xc2b   :  { %v5201_v34 = vpop.f32.mrb[61].mxu0  ;;  %v5207_v9 = vpop.f32.mrb[69].mxu1 }
 0xc2c   :  { %v4074_v42 = vpop.f32.mrb[62].mxu0  ;;  %v4120_v18 = vpop.f32.mrb[70].mxu1 }
 0xc2d   :  { %v5202_v62 = vpop.f32.mrb[63].mxu0  ;;  %v5208_v2 = vpop.f32.mrb[71].mxu1 }
 0xc51   :  { %v4209_v63 = vpop.f32.mrb[72].mxu1 }
 0xc52   :  { %v4163_v56 = vpop.f32.mrb[64].mxu0  ;;  %v4299_v58 = vcombine.low %v4117_v45, %v4209_v63  ;;  %v4300_v37 = vcombine.high %v4117_v45, %v4209_v63  ;;  %v5219_v57 = vpop.f32.mrb[73].mxu1 }
 0xc53   :  { %v4283_v59 = vcombine.low %v4071_v41, %v4163_v56  ;;  %v4284_v60 = vcombine.high %v4071_v41, %v4163_v56  ;;  %v5213_v49 = vpop.f32.mrb[65].mxu0  ;;  %v4212_v61 = vpop.f32.mrb[74].mxu1 }
 0xc54   :  { %v4307_v3 = vrot.slane %v4299_v58, %v5549_v31  ;;  %v4314_v21 = vrot.slane %v4300_v37, %v5549_v31  ;;  %v4166_v55 = vpop.f32.mrb[66].mxu0  ;;  %v5220_v23 = vpop.f32.mrb[75].mxu1 }
 0xc55   :  { %v4291_v12 = vrot.slane %v4283_v59, %v5549_v31  ;;  %v4298_v8 = vrot.slane %v4284_v60, %v5549_v31  ;;  %v5214_v39 = vpop.f32.mrb[67].mxu0 }
 0xc57   :  { %v4315_v25 = vcombine.low %v4291_v12, %v4307_v3  ;;  %v4316_v26 = vcombine.high %v4291_v12, %v4307_v3  ;;  %v4331_v32 = vcombine.low %v4298_v8, %v4314_v21  ;;  %v4332_v36 = vcombine.high %v4298_v8, %v4314_v21 }
 0xc59   :  { %v4323_v13 = vrot.slane %v4315_v25, %v5559_v38  ;;  %v4330_v20 = vrot.slane %v4316_v26, %v5559_v38  ;;  %v4339_v28 = vrot.slane %v4331_v32, %v5559_v38  ;;  %v4346_v52 = vrot.slane %v4332_v36, %v5559_v38 }
 0xc5b   :  { %v4419_v16 = vcombine.low %v4323_v13, %v4330_v20  ;;  %v4897_v29 = vcombine.high %v4323_v13, %v4330_v20  ;;  %v4435_v30 = vcombine.low %v4339_v28, %v4346_v52  ;;  %v4898_v22 = vcombine.high %v4339_v28, %v4346_v52 }
 0xc5d   :  { %v4426_v44 = vrot.slane %v4419_v16, %v5549_v31  ;;  %v4434_v54 = vrot.slane %v4897_v29, %v5549_v31  ;;  %v4442_v40 = vrot.slane %v4435_v30, %v5549_v31  ;;  %v4450_v10 = vrot.slane %v4898_v22, %v5549_v31  ;;  %v5304_v31 = vld [vmem:[%s6468_s8 + $0x8] sm:$0xff]  }
 0xc5e   :  { %5224 = vmatpush3.bf16.msra.mxu0 %v5304_v31  ;;  %v4612_v31 = vsub.s32 7, %v5491_v5 }
 0xc5f   :  { %v4452_v35 = vcombine.high %v4426_v44, %v4434_v54  ;;  %v4468_v7 = vcombine.high %v4442_v40, %v4450_v10  ;;  %v4451_v14 = vcombine.low %v4426_v44, %v4434_v54  ;;  %v4467_v1 = vcombine.low %v4442_v40, %v4450_v10  ;;  %5237 = vmatprep.subr.bf16.mxu0 %v5391_v0 }
 0xc61   :  { %v4466_v41 = vrot.slane %v4452_v35, %v5559_v38  ;;  %v4482_v45 = vrot.slane %v4468_v7, %v5559_v38  ;;  %v4459_v34 = vrot.slane %v4451_v14, %v5559_v38  ;;  %v4475_v9 = vrot.slane %v4467_v1, %v5559_v38  ;;  %v5307_v35 = vld [vmem:[%s6470_s10] sm:$0xff]   ;;  %v5308_v7 = vld [vmem:[%s6470_s10 + $0x8] sm:$0xff]  }
 0xc63   :  { %v4485_v42 = vcombine.low %v4466_v41, %v4482_v45  ;;  %v4484_v18 = vcombine.high %v4459_v34, %v4475_v9  ;;  %v4483_v62 = vcombine.low %v4459_v34, %v4475_v9  ;;  %v4486_v2 = vcombine.high %v4466_v41, %v4482_v45 }
 0xc65   :  { %v5283_v63 = vpack.i.bf16 %v4485_v42, %v4417_v4  ;;  %v5278_v56 = vpack.i.bf16 %v4484_v18, %v4416_v53  ;;  %v5288_v58 = vpack.i.bf16 %v4486_v2, %v4418_v24  ;;  %v4613_v18 = vrot.slane %v5390_v11, %v4612_v31  ;;  %v49_v2 = vld [vmem:[%s6461_s11 + $0x8] sm:$0xff] }
 0xc67   :  { %5284 = vrot.lane.b32.xlu1 %v5283_v63, %s5401_s20  ;;  %5279 = vrot.lane.b32.xlu0 %v5278_v56, %s5402_s21 }
 0xc6b   :  { %5289 = vrot.lane.b32.xlu1 %v5288_v58, %s5403_s5 }
 0xcd9   :  { %v5285_v38 = vpop.permute.xlu1 %5284  ;;  %v5280_v37 = vpop.permute.xlu0 %5279 }
 0xcda   :  { %v5282_v57 = vunpack.i.h.bf16 %v5280_v37  ;;  %v5281_v59 = vunpack.i.l.bf16 %v5280_v37  ;;  %v5287_v60 = vunpack.i.h.bf16 %v5285_v38  ;;  %v5286_v49 = vunpack.i.l.bf16 %v5285_v38 }
 0xcdb   :  { %v4619_v38 = vrot.slane %v49_v2, %v5494_v6  ;;  %v4630_v6 = vrot.slane %v49_v2, %v5531_v19 }
 0xcdc   :  { %v4511_v48 = vsel %vm1075_vm2, %v4415_v51, %v5281_v59  ;;  %v4512_v47 = vsel %vm1075_vm2, %v4483_v62, %v5282_v57  ;;  %v4525_v51 = vrot.slane %v5390_v11, %v4524_v50 }
 0xcdd   :  { %v5290_v4 = vpop.permute.xlu1 %5289  ;;  %v4513_v61 = vsel %vm2215_vm5, %v4511_v48, %v5286_v49  ;;  %v4514_v3 = vsel %vm2215_vm5, %v4512_v47, %v5287_v60  ;;  %v5309_v49 = vld [vmem:[%s6470_s10 + $0x10] sm:$0xff]   ;;  %v5310_v48 = vld [vmem:[%s6470_s10 + $0x18] sm:$0xff]  }
 0xcde   :  { %v5292_v53 = vunpack.i.h.bf16 %v5290_v4  ;;  %v5291_v24 = vunpack.i.l.bf16 %v5290_v4 }
 0xce0   :  { %v4515_v21 = vsel %vm2218_vm6, %v4513_v61, %v5291_v24  ;;  %v4516_v55 = vsel %vm2218_vm6, %v4514_v3, %v5292_v53 }
 0xce1   :  { %v4517_v23 = vpack.c.bf16 %v4516_v55, %v4515_v21 }
 0xce3   :  { %5226 = vmatmul.mubr.msk.bf16.vlgmr.msra.gmra.mrb[68].mxu0 %vm122_vm1, %v4517_v23 }
 0xce4   :  { %5245 = vmatprep.mubr.msk.bf16.mxu0 %vm5392_vm0, %v5391_v0  ;;  %5238 = vmatpush3.bf16.msra.mxu0 %v5307_v35 }
 0xce5   :  { %5239 = vmatprep.subr.bf16.mxu0 %v5391_v0 }
 0xce8   :  { %5240 = vmatpush3.bf16.msra.mxu0 %v5308_v7  ;;  %v4808_v7 = vrot.slane %v49_v2, %v2334_v43 }
 0xce9   :  { %5241 = vmatprep.subr.bf16.mxu0 %v5391_v0 }
 0xcec   :  { %5242 = vmatpush3.bf16.msra.mxu0 %v5309_v49 }
 0xced   :  { %5243 = vmatprep.subr.bf16.mxu0 %v5391_v0 }
 0xcf0   :  { %5244 = vmatpush3.bf16.msra.mxu0 %v5310_v48 }
 0xdb6   :  { %v4575_v12 = vpop.f32.mrb[68].mxu0 }
 0xdb7   :  { %v4576_v8 = vadd.f32 %v4575_v12, %v4525_v51  ;;  %v5227_v39 = vpop.f32.mrb[69].mxu0 }
 0xdb8   :  { %v4578_v25 = vpop.f32.mrb[70].mxu0 }
 0xdb9   :  { %v4579_v26 = vadd.f32 %v4578_v25, %v4525_v51  ;;  %v5228_v32 = vpop.f32.mrb[71].mxu0  ;;  %v4582_v36 = vadd.f32 %v4576_v8, %v5997_v27 }
 0xdbb   :  { %v4584_v13 = vsel %vm122_vm1, %v4582_v36, 0.0  ;;  %v4583_v20 = vadd.f32 %v4579_v26, %v5999_v15  ;;  %v5305_v15 = vld [vmem:[%s6469_s9] sm:$0xff]  }
 0xdbc   :  { %4585 = vadd.xlane.f32.xlu0 %v4584_v13  ;;  %5230 = vmatpush3.bf16.msra.mxu1 %v5305_v15 }
 0xdbd   :  { %v4587_v28 = vsel %vm122_vm1, %v4583_v20, 0.0  ;;  %5231 = vmatprep.subr.bf16.mxu1 %v5391_v0  ;;  %v4701_v0 = vrot.slane %v49_v2, %v2317_v17 }
 0xdbe   :  { %4588 = vadd.xlane.f32.xlu1 %v4587_v28 }
 0xdc0   :  { %5232 = vmatpush3.bf16.msra.mxu1 %v5306_v46  ;;  %v4802_v46 = vrot.slane %v49_v2, %v2323_v33 }
 0xe49   :  { %v4586_v52 = vpop.xlane.xlu0 %4585 }
 0xe4a   :  { %v4590_v16 = vmul.f32 0.03125, %v4586_v52 }
 0xe4b   :  { %v4589_v29 = vpop.xlane.xlu1 %4588 }
 0xe4c   :  { %v4592_v30 = vsub.f32 %v4582_v36, %v4590_v16  ;;  %v4591_v22 = vmul.f32 0.03125, %v4589_v29 }
 0xe4e   :  { %v4593_v44 = vsub.f32 %v4583_v20, %v4591_v22  ;;  %v4594_v54 = vmul.f32 %v4592_v30, %v4592_v30 }
 0xe50   :  { %v4596_v40 = vsel %vm122_vm1, %v4594_v54, 0.0  ;;  %v4595_v10 = vmul.f32 %v4593_v44, %v4593_v44 }
 0xe51   :  { %4597 = vadd.xlane.f32.xlu0 %v4596_v40 }
 0xe52   :  { %v4599_v27 = vsel %vm122_vm1, %v4595_v10, 0.0 }
 0xe55   :  { %4600 = vadd.xlane.f32.xlu0 %v4599_v27 }
 0xede   :  { %v4598_v14 = vpop.xlane.xlu0 %4597 }
 0xedf   :  { %v4602_v1 = vmul.f32 0.03125, %v4598_v14 }
 0xee1   :  { %v4604_v41 = vadd.f32 1e-05, %v4602_v1 }
 0xee2   :  { %v4601_v45 = vpop.xlane.xlu0 %4600 }
 0xee3   :  { %5380 = vrsqrt.f32 %v4604_v41  ;;  %v4603_v34 = vmul.f32 0.03125, %v4601_v45 }
 0xee5   :  { %v4605_v9 = vadd.f32 1e-05, %v4603_v34 }
 0xee7   :  { %5382 = vrsqrt.f32 %v4605_v9 }
 0xeed   :  { %v5381_v42 = vpop.eup %5380 }
 0xeee   :  { %v4608_v62 = vmul.f32 %v5381_v42, %v4592_v30 }
 0xef0   :  { %v4614_v56 = vmul.f32 %v4613_v18, %v4608_v62 }
 0xef1   :  { %v5383_v63 = vpop.eup %5382 }
 0xef2   :  { %v4609_v58 = vmul.f32 %v5383_v63, %v4593_v44  ;;  %v4620_v57 = vadd.f32 %v4619_v38, %v4614_v56 }
 0xef4   :  { %v4615_v37 = vmul.f32 %v4613_v18, %v4609_v58 }
 0xef6   :  { %v4621_v59 = vadd.f32 %v4619_v38, %v4615_v37 }
 0xef8   :  { %v4622_v60 = vpack.c.bf16 %v4621_v59, %v4620_v57 }
 0xefa   :  { %5234 = vmatmul.mubr.msk.bf16.vlgmr.msra.gmra.mrb[76].mxu1 %vm122_vm1, %v4622_v60 }
 0xfcd   :  { %v4680_v47 = vpop.f32.mrb[76].mxu1 }
 0xfce   :  { %v4681_v4 = vadd.f32 %v4680_v47, %v4630_v6  ;;  %v5235_v53 = vpop.f32.mrb[77].mxu1 }
 0xfcf   :  { %v4683_v24 = vpop.f32.mrb[78].mxu1 }
 0xfd0   :  { %v4684_v61 = vadd.f32 %v4683_v24, %v4630_v6  ;;  %v5236_v3 = vpop.f32.mrb[79].mxu1  ;;  %v4687_v21 = vmax.f32 %v4681_v4, 0.0 }
 0xfd2   :  { %v4688_v55 = vmax.f32 %v4684_v61, 0.0 }
 0xfd4   :  { %v4689_v23 = vpack.c.bf16 %v4688_v55, %v4687_v21 }
 0xfd6   :  { %5246 = vmatmul.mubr.msk.bf16.vlgmr.msra.gmra.mrb[72].mxu0 %vm4726_vm7, %v4689_v23 }
0x10a9   :  { %v4764_v50 = vpop.f32.mrb[72].mxu0 }
0x10aa   :  { %v4765_v11 = vadd.f32 %v4764_v50, %v4701_v0  ;;  %v5247_v51 = vpop.f32.mrb[73].mxu0 }
0x10ab   :  { %v4767_v12 = vpop.f32.mrb[74].mxu0 }
0x10ac   :  { %v4768_v8 = vadd.f32 %v4767_v12, %v4701_v0  ;;  %v5248_v19 = vpop.f32.mrb[75].mxu0  ;;  %v4771_v39 = vadd.f32 %v4765_v11, %v4620_v57 }
0x10ae   :  { %v4773_v25 = vsel %vm122_vm1, %v4771_v39, 0.0  ;;  %v4772_v26 = vadd.f32 %v4768_v8, %v4621_v59 }
0x10af   :  { %4774 = vadd.xlane.f32.xlu1 %v4773_v25 }
0x10b0   :  { %v4776_v32 = vsel %vm122_vm1, %v4772_v26, 0.0 }
0x10b1   :  { %4777 = vadd.xlane.f32.xlu0 %v4776_v32 }
0x113c   :  { %v4775_v36 = vpop.xlane.xlu1 %4774 }
0x113d   :  { %v4779_v13 = vmul.f32 0.03125, %v4775_v36 }
0x113e   :  { %v4778_v20 = vpop.xlane.xlu0 %4777 }
0x113f   :  { %v4781_v28 = vsub.f32 %v4771_v39, %v4779_v13  ;;  %v4780_v52 = vmul.f32 0.03125, %v4778_v20 }
0x1141   :  { %v4782_v17 = vsub.f32 %v4772_v26, %v4780_v52  ;;  %v4783_v16 = vmul.f32 %v4781_v28, %v4781_v28 }
0x1143   :  { %v4785_v29 = vsel %vm122_vm1, %v4783_v16, 0.0  ;;  %v4784_v30 = vmul.f32 %v4782_v17, %v4782_v17 }
0x1144   :  { %4786 = vadd.xlane.f32.xlu1 %v4785_v29 }
0x1145   :  { %v4788_v22 = vsel %vm122_vm1, %v4784_v30, 0.0 }
0x1146   :  { %4789 = vadd.xlane.f32.xlu0 %v4788_v22 }
0x11d1   :  { %v4787_v44 = vpop.xlane.xlu1 %4786 }
0x11d2   :  { %v4791_v54 = vmul.f32 0.03125, %v4787_v44 }
0x11d3   :  { %v4790_v40 = vpop.xlane.xlu0 %4789 }
0x11d4   :  { %v4793_v10 = vadd.f32 1e-05, %v4791_v54  ;;  %v4792_v27 = vmul.f32 0.03125, %v4790_v40 }
0x11d6   :  { %5384 = vrsqrt.f32 %v4793_v10  ;;  %v4794_v15 = vadd.f32 1e-05, %v4792_v27 }
0x11d8   :  { %5386 = vrsqrt.f32 %v4794_v15 }
0x11e0   :  { %v5385_v35 = vpop.eup %5384 }
0x11e1   :  { %v4797_v14 = vmul.f32 %v5385_v35, %v4781_v28 }
0x11e2   :  { %v5387_v1 = vpop.eup %5386 }
0x11e3   :  { %v4803_v41 = vmul.f32 %v4802_v46, %v4797_v14  ;;  %v4798_v45 = vmul.f32 %v5387_v1, %v4782_v17 }
0x11e5   :  { %v4809_v34 = vadd.f32 %v4808_v7, %v4803_v41  ;;  %v4804_v9 = vmul.f32 %v4802_v46, %v4798_v45 }
0x11e7   :  { %v4811_v31 = vpack.c.bf16 %v4809_v34, %v4809_v34  ;;  %v4810_v42 = vadd.f32 %v4808_v7, %v4804_v9 }
0x11e9   :  { %4814 = vst.msk [vmem:[%s6471_s12] sm:$0xf] %vm4813_vm8, %v4811_v31  ;;  %v4812_v18 = vpack.c.bf16 %v4810_v42, %v4810_v42 }
0x11eb   :  { %4815 = vst.msk [vmem:[%s6471_s12 + $0x4] sm:$0xf] %vm4813_vm8, %v4812_v18 }

</bundles_post_ra>
